<compile_context>
chip_gen: v6e
topology: v6e:2x2x1
jax: 0.10.0
libtpu: 0.0.40
codegen_flags: <defaults>
</compile_context>

<pallas_src>
import jax
import jax.numpy as jnp
from jax.experimental import pallas as pl
from jax.experimental.pallas import tpu as pltpu

_EPS = 1e-5


def _resnet_block_kernel(x_ref, w1_ref, w2_ref, o_ref, pad_ref, col_ref):
    """Fused: reflect-pad -> conv3x3 -> IN -> ReLU -> reflect-pad -> conv3x3 -> IN -> +x."""
    _, H, W, C = x_ref.shape
    HW = H * W

    def reflect_into_pad(t):
        # Fill interior, then the reflected 1-pixel border, of the shared f32
        # VMEM slab.  Rows first, then columns, so the corners pick up the
        # double reflection (matches torch.nn.ReflectionPad2d(1)).
        pad_ref[1:H + 1, 1:W + 1, :] = t
        pad_ref[0:1, 1:W + 1, :] = t[1:2]                      # top    <- row 1
        pad_ref[H + 1:H + 2, 1:W + 1, :] = t[H - 2:H - 1]      # bottom <- row H-2
        pad_ref[:, 0:1, :] = pad_ref[:, 2:3, :]                # left   <- col 1
        pad_ref[:, W + 1:W + 2, :] = pad_ref[:, W - 1:W, :]    # right  <- col W-2

    def conv3x3_instance_norm(w_ref):
        # im2col into a bf16 VMEM scratch: one window copy per tap, no value
        # reshapes of strided slices.  Tap order (kh, kw, c_in) matches the
        # (3,3,Cin,Cout) -> (9*Cin, Cout) weight reshape done in the wrapper.
        for kh in range(3):
            for kw in range(3):
                tap = kh * 3 + kw
                col_ref[:, :, tap * C:(tap + 1) * C] = (
                    pad_ref[kh:kh + H, kw:kw + W, :].astype(jnp.bfloat16))
        patches = col_ref[...].reshape(HW, 9 * C)              # bf16, cheap leading-dim merge
        # Single deep-K bf16 matmul, f32 accumulation on the MXU.
        acc = jnp.dot(patches, w_ref[...],
                      preferred_element_type=jnp.float32)      # (HW, C) f32
        # Two-pass instance-norm statistics (biased variance, eps=1e-5), f32.
        mean = jnp.mean(acc, axis=0, keepdims=True)
        centered = acc - mean
        var = jnp.mean(centered * centered, axis=0, keepdims=True)
        return centered * jax.lax.rsqrt(var + _EPS)            # (HW, C) f32

    reflect_into_pad(x_ref[0])
    h = jnp.maximum(conv3x3_instance_norm(w1_ref), 0.0)        # conv -> IN -> ReLU
    # TODO(synk): production scale (C=256, H=W>=64) needs row-tiling with a
    # 1-row halo + multi-step (two-phase) instance norm, chunked f32 VMEM
    # accumulation, and lane padding when C < 128; the dropout branch
    # (use_dropout=True) is also not implemented (default config is False).
    reflect_into_pad(h.reshape(H, W, C))                       # h stays on-chip (VMEM)
    y = conv3x3_instance_norm(w2_ref)                          # conv -> IN
    o_ref[0] = x_ref[0] + y.reshape(H, W, C)                   # residual add


def _resnet_block_fused(x_nhwc, w1_hwio, w2_hwio):
    N, H, W, C = x_nhwc.shape
    assert H >= 2 and W >= 2, "ReflectionPad2d(1) requires H, W >= 2"
    # Weights: HWIO (3,3,Cin,Cout) -> (9*Cin, Cout), cast to bf16 for the MXU
    # (f32 accumulation is requested inside the kernel).
    w1_2d = w1_hwio.reshape(9 * C, C).astype(jnp.bfloat16)
    w2_2d = w2_hwio.reshape(9 * C, C).astype(jnp.bfloat16)
    return pl.pallas_call(
        _resnet_block_kernel,
        out_shape=jax.ShapeDtypeStruct((N, H, W, C), jnp.float32),
        grid=(N,),
        in_specs=[
            pl.BlockSpec((1, H, W, C), lambda n: (n, 0, 0, 0)),
            pl.BlockSpec((9 * C, C), lambda n: (0, 0)),
            pl.BlockSpec((9 * C, C), lambda n: (0, 0)),
        ],
        out_specs=pl.BlockSpec((1, H, W, C), lambda n: (n, 0, 0, 0)),
        scratch_shapes=[
            pltpu.VMEM((H + 2, W + 2, C), jnp.float32),        # shared padded slab
            pltpu.VMEM((H, W, 9 * C), jnp.bfloat16),           # im2col patches (bf16)
        ],
        compiler_params=pltpu.CompilerParams(
            dimension_semantics=("parallel",),                 # one image per TC (megacore / v7x)
            vmem_limit_bytes=32 * 1024 * 1024),                # TODO(synk): re-derive per tile size / chip generation
    )(x_nhwc, w1_2d, w2_2d)


@jax.jit
def resnet_block_forward(x_nchw, w1, b1, w2, b2):
    """ResnetBlock.forward: x + conv_block(x). Input/output are NCHW (PyTorch).

    b1/b2 are accepted for interface parity but not used by the kernel:
    InstanceNorm2d(affine=False) cancels a per-channel conv bias exactly.
    """
    del b1, b2
    # TODO(synk): if the surrounding model can stay NHWC, drop these transposes
    # (they are full HBM read+write passes per block).
    x = jnp.transpose(x_nchw, (0, 2, 3, 1)).astype(jnp.float32)   # NCHW -> NHWC
    out = _resnet_block_fused(x, w1, w2)
    return jnp.transpose(out, (0, 3, 1, 2))                       # NHWC -> NCHW


def _reference_forward(x_nchw, w1, b1, w2, b2):
    """Pure-JAX reference (with biases; same bf16-conv / f32-accumulate policy)."""
    x = jnp.transpose(x_nchw, (0, 2, 3, 1)).astype(jnp.float32)

    def conv_in(inp, w, b):
        xp = jnp.pad(inp.astype(jnp.bfloat16),
                     ((0, 0), (1, 1), (1, 1), (0, 0)), mode="reflect")
        y = jax.lax.conv_general_dilated(
            xp, w.astype(jnp.bfloat16), (1, 1), "VALID",
            dimension_numbers=("NHWC", "HWIO", "NHWC"),
            preferred_element_type=jnp.float32) + b
        mean = jnp.mean(y, axis=(1, 2), keepdims=True)
        var = jnp.mean((y - mean) ** 2, axis=(1, 2), keepdims=True)
        return (y - mean) * jax.lax.rsqrt(var + _EPS)

    h = jnp.maximum(conv_in(x, w1, b1), 0.0)
    out = x + conv_in(h, w2, b2)
    return jnp.transpose(out, (0, 3, 1, 2))


if __name__ == "__main__":
    dim = 4            # channels
    N, H, W = 2, 16, 16

    key = jax.random.PRNGKey(0)
    k_x, k_w1, k_b1, k_w2, k_b2 = jax.random.split(key, 5)

    x = jax.random.normal(k_x, (N, dim, H, W), dtype=jnp.float32)      # NCHW
    # Conv weights in HWIO layout (3, 3, C_in, C_out); a PyTorch OIHW weight
    # maps here via transpose(2, 3, 1, 0).
    w1 = 0.1 * jax.random.normal(k_w1, (3, 3, dim, dim), dtype=jnp.float32)
    b1 = 0.1 * jax.random.normal(k_b1, (dim,), dtype=jnp.float32)
    w2 = 0.1 * jax.random.normal(k_w2, (3, 3, dim, dim), dtype=jnp.float32)
    b2 = 0.1 * jax.random.normal(k_b2, (dim,), dtype=jnp.float32)

    out = resnet_block_forward(x, w1, b1, w2, b2)
    out = jax.block_until_ready(out)

    ref = _reference_forward(x, w1, b1, w2, b2)
    assert out.shape == x.shape and out.dtype == jnp.float32
    assert jnp.allclose(out, ref, atol=2e-3, rtol=2e-3), "mismatch vs JAX reference"

    print("KERNEL_OK")
</pallas_src>

<mosaic_0001>
module attributes {stable_mosaic.version = 11 : i64} {
  func.func @_resnet_block_kernel(%arg0: i32, %arg1: memref<1x16x16x4xf32, #tpu.memory_space<vmem>>, %arg2: memref<36x4xbf16, #tpu.memory_space<vmem>>, %arg3: memref<36x4xbf16, #tpu.memory_space<vmem>>, %arg4: memref<1x16x16x4xf32, #tpu.memory_space<vmem>>, %arg5: memref<18x18x4xf32, #tpu.memory_space<vmem>>, %arg6: memref<16x16x36xbf16, #tpu.memory_space<vmem>>) attributes {dimension_semantics = [#tpu.dimension_semantics<parallel>], iteration_bounds = array<i64: 2>, scalar_prefetch = 0 : i64, scratch_operands = 2 : i64, tpu.core_type = #tpu.core_type<tc>, window_params = [{transform_indices = @transform_0, window_bounds = array<i64: 1, 16, 16, 4>}, {pipeline_mode = #tpu.pipeline_mode<synchronous>, transform_indices = @transform_1, window_bounds = array<i64: 36, 4>}, {pipeline_mode = #tpu.pipeline_mode<synchronous>, transform_indices = @transform_2, window_bounds = array<i64: 36, 4>}, {transform_indices = @transform_3, window_bounds = array<i64: 1, 16, 16, 4>}]} {
    %c0 = arith.constant 0 : index
    %c0_0 = arith.constant 0 : index
    %c0_1 = arith.constant 0 : index
    %c0_2 = arith.constant 0 : index
    %0 = vector.load %arg1[%c0, %c0_0, %c0_1, %c0_2] : memref<1x16x16x4xf32, #tpu.memory_space<vmem>>, vector<1x16x16x4xf32>
    %1 = vector.shape_cast %0 : vector<1x16x16x4xf32> to vector<16x16x4xf32>
    %c1 = arith.constant 1 : index
    %c1_3 = arith.constant 1 : index
    %c0_4 = arith.constant 0 : index
    %2 = vector.load %arg5[%c1, %c1_3, %c0_4] : memref<18x18x4xf32, #tpu.memory_space<vmem>>, vector<16x16x4xf32>
    tpu.vector_store %arg5[%c1, %c1_3, %c0_4], %1 {strides = array<i32>} : memref<18x18x4xf32, #tpu.memory_space<vmem>>, vector<16x16x4xf32>,
    %3 = vector.extract_strided_slice %1 {offsets = [1, 0, 0], sizes = [1, 16, 4], strides = [1, 1, 1]} : vector<16x16x4xf32> to vector<1x16x4xf32>
    %c0_5 = arith.constant 0 : index
    %c1_6 = arith.constant 1 : index
    %c0_7 = arith.constant 0 : index
    %4 = vector.load %arg5[%c0_5, %c1_6, %c0_7] : memref<18x18x4xf32, #tpu.memory_space<vmem>>, vector<1x16x4xf32>
    tpu.vector_store %arg5[%c0_5, %c1_6, %c0_7], %3 {strides = array<i32>} : memref<18x18x4xf32, #tpu.memory_space<vmem>>, vector<1x16x4xf32>,
    %5 = vector.extract_strided_slice %1 {offsets = [14, 0, 0], sizes = [1, 16, 4], strides = [1, 1, 1]} : vector<16x16x4xf32> to vector<1x16x4xf32>
    %c17 = arith.constant 17 : index
    %c1_8 = arith.constant 1 : index
    %c0_9 = arith.constant 0 : index
    %6 = vector.load %arg5[%c17, %c1_8, %c0_9] : memref<18x18x4xf32, #tpu.memory_space<vmem>>, vector<1x16x4xf32>
    tpu.vector_store %arg5[%c17, %c1_8, %c0_9], %5 {strides = array<i32>} : memref<18x18x4xf32, #tpu.memory_space<vmem>>, vector<1x16x4xf32>,
    %c0_10 = arith.constant 0 : index
    %c2 = arith.constant 2 : index
    %c0_11 = arith.constant 0 : index
    %7 = vector.load %arg5[%c0_10, %c2, %c0_11] : memref<18x18x4xf32, #tpu.memory_space<vmem>>, vector<18x1x4xf32>
    %c0_12 = arith.constant 0 : index
    %c0_13 = arith.constant 0 : index
    %c0_14 = arith.constant 0 : index
    %8 = vector.load %arg5[%c0_12, %c0_13, %c0_14] : memref<18x18x4xf32, #tpu.memory_space<vmem>>, vector<18x1x4xf32>
    tpu.vector_store %arg5[%c0_12, %c0_13, %c0_14], %7 {strides = array<i32>} : memref<18x18x4xf32, #tpu.memory_space<vmem>>, vector<18x1x4xf32>,
    %c0_15 = arith.constant 0 : index
    %c15 = arith.constant 15 : index
    %c0_16 = arith.constant 0 : index
    %9 = vector.load %arg5[%c0_15, %c15, %c0_16] : memref<18x18x4xf32, #tpu.memory_space<vmem>>, vector<18x1x4xf32>
    %c0_17 = arith.constant 0 : index
    %c17_18 = arith.constant 17 : index
    %c0_19 = arith.constant 0 : index
    %10 = vector.load %arg5[%c0_17, %c17_18, %c0_19] : memref<18x18x4xf32, #tpu.memory_space<vmem>>, vector<18x1x4xf32>
    tpu.vector_store %arg5[%c0_17, %c17_18, %c0_19], %9 {strides = array<i32>} : memref<18x18x4xf32, #tpu.memory_space<vmem>>, vector<18x1x4xf32>,
    %c0_20 = arith.constant 0 : index
    %c0_21 = arith.constant 0 : index
    %c0_22 = arith.constant 0 : index
    %11 = vector.load %arg5[%c0_20, %c0_21, %c0_22] : memref<18x18x4xf32, #tpu.memory_space<vmem>>, vector<16x16x4xf32>
    %12 = arith.truncf %11 : vector<16x16x4xf32> to vector<16x16x4xbf16>
    %c0_23 = arith.constant 0 : index
    %c0_24 = arith.constant 0 : index
    %c0_25 = arith.constant 0 : index
    %13 = vector.load %arg6[%c0_23, %c0_24, %c0_25] : memref<16x16x36xbf16, #tpu.memory_space<vmem>>, vector<16x16x4xbf16>
    tpu.vector_store %arg6[%c0_23, %c0_24, %c0_25], %12 {strides = array<i32>} : memref<16x16x36xbf16, #tpu.memory_space<vmem>>, vector<16x16x4xbf16>,
    %c0_26 = arith.constant 0 : index
    %c1_27 = arith.constant 1 : index
    %c0_28 = arith.constant 0 : index
    %14 = vector.load %arg5[%c0_26, %c1_27, %c0_28] : memref<18x18x4xf32, #tpu.memory_space<vmem>>, vector<16x16x4xf32>
    %15 = arith.truncf %14 : vector<16x16x4xf32> to vector<16x16x4xbf16>
    %c0_29 = arith.constant 0 : index
    %c0_30 = arith.constant 0 : index
    %c4 = arith.constant 4 : index
    %16 = vector.load %arg6[%c0_29, %c0_30, %c4] : memref<16x16x36xbf16, #tpu.memory_space<vmem>>, vector<16x16x4xbf16>
    tpu.vector_store %arg6[%c0_29, %c0_30, %c4], %15 {strides = array<i32>} : memref<16x16x36xbf16, #tpu.memory_space<vmem>>, vector<16x16x4xbf16>,
    %c0_31 = arith.constant 0 : index
    %c2_32 = arith.constant 2 : index
    %c0_33 = arith.constant 0 : index
    %17 = vector.load %arg5[%c0_31, %c2_32, %c0_33] : memref<18x18x4xf32, #tpu.memory_space<vmem>>, vector<16x16x4xf32>
    %18 = arith.truncf %17 : vector<16x16x4xf32> to vector<16x16x4xbf16>
    %c0_34 = arith.constant 0 : index
    %c0_35 = arith.constant 0 : index
    %c8 = arith.constant 8 : index
    %19 = vector.load %arg6[%c0_34, %c0_35, %c8] : memref<16x16x36xbf16, #tpu.memory_space<vmem>>, vector<16x16x4xbf16>
    tpu.vector_store %arg6[%c0_34, %c0_35, %c8], %18 {strides = array<i32>} : memref<16x16x36xbf16, #tpu.memory_space<vmem>>, vector<16x16x4xbf16>,
    %c1_36 = arith.constant 1 : index
    %c0_37 = arith.constant 0 : index
    %c0_38 = arith.constant 0 : index
    %20 = vector.load %arg5[%c1_36, %c0_37, %c0_38] : memref<18x18x4xf32, #tpu.memory_space<vmem>>, vector<16x16x4xf32>
    %21 = arith.truncf %20 : vector<16x16x4xf32> to vector<16x16x4xbf16>
    %c0_39 = arith.constant 0 : index
    %c0_40 = arith.constant 0 : index
    %c12 = arith.constant 12 : index
    %22 = vector.load %arg6[%c0_39, %c0_40, %c12] : memref<16x16x36xbf16, #tpu.memory_space<vmem>>, vector<16x16x4xbf16>
    tpu.vector_store %arg6[%c0_39, %c0_40, %c12], %21 {strides = array<i32>} : memref<16x16x36xbf16, #tpu.memory_space<vmem>>, vector<16x16x4xbf16>,
    %c1_41 = arith.constant 1 : index
    %c1_42 = arith.constant 1 : index
    %c0_43 = arith.constant 0 : index
    %23 = vector.load %arg5[%c1_41, %c1_42, %c0_43] : memref<18x18x4xf32, #tpu.memory_space<vmem>>, vector<16x16x4xf32>
    %24 = arith.truncf %23 : vector<16x16x4xf32> to vector<16x16x4xbf16>
    %c0_44 = arith.constant 0 : index
    %c0_45 = arith.constant 0 : index
    %c16 = arith.constant 16 : index
    %25 = vector.load %arg6[%c0_44, %c0_45, %c16] : memref<16x16x36xbf16, #tpu.memory_space<vmem>>, vector<16x16x4xbf16>
    tpu.vector_store %arg6[%c0_44, %c0_45, %c16], %24 {strides = array<i32>} : memref<16x16x36xbf16, #tpu.memory_space<vmem>>, vector<16x16x4xbf16>,
    %c1_46 = arith.constant 1 : index
    %c2_47 = arith.constant 2 : index
    %c0_48 = arith.constant 0 : index
    %26 = vector.load %arg5[%c1_46, %c2_47, %c0_48] : memref<18x18x4xf32, #tpu.memory_space<vmem>>, vector<16x16x4xf32>
    %27 = arith.truncf %26 : vector<16x16x4xf32> to vector<16x16x4xbf16>
    %c0_49 = arith.constant 0 : index
    %c0_50 = arith.constant 0 : index
    %c20 = arith.constant 20 : index
    %28 = vector.load %arg6[%c0_49, %c0_50, %c20] : memref<16x16x36xbf16, #tpu.memory_space<vmem>>, vector<16x16x4xbf16>
    tpu.vector_store %arg6[%c0_49, %c0_50, %c20], %27 {strides = array<i32>} : memref<16x16x36xbf16, #tpu.memory_space<vmem>>, vector<16x16x4xbf16>,
    %c2_51 = arith.constant 2 : index
    %c0_52 = arith.constant 0 : index
    %c0_53 = arith.constant 0 : index
    %29 = vector.load %arg5[%c2_51, %c0_52, %c0_53] : memref<18x18x4xf32, #tpu.memory_space<vmem>>, vector<16x16x4xf32>
    %30 = arith.truncf %29 : vector<16x16x4xf32> to vector<16x16x4xbf16>
    %c0_54 = arith.constant 0 : index
    %c0_55 = arith.constant 0 : index
    %c24 = arith.constant 24 : index
    %31 = vector.load %arg6[%c0_54, %c0_55, %c24] : memref<16x16x36xbf16, #tpu.memory_space<vmem>>, vector<16x16x4xbf16>
    tpu.vector_store %arg6[%c0_54, %c0_55, %c24], %30 {strides = array<i32>} : memref<16x16x36xbf16, #tpu.memory_space<vmem>>, vector<16x16x4xbf16>,
    %c2_56 = arith.constant 2 : index
    %c1_57 = arith.constant 1 : index
    %c0_58 = arith.constant 0 : index
    %32 = vector.load %arg5[%c2_56, %c1_57, %c0_58] : memref<18x18x4xf32, #tpu.memory_space<vmem>>, vector<16x16x4xf32>
    %33 = arith.truncf %32 : vector<16x16x4xf32> to vector<16x16x4xbf16>
    %c0_59 = arith.constant 0 : index
    %c0_60 = arith.constant 0 : index
    %c28 = arith.constant 28 : index
    %34 = vector.load %arg6[%c0_59, %c0_60, %c28] : memref<16x16x36xbf16, #tpu.memory_space<vmem>>, vector<16x16x4xbf16>
    tpu.vector_store %arg6[%c0_59, %c0_60, %c28], %33 {strides = array<i32>} : memref<16x16x36xbf16, #tpu.memory_space<vmem>>, vector<16x16x4xbf16>,
    %c2_61 = arith.constant 2 : index
    %c2_62 = arith.constant 2 : index
    %c0_63 = arith.constant 0 : index
    %35 = vector.load %arg5[%c2_61, %c2_62, %c0_63] : memref<18x18x4xf32, #tpu.memory_space<vmem>>, vector<16x16x4xf32>
    %36 = arith.truncf %35 : vector<16x16x4xf32> to vector<16x16x4xbf16>
    %c0_64 = arith.constant 0 : index
    %c0_65 = arith.constant 0 : index
    %c32 = arith.constant 32 : index
    %37 = vector.load %arg6[%c0_64, %c0_65, %c32] : memref<16x16x36xbf16, #tpu.memory_space<vmem>>, vector<16x16x4xbf16>
    tpu.vector_store %arg6[%c0_64, %c0_65, %c32], %36 {strides = array<i32>} : memref<16x16x36xbf16, #tpu.memory_space<vmem>>, vector<16x16x4xbf16>,
    %c0_66 = arith.constant 0 : index
    %c0_67 = arith.constant 0 : index
    %c0_68 = arith.constant 0 : index
    %38 = vector.load %arg6[%c0_66, %c0_67, %c0_68] : memref<16x16x36xbf16, #tpu.memory_space<vmem>>, vector<16x16x36xbf16>
    %39 = vector.shape_cast %38 : vector<16x16x36xbf16> to vector<256x36xbf16>
    %c0_69 = arith.constant 0 : index
    %c0_70 = arith.constant 0 : index
    %40 = vector.load %arg2[%c0_69, %c0_70] : memref<36x4xbf16, #tpu.memory_space<vmem>>, vector<36x4xbf16>
    %cst = arith.constant dense<0.000000e+00> : vector<256x4xf32>
    %41 = tpu.matmul %39, %40, %cst {dimension_numbers = #tpu.dot_dimension_numbers<[1], [0], [0], [1], [0, 0, 1, 1], [], []>} : vector<256x36xbf16>, vector<36x4xbf16>, vector<256x4xf32> -> vector<256x4xf32>
    %cst_71 = arith.constant dense<0.000000e+00> : vector<4xf32>
    %42 = vector.multi_reduction <add>, %41, %cst_71 [0] : vector<256x4xf32> to vector<4xf32>
    %43 = vector.shape_cast %42 : vector<4xf32> to vector<1x4xf32>
    %cst_72 = arith.constant 2.560000e+02 : f32
    %44 = vector.broadcast %cst_72 : f32 to vector<1x4xf32>
    %45 = arith.divf %43, %44 : vector<1x4xf32>
    %46 = vector.broadcast %45 : vector<1x4xf32> to vector<256x4xf32>
    %47 = arith.subf %41, %46 : vector<256x4xf32>
    %48 = arith.mulf %47, %47 : vector<256x4xf32>
    %cst_73 = arith.constant dense<0.000000e+00> : vector<4xf32>
    %49 = vector.multi_reduction <add>, %48, %cst_73 [0] : vector<256x4xf32> to vector<4xf32>
    %50 = vector.shape_cast %49 : vector<4xf32> to vector<1x4xf32>
    %cst_74 = arith.constant 2.560000e+02 : f32
    %51 = vector.broadcast %cst_74 : f32 to vector<1x4xf32>
    %52 = arith.divf %50, %51 : vector<1x4xf32>
    %cst_75 = arith.constant 9.99999974E-6 : f32
    %53 = vector.broadcast %cst_75 : f32 to vector<1x4xf32>
    %54 = arith.addf %52, %53 : vector<1x4xf32>
    %55 = math.rsqrt %54 : vector<1x4xf32>
    %56 = vector.broadcast %55 : vector<1x4xf32> to vector<256x4xf32>
    %57 = arith.mulf %47, %56 : vector<256x4xf32>
    %cst_76 = arith.constant 0.000000e+00 : f32
    %58 = vector.broadcast %cst_76 : f32 to vector<256x4xf32>
    %59 = arith.maximumf %57, %58 : vector<256x4xf32>
    %60 = vector.shape_cast %59 : vector<256x4xf32> to vector<16x16x4xf32>
    %c1_77 = arith.constant 1 : index
    %c1_78 = arith.constant 1 : index
    %c0_79 = arith.constant 0 : index
    %61 = vector.load %arg5[%c1_77, %c1_78, %c0_79] : memref<18x18x4xf32, #tpu.memory_space<vmem>>, vector<16x16x4xf32>
    tpu.vector_store %arg5[%c1_77, %c1_78, %c0_79], %60 {strides = array<i32>} : memref<18x18x4xf32, #tpu.memory_space<vmem>>, vector<16x16x4xf32>,
    %62 = vector.extract_strided_slice %60 {offsets = [1, 0, 0], sizes = [1, 16, 4], strides = [1, 1, 1]} : vector<16x16x4xf32> to vector<1x16x4xf32>
    %c0_80 = arith.constant 0 : index
    %c1_81 = arith.constant 1 : index
    %c0_82 = arith.constant 0 : index
    %63 = vector.load %arg5[%c0_80, %c1_81, %c0_82] : memref<18x18x4xf32, #tpu.memory_space<vmem>>, vector<1x16x4xf32>
    tpu.vector_store %arg5[%c0_80, %c1_81, %c0_82], %62 {strides = array<i32>} : memref<18x18x4xf32, #tpu.memory_space<vmem>>, vector<1x16x4xf32>,
    %64 = vector.extract_strided_slice %60 {offsets = [14, 0, 0], sizes = [1, 16, 4], strides = [1, 1, 1]} : vector<16x16x4xf32> to vector<1x16x4xf32>
    %c17_83 = arith.constant 17 : index
    %c1_84 = arith.constant 1 : index
    %c0_85 = arith.constant 0 : index
    %65 = vector.load %arg5[%c17_83, %c1_84, %c0_85] : memref<18x18x4xf32, #tpu.memory_space<vmem>>, vector<1x16x4xf32>
    tpu.vector_store %arg5[%c17_83, %c1_84, %c0_85], %64 {strides = array<i32>} : memref<18x18x4xf32, #tpu.memory_space<vmem>>, vector<1x16x4xf32>,
    %c0_86 = arith.constant 0 : index
    %c2_87 = arith.constant 2 : index
    %c0_88 = arith.constant 0 : index
    %66 = vector.load %arg5[%c0_86, %c2_87, %c0_88] : memref<18x18x4xf32, #tpu.memory_space<vmem>>, vector<18x1x4xf32>
    %c0_89 = arith.constant 0 : index
    %c0_90 = arith.constant 0 : index
    %c0_91 = arith.constant 0 : index
    %67 = vector.load %arg5[%c0_89, %c0_90, %c0_91] : memref<18x18x4xf32, #tpu.memory_space<vmem>>, vector<18x1x4xf32>
    tpu.vector_store %arg5[%c0_89, %c0_90, %c0_91], %66 {strides = array<i32>} : memref<18x18x4xf32, #tpu.memory_space<vmem>>, vector<18x1x4xf32>,
    %c0_92 = arith.constant 0 : index
    %c15_93 = arith.constant 15 : index
    %c0_94 = arith.constant 0 : index
    %68 = vector.load %arg5[%c0_92, %c15_93, %c0_94] : memref<18x18x4xf32, #tpu.memory_space<vmem>>, vector<18x1x4xf32>
    %c0_95 = arith.constant 0 : index
    %c17_96 = arith.constant 17 : index
    %c0_97 = arith.constant 0 : index
    %69 = vector.load %arg5[%c0_95, %c17_96, %c0_97] : memref<18x18x4xf32, #tpu.memory_space<vmem>>, vector<18x1x4xf32>
    tpu.vector_store %arg5[%c0_95, %c17_96, %c0_97], %68 {strides = array<i32>} : memref<18x18x4xf32, #tpu.memory_space<vmem>>, vector<18x1x4xf32>,
    %c0_98 = arith.constant 0 : index
    %c0_99 = arith.constant 0 : index
    %c0_100 = arith.constant 0 : index
    %70 = vector.load %arg5[%c0_98, %c0_99, %c0_100] : memref<18x18x4xf32, #tpu.memory_space<vmem>>, vector<16x16x4xf32>
    %71 = arith.truncf %70 : vector<16x16x4xf32> to vector<16x16x4xbf16>
    %c0_101 = arith.constant 0 : index
    %c0_102 = arith.constant 0 : index
    %c0_103 = arith.constant 0 : index
    %72 = vector.load %arg6[%c0_101, %c0_102, %c0_103] : memref<16x16x36xbf16, #tpu.memory_space<vmem>>, vector<16x16x4xbf16>
    tpu.vector_store %arg6[%c0_101, %c0_102, %c0_103], %71 {strides = array<i32>} : memref<16x16x36xbf16, #tpu.memory_space<vmem>>, vector<16x16x4xbf16>,
    %c0_104 = arith.constant 0 : index
    %c1_105 = arith.constant 1 : index
    %c0_106 = arith.constant 0 : index
    %73 = vector.load %arg5[%c0_104, %c1_105, %c0_106] : memref<18x18x4xf32, #tpu.memory_space<vmem>>, vector<16x16x4xf32>
    %74 = arith.truncf %73 : vector<16x16x4xf32> to vector<16x16x4xbf16>
    %c0_107 = arith.constant 0 : index
    %c0_108 = arith.constant 0 : index
    %c4_109 = arith.constant 4 : index
    %75 = vector.load %arg6[%c0_107, %c0_108, %c4_109] : memref<16x16x36xbf16, #tpu.memory_space<vmem>>, vector<16x16x4xbf16>
    tpu.vector_store %arg6[%c0_107, %c0_108, %c4_109], %74 {strides = array<i32>} : memref<16x16x36xbf16, #tpu.memory_space<vmem>>, vector<16x16x4xbf16>,
    %c0_110 = arith.constant 0 : index
    %c2_111 = arith.constant 2 : index
    %c0_112 = arith.constant 0 : index
    %76 = vector.load %arg5[%c0_110, %c2_111, %c0_112] : memref<18x18x4xf32, #tpu.memory_space<vmem>>, vector<16x16x4xf32>
    %77 = arith.truncf %76 : vector<16x16x4xf32> to vector<16x16x4xbf16>
    %c0_113 = arith.constant 0 : index
    %c0_114 = arith.constant 0 : index
    %c8_115 = arith.constant 8 : index
    %78 = vector.load %arg6[%c0_113, %c0_114, %c8_115] : memref<16x16x36xbf16, #tpu.memory_space<vmem>>, vector<16x16x4xbf16>
    tpu.vector_store %arg6[%c0_113, %c0_114, %c8_115], %77 {strides = array<i32>} : memref<16x16x36xbf16, #tpu.memory_space<vmem>>, vector<16x16x4xbf16>,
    %c1_116 = arith.constant 1 : index
    %c0_117 = arith.constant 0 : index
    %c0_118 = arith.constant 0 : index
    %79 = vector.load %arg5[%c1_116, %c0_117, %c0_118] : memref<18x18x4xf32, #tpu.memory_space<vmem>>, vector<16x16x4xf32>
    %80 = arith.truncf %79 : vector<16x16x4xf32> to vector<16x16x4xbf16>
    %c0_119 = arith.constant 0 : index
    %c0_120 = arith.constant 0 : index
    %c12_121 = arith.constant 12 : index
    %81 = vector.load %arg6[%c0_119, %c0_120, %c12_121] : memref<16x16x36xbf16, #tpu.memory_space<vmem>>, vector<16x16x4xbf16>
    tpu.vector_store %arg6[%c0_119, %c0_120, %c12_121], %80 {strides = array<i32>} : memref<16x16x36xbf16, #tpu.memory_space<vmem>>, vector<16x16x4xbf16>,
    %c1_122 = arith.constant 1 : index
    %c1_123 = arith.constant 1 : index
    %c0_124 = arith.constant 0 : index
    %82 = vector.load %arg5[%c1_122, %c1_123, %c0_124] : memref<18x18x4xf32, #tpu.memory_space<vmem>>, vector<16x16x4xf32>
    %83 = arith.truncf %82 : vector<16x16x4xf32> to vector<16x16x4xbf16>
    %c0_125 = arith.constant 0 : index
    %c0_126 = arith.constant 0 : index
    %c16_127 = arith.constant 16 : index
    %84 = vector.load %arg6[%c0_125, %c0_126, %c16_127] : memref<16x16x36xbf16, #tpu.memory_space<vmem>>, vector<16x16x4xbf16>
    tpu.vector_store %arg6[%c0_125, %c0_126, %c16_127], %83 {strides = array<i32>} : memref<16x16x36xbf16, #tpu.memory_space<vmem>>, vector<16x16x4xbf16>,
    %c1_128 = arith.constant 1 : index
    %c2_129 = arith.constant 2 : index
    %c0_130 = arith.constant 0 : index
    %85 = vector.load %arg5[%c1_128, %c2_129, %c0_130] : memref<18x18x4xf32, #tpu.memory_space<vmem>>, vector<16x16x4xf32>
    %86 = arith.truncf %85 : vector<16x16x4xf32> to vector<16x16x4xbf16>
    %c0_131 = arith.constant 0 : index
    %c0_132 = arith.constant 0 : index
    %c20_133 = arith.constant 20 : index
    %87 = vector.load %arg6[%c0_131, %c0_132, %c20_133] : memref<16x16x36xbf16, #tpu.memory_space<vmem>>, vector<16x16x4xbf16>
    tpu.vector_store %arg6[%c0_131, %c0_132, %c20_133], %86 {strides = array<i32>} : memref<16x16x36xbf16, #tpu.memory_space<vmem>>, vector<16x16x4xbf16>,
    %c2_134 = arith.constant 2 : index
    %c0_135 = arith.constant 0 : index
    %c0_136 = arith.constant 0 : index
    %88 = vector.load %arg5[%c2_134, %c0_135, %c0_136] : memref<18x18x4xf32, #tpu.memory_space<vmem>>, vector<16x16x4xf32>
    %89 = arith.truncf %88 : vector<16x16x4xf32> to vector<16x16x4xbf16>
    %c0_137 = arith.constant 0 : index
    %c0_138 = arith.constant 0 : index
    %c24_139 = arith.constant 24 : index
    %90 = vector.load %arg6[%c0_137, %c0_138, %c24_139] : memref<16x16x36xbf16, #tpu.memory_space<vmem>>, vector<16x16x4xbf16>
    tpu.vector_store %arg6[%c0_137, %c0_138, %c24_139], %89 {strides = array<i32>} : memref<16x16x36xbf16, #tpu.memory_space<vmem>>, vector<16x16x4xbf16>,
    %c2_140 = arith.constant 2 : index
    %c1_141 = arith.constant 1 : index
    %c0_142 = arith.constant 0 : index
    %91 = vector.load %arg5[%c2_140, %c1_141, %c0_142] : memref<18x18x4xf32, #tpu.memory_space<vmem>>, vector<16x16x4xf32>
    %92 = arith.truncf %91 : vector<16x16x4xf32> to vector<16x16x4xbf16>
    %c0_143 = arith.constant 0 : index
    %c0_144 = arith.constant 0 : index
    %c28_145 = arith.constant 28 : index
    %93 = vector.load %arg6[%c0_143, %c0_144, %c28_145] : memref<16x16x36xbf16, #tpu.memory_space<vmem>>, vector<16x16x4xbf16>
    tpu.vector_store %arg6[%c0_143, %c0_144, %c28_145], %92 {strides = array<i32>} : memref<16x16x36xbf16, #tpu.memory_space<vmem>>, vector<16x16x4xbf16>,
    %c2_146 = arith.constant 2 : index
    %c2_147 = arith.constant 2 : index
    %c0_148 = arith.constant 0 : index
    %94 = vector.load %arg5[%c2_146, %c2_147, %c0_148] : memref<18x18x4xf32, #tpu.memory_space<vmem>>, vector<16x16x4xf32>
    %95 = arith.truncf %94 : vector<16x16x4xf32> to vector<16x16x4xbf16>
    %c0_149 = arith.constant 0 : index
    %c0_150 = arith.constant 0 : index
    %c32_151 = arith.constant 32 : index
    %96 = vector.load %arg6[%c0_149, %c0_150, %c32_151] : memref<16x16x36xbf16, #tpu.memory_space<vmem>>, vector<16x16x4xbf16>
    tpu.vector_store %arg6[%c0_149, %c0_150, %c32_151], %95 {strides = array<i32>} : memref<16x16x36xbf16, #tpu.memory_space<vmem>>, vector<16x16x4xbf16>,
    %c0_152 = arith.constant 0 : index
    %c0_153 = arith.constant 0 : index
    %c0_154 = arith.constant 0 : index
    %97 = vector.load %arg6[%c0_152, %c0_153, %c0_154] : memref<16x16x36xbf16, #tpu.memory_space<vmem>>, vector<16x16x36xbf16>
    %98 = vector.shape_cast %97 : vector<16x16x36xbf16> to vector<256x36xbf16>
    %c0_155 = arith.constant 0 : index
    %c0_156 = arith.constant 0 : index
    %99 = vector.load %arg3[%c0_155, %c0_156] : memref<36x4xbf16, #tpu.memory_space<vmem>>, vector<36x4xbf16>
    %cst_157 = arith.constant dense<0.000000e+00> : vector<256x4xf32>
    %100 = tpu.matmul %98, %99, %cst_157 {dimension_numbers = #tpu.dot_dimension_numbers<[1], [0], [0], [1], [0, 0, 1, 1], [], []>} : vector<256x36xbf16>, vector<36x4xbf16>, vector<256x4xf32> -> vector<256x4xf32>
    %cst_158 = arith.constant dense<0.000000e+00> : vector<4xf32>
    %101 = vector.multi_reduction <add>, %100, %cst_158 [0] : vector<256x4xf32> to vector<4xf32>
    %102 = vector.shape_cast %101 : vector<4xf32> to vector<1x4xf32>
    %cst_159 = arith.constant 2.560000e+02 : f32
    %103 = vector.broadcast %cst_159 : f32 to vector<1x4xf32>
    %104 = arith.divf %102, %103 : vector<1x4xf32>
    %105 = vector.broadcast %104 : vector<1x4xf32> to vector<256x4xf32>
    %106 = arith.subf %100, %105 : vector<256x4xf32>
    %107 = arith.mulf %106, %106 : vector<256x4xf32>
    %cst_160 = arith.constant dense<0.000000e+00> : vector<4xf32>
    %108 = vector.multi_reduction <add>, %107, %cst_160 [0] : vector<256x4xf32> to vector<4xf32>
    %109 = vector.shape_cast %108 : vector<4xf32> to vector<1x4xf32>
    %cst_161 = arith.constant 2.560000e+02 : f32
    %110 = vector.broadcast %cst_161 : f32 to vector<1x4xf32>
    %111 = arith.divf %109, %110 : vector<1x4xf32>
    %cst_162 = arith.constant 9.99999974E-6 : f32
    %112 = vector.broadcast %cst_162 : f32 to vector<1x4xf32>
    %113 = arith.addf %111, %112 : vector<1x4xf32>
    %114 = math.rsqrt %113 : vector<1x4xf32>
    %115 = vector.broadcast %114 : vector<1x4xf32> to vector<256x4xf32>
    %116 = arith.mulf %106, %115 : vector<256x4xf32>
    %c0_163 = arith.constant 0 : index
    %c0_164 = arith.constant 0 : index
    %c0_165 = arith.constant 0 : index
    %c0_166 = arith.constant 0 : index
    %117 = vector.load %arg1[%c0_163, %c0_164, %c0_165, %c0_166] : memref<1x16x16x4xf32, #tpu.memory_space<vmem>>, vector<1x16x16x4xf32>
    %118 = vector.shape_cast %117 : vector<1x16x16x4xf32> to vector<16x16x4xf32>
    %119 = vector.shape_cast %116 : vector<256x4xf32> to vector<16x16x4xf32>
    %120 = arith.addf %118, %119 : vector<16x16x4xf32>
    %c0_167 = arith.constant 0 : index
    %c0_168 = arith.constant 0 : index
    %c0_169 = arith.constant 0 : index
    %c0_170 = arith.constant 0 : index
    %121 = vector.load %arg4[%c0_167, %c0_168, %c0_169, %c0_170] : memref<1x16x16x4xf32, #tpu.memory_space<vmem>>, vector<1x16x16x4xf32>
    %122 = vector.shape_cast %121 : vector<1x16x16x4xf32> to vector<16x16x4xf32>
    %123 = vector.shape_cast %120 : vector<16x16x4xf32> to vector<1x16x16x4xf32>
    tpu.vector_store %arg4[%c0_167, %c0_168, %c0_169, %c0_170], %123 {strides = array<i32>} : memref<1x16x16x4xf32, #tpu.memory_space<vmem>>, vector<1x16x16x4xf32>,
    return
  }
  func.func @transform_0(%arg0: i32) -> (i32, i32, i32, i32) {
    %c0_i32 = arith.constant 0 : i32
    %c0_i32_0 = arith.constant 0 : i32
    %c0_i32_1 = arith.constant 0 : i32
    %c0_i32_2 = arith.constant 0 : i32
    return %arg0, %c0_i32, %c0_i32_0, %c0_i32_1 : i32, i32, i32, i32
  }
  func.func @transform_1(%arg0: i32) -> (i32, i32) {
    %c0_i32 = arith.constant 0 : i32
    %c0_i32_0 = arith.constant 0 : i32
    %c0_i32_1 = arith.constant 0 : i32
    return %c0_i32, %c0_i32_0 : i32, i32
  }
  func.func @transform_2(%arg0: i32) -> (i32, i32) {
    %c0_i32 = arith.constant 0 : i32
    %c0_i32_0 = arith.constant 0 : i32
    %c0_i32_1 = arith.constant 0 : i32
    return %c0_i32, %c0_i32_0 : i32, i32
  }
  func.func @transform_3(%arg0: i32) -> (i32, i32, i32, i32) {
    %c0_i32 = arith.constant 0 : i32
    %c0_i32_0 = arith.constant 0 : i32
    %c0_i32_1 = arith.constant 0 : i32
    %c0_i32_2 = arith.constant 0 : i32
    return %arg0, %c0_i32, %c0_i32_0, %c0_i32_1 : i32, i32, i32, i32
  }
}

</mosaic_0001>

<bundles_post_ra>
// kernel: resnet_block_forward.1
= control target key start
LH: loop header
LB: loop body
LE: loop exit
PB: predicated region body
PF: predicated region fallthrough
CT: control target
= control target key end

     0   :  { %s7709_s12 = smov 0   ;;  %s10470_s0 = inlined_call_operand.vmem [shape: f32[2,16,16,4], index: 0, kind: input, shape index: {}]   ;;  %s10471_s1 = inlined_call_operand.vmem [shape: bf16[36,4], index: 1, kind: input, shape index: {}]   ;;  %s10472_s2 = inlined_call_operand.vmem [shape: bf16[36,4], index: 2, kind: input, shape index: {}]   ;;  %s10473_s3 = inlined_call_operand.vmem [shape: f32[2,16,16,4], index: 3, kind: output, shape index: {}]  }
   0x1 LB: > { %s6264_s13 = sadd.s32 4294967295, %s7679_s12   ;;  %p6268_p0 = scmp.ge.s32.totalorder %s7679_s12, 1  ;;  %s7679_s12 = sphi %s7709_s12, %s13_s12  }
   0x2   : > { %p137_p1 = scmp.lt.s32.totalorder %s7679_s12, 3 }
   0x4   : > { %p138_p2 = pnand %p6268_p0, %p137_p1 }
   0x6   : > { %141 = sbr.rel (%p138_p2) target bundleno = 1977 (0x7b9), region = 32 }
   0xb   : > { %p161_p3 = scmp.lt.s32.totalorder %s6264_s13, 1  ;;  %vm205_vm0 = vcmask 31744   ;;  %s7681_s18 = smov 4   ;;  %vm261_vm1 = vcmask 24576   ;;  %vm476_vm2 = vcmask 27648   ;;  %vm733_vm3 = vcmask 60448  }
   0xc   : > { %s7682_s19 = smov 8   ;;  %s7683_s20 = smov 12   ;;  %vm2747_vm4 = vcmask 1041408   ;;  %vm990_vm5 = vcmask 93248   ;;  %vm1247_vm6 = vcmask 126048   ;;  %vm1504_vm7 = vcmask 158848  }
   0xd   : > { %s10477_s13 = smov (!%p161_p3, %s6264_s13), 1  ;;  %s7684_s21 = smov 16   ;;  %vm1761_vm8 = vcmask 191648   ;;  %vm2019_vm9 = vcmask 224448   ;;  %vm2276_vm10 = vcmask 257248   ;;  %vm2533_vm11 = vcmask 290048  }
   0xe   : > { %s6921_s14 = sshll.u32 %s10477_s13, 8  ;;  %s7685_s22 = smov 20   ;;  %vm2698_vm12 = vcmask 293888  }
   0xf   : > { %s7725_s17 = scalar_lea.vmem %s10470_s0, %s6921_s14  ;;  %s7686_s23 = smov 24  }
  0x10   : > { %v174_v0 = vld [vmem:[%s7725_s17 + $0x10] sm:$0xff]  ;;  %v172_v1 = vld [vmem:[%s7725_s17] sm:$0xff]  ;;  %v175_v2 = vld [vmem:[%s7725_s17 + $0x18] sm:$0xff]  ;;  %s7687_s28 = smov 28   ;;  %s7688_s4 = smov 32  }
  0x11   : > { %238 = vst.msk [vmem:[#allocation2 + $0x1] sm:$0xff] %vm205_vm0, %v174_v0  ;;  %208 = vst.msk [vmem:[#allocation2 + $0x31] sm:$0xff] %vm205_vm0, %v174_v0  ;;  %v173_v3 = vld [vmem:[%s7725_s17 + $0x8] sm:$0xff]  ;;  %v176_v4 = vld [vmem:[%s7725_s17 + $0x20] sm:$0xff]  ;;  %s10351_s16 = scalar_lea.vmem %s10473_s3, %s6921_s14 }
  0x12   : > { %206 = vst.msk [vmem:[#allocation2 + $0x19] sm:$0xff] %vm205_vm0, %v172_v1  ;;  %239 = vst.msk [vmem:[#allocation2 + $0x9] sm:$0xff] %vm205_vm0, %v175_v2  ;;  %v177_v5 = vld [vmem:[%s7725_s17 + $0x28] sm:$0xff]  ;;  %v178_v6 = vld [vmem:[%s7725_s17 + $0x30] sm:$0xff] }
  0x13   : > { %209 = vst.msk [vmem:[#allocation2 + $0x39] sm:$0xff] %vm205_vm0, %v175_v2  ;;  %207 = vst.msk [vmem:[#allocation2 + $0x21] sm:$0xff] %vm205_vm0, %v173_v3  ;;  %v179_v7 = vld [vmem:[%s7725_s17 + $0x38] sm:$0xff]  ;;  %v180_v8 = vld [vmem:[%s7725_s17 + $0x40] sm:$0xff] }
  0x14   : > { %210 = vst.msk [vmem:[#allocation2 + $0x49] sm:$0xff] %vm205_vm0, %v176_v4  ;;  %211 = vst.msk [vmem:[#allocation2 + $0x51] sm:$0xff] %vm205_vm0, %v177_v5  ;;  %v181_v9 = vld [vmem:[%s7725_s17 + $0x48] sm:$0xff]  ;;  %v182_v10 = vld [vmem:[%s7725_s17 + $0x50] sm:$0xff] }
  0x15   : > { %212 = vst.msk [vmem:[#allocation2 + $0x61] sm:$0xff] %vm205_vm0, %v178_v6  ;;  %213 = vst.msk [vmem:[#allocation2 + $0x69] sm:$0xff] %vm205_vm0, %v179_v7  ;;  %v183_v11 = vld [vmem:[%s7725_s17 + $0x58] sm:$0xff]  ;;  %v184_v12 = vld [vmem:[%s7725_s17 + $0x60] sm:$0xff] }
  0x16   : > { %214 = vst.msk [vmem:[#allocation2 + $0x79] sm:$0xff] %vm205_vm0, %v180_v8  ;;  %215 = vst.msk [vmem:[#allocation2 + $0x81] sm:$0xff] %vm205_vm0, %v181_v9  ;;  %v185_v13 = vld [vmem:[%s7725_s17 + $0x68] sm:$0xff]  ;;  %v186_v14 = vld [vmem:[%s7725_s17 + $0x70] sm:$0xff] }
  0x17   : > { %216 = vst.msk [vmem:[#allocation2 + $0x91] sm:$0xff] %vm205_vm0, %v182_v10  ;;  %217 = vst.msk [vmem:[#allocation2 + $0x99] sm:$0xff] %vm205_vm0, %v183_v11  ;;  %v187_v15 = vld [vmem:[%s7725_s17 + $0x78] sm:$0xff]  ;;  %v188_v16 = vld [vmem:[%s7725_s17 + $0x80] sm:$0xff] }
  0x18   : > { %218 = vst.msk [vmem:[#allocation2 + $0xa9] sm:$0xff] %vm205_vm0, %v184_v12  ;;  %219 = vst.msk [vmem:[#allocation2 + $0xb1] sm:$0xff] %vm205_vm0, %v185_v13  ;;  %v189_v17 = vld [vmem:[%s7725_s17 + $0x88] sm:$0xff]  ;;  %v190_v18 = vld [vmem:[%s7725_s17 + $0x90] sm:$0xff] }
  0x19   : > { %220 = vst.msk [vmem:[#allocation2 + $0xc1] sm:$0xff] %vm205_vm0, %v186_v14  ;;  %221 = vst.msk [vmem:[#allocation2 + $0xc9] sm:$0xff] %vm205_vm0, %v187_v15  ;;  %v191_v19 = vld [vmem:[%s7725_s17 + $0x98] sm:$0xff]  ;;  %v192_v20 = vld [vmem:[%s7725_s17 + $0xa0] sm:$0xff] }
  0x1a   : > { %222 = vst.msk [vmem:[#allocation2 + $0xd9] sm:$0xff] %vm205_vm0, %v188_v16  ;;  %223 = vst.msk [vmem:[#allocation2 + $0xe1] sm:$0xff] %vm205_vm0, %v189_v17  ;;  %v193_v21 = vld [vmem:[%s7725_s17 + $0xa8] sm:$0xff]  ;;  %v194_v22 = vld [vmem:[%s7725_s17 + $0xb0] sm:$0xff] }
  0x1b   : > { %224 = vst.msk [vmem:[#allocation2 + $0xf1] sm:$0xff] %vm205_vm0, %v190_v18  ;;  %225 = vst.msk [vmem:[#allocation2 + $0xf9] sm:$0xff] %vm205_vm0, %v191_v19  ;;  %v195_v23 = vld [vmem:[%s7725_s17 + $0xb8] sm:$0xff]  ;;  %v509_v24 = vld [vmem:[#allocation2 + $0x1] sm:$0xff] }
  0x1c   : > { %226 = vst.msk [vmem:[#allocation2 + $0x109] sm:$0xff] %vm205_vm0, %v192_v20  ;;  %v511_v25 = vld [vmem:[#allocation2 + $0x19] sm:$0xff]  ;;  %v510_v26 = vld [vmem:[#allocation2 + $0x9] sm:$0xff]  ;;  %227 = vst.msk [vmem:[#allocation2 + $0x111] sm:$0xff] %vm205_vm0, %v193_v21  ;;  %v6955_v27 = vpack.c.bf16 %v509_v24, %v509_v24 }
  0x1d   : > { %228 = vst.msk [vmem:[#allocation2 + $0x121] sm:$0xff] %vm205_vm0, %v194_v22  ;;  %229 = vst.msk [vmem:[#allocation2 + $0x129] sm:$0xff] %vm205_vm0, %v195_v23  ;;  %v7777_v28 = vpack.c.bf16 %v511_v25, %v511_v25  ;;  %v512_v29 = vld [vmem:[#allocation2 + $0x21] sm:$0xff]  ;;  %v6956_v30 = vpack.c.bf16 %v510_v26, %v510_v26  ;;  %v513_v32 = vld [vmem:[#allocation2 + $0x31] sm:$0xff] }
  0x1e   : > { %637 = vrot.lane.b32.xlu0 %v6955_v27, %s7681_s18  ;;  %v7782_v31 = vpack.c.bf16 %v512_v29, %v512_v29  ;;  %v514_v33 = vld [vmem:[#allocation2 + $0x39] sm:$0xff]  ;;  %v7787_v34 = vpack.c.bf16 %v513_v32, %v513_v32  ;;  %v515_v36 = vld [vmem:[#allocation2 + $0x49] sm:$0xff]  ;;  %v516_v37 = vld [vmem:[#allocation2 + $0x51] sm:$0xff] }
  0x1f   : > { %641 = vrot.lane.b32.xlu1 %v7777_v28, %s7681_s18  ;;  %v7789_v35 = vpack.c.bf16 %v514_v33, %v514_v33  ;;  %v196_v38 = vld [vmem:[%s7725_s17 + $0xc0] sm:$0xff]  ;;  %v197_v39 = vld [vmem:[%s7725_s17 + $0xc8] sm:$0xff]  ;;  %v198_v40 = vld [vmem:[%s7725_s17 + $0xd0] sm:$0xff]  ;;  %v7805_v44 = vpack.c.bf16 %v515_v36, %v515_v36  ;;  %v7807_v45 = vpack.c.bf16 %v516_v37, %v516_v37 }
  0x20   : > { %230 = vst.msk [vmem:[#allocation2 + $0x139] sm:$0xff] %vm205_vm0, %v196_v38  ;;  %v199_v41 = vld [vmem:[%s7725_s17 + $0xd8] sm:$0xff]  ;;  %231 = vst.msk [vmem:[#allocation2 + $0x141] sm:$0xff] %vm205_vm0, %v197_v39  ;;  %v200_v42 = vld [vmem:[%s7725_s17 + $0xe0] sm:$0xff] }
  0x21   : > { %232 = vst.msk [vmem:[#allocation2 + $0x151] sm:$0xff] %vm205_vm0, %v198_v40  ;;  %233 = vst.msk [vmem:[#allocation2 + $0x159] sm:$0xff] %vm205_vm0, %v199_v41  ;;  %v201_v43 = vld [vmem:[%s7725_s17 + $0xe8] sm:$0xff]  ;;  %v281_v47 = vld [vmem:[#allocation2 + $0x27] sm:$0x1] }
  0x22   : > { %639 = vrot.lane.b32.xlu0 %v6956_v30, %s7681_s18  ;;  %234 = vst.msk [vmem:[#allocation2 + $0x169] sm:$0xff] %vm205_vm0, %v200_v42  ;;  %241 = vst.msk [vmem:[#allocation2 + $0x199] sm:$0xff] %vm205_vm0, %v200_v42  ;;  %v280_v46 = vld [vmem:[#allocation2 + $0xf] sm:$0x1]  ;;  %v517_v48 = vld [vmem:[#allocation2 + $0x61] sm:$0xff] }
  0x23   : > { %643 = vrot.lane.b32.xlu1 %v7782_v31, %s7681_s18  ;;  %235 = vst.msk [vmem:[#allocation2 + $0x171] sm:$0xff] %vm205_vm0, %v201_v43  ;;  %242 = vst.msk [vmem:[#allocation2 + $0x1a1] sm:$0xff] %vm205_vm0, %v201_v43  ;;  %v518_v49 = vld [vmem:[#allocation2 + $0x69] sm:$0xff]  ;;  %v282_v50 = vld [vmem:[#allocation2 + $0x3f] sm:$0x1]  ;;  %v7822_v54 = vpack.c.bf16 %v517_v48, %v517_v48 }
  0x24   : > { %298 = vst.msk [vmem:[#allocation2 + $0x11] sm:$0x1] %vm261_vm1, %v280_v46  ;;  %299 = vst.msk [vmem:[#allocation2 + $0x29] sm:$0x1] %vm261_vm1, %v281_v47  ;;  %v283_v51 = vld [vmem:[#allocation2 + $0x57] sm:$0x1]  ;;  %v7824_v55 = vpack.c.bf16 %v518_v49, %v518_v49 }
  0x25   : > { %300 = vst.msk [vmem:[#allocation2 + $0x41] sm:$0x1] %vm261_vm1, %v282_v50  ;;  %v284_v52 = vld [vmem:[#allocation2 + $0x6f] sm:$0x1]  ;;  %301 = vst.msk [vmem:[#allocation2 + $0x59] sm:$0x1] %vm261_vm1, %v283_v51 }
  0x26   : > { %645 = vrot.lane.b32.xlu0 %v7787_v34, %s7681_s18  ;;  %302 = vst.msk [vmem:[#allocation2 + $0x71] sm:$0x1] %vm261_vm1, %v284_v52  ;;  %v285_v53 = vld [vmem:[#allocation2 + $0x87] sm:$0x1]  ;;  %v286_v56 = vld [vmem:[#allocation2 + $0x9f] sm:$0x1] }
  0x27   : > { %647 = vrot.lane.b32.xlu1 %v7789_v35, %s7681_s18  ;;  %303 = vst.msk [vmem:[#allocation2 + $0x89] sm:$0x1] %vm261_vm1, %v285_v53  ;;  %v287_v57 = vld [vmem:[#allocation2 + $0xb7] sm:$0x1]  ;;  %v519_v58 = vld [vmem:[#allocation2 + $0x79] sm:$0xff]  ;;  %v520_v59 = vld [vmem:[#allocation2 + $0x81] sm:$0xff] }
  0x28   : > { %304 = vst.msk [vmem:[#allocation2 + $0xa1] sm:$0x1] %vm261_vm1, %v286_v56  ;;  %305 = vst.msk [vmem:[#allocation2 + $0xb9] sm:$0x1] %vm261_vm1, %v287_v57  ;;  %v288_v60 = vld [vmem:[#allocation2 + $0xcf] sm:$0x1]  ;;  %v6965_v61 = vpack.c.bf16 %v519_v58, %v519_v58  ;;  %v6966_v62 = vpack.c.bf16 %v520_v59, %v520_v59 }
  0x29   : > { %306 = vst.msk [vmem:[#allocation2 + $0xd1] sm:$0x1] %vm261_vm1, %v288_v60  ;;  %v521_v63 = vld [vmem:[#allocation2 + $0x91] sm:$0xff]  ;;  %v289_v0 = vld [vmem:[#allocation2 + $0xe7] sm:$0x1]  ;;  %v522_v1 = vld [vmem:[#allocation2 + $0x99] sm:$0xff] }
  0x2a   : > { %649 = vrot.lane.b32.xlu0 %v7805_v44, %s7681_s18  ;;  %307 = vst.msk [vmem:[#allocation2 + $0xe9] sm:$0x1] %vm261_vm1, %v289_v0  ;;  %v1024_v2 = vld [vmem:[#allocation2 + $0x20] sm:$0xff]  ;;  %v244_v3 = vld [vmem:[#allocation2 + $0x1a] sm:$0x1]  ;;  %v6967_v9 = vpack.c.bf16 %v521_v63, %v521_v63  ;;  %v6968_v10 = vpack.c.bf16 %v522_v1, %v522_v1  ;;  %v523_v11 = vld [vmem:[#allocation2 + $0xa9] sm:$0xff] }
  0x2b   : > { %651 = vrot.lane.b32.xlu1 %v7807_v45, %s7681_s18  ;;  %v7835_v4 = vpack.c.bf16 %v1024_v2, %v1024_v2  ;;  %263 = vst.msk [vmem:[#allocation2 + $0x18] sm:$0x1] %vm261_vm1, %v244_v3  ;;  %v1026_v5 = vld [vmem:[#allocation2 + $0x38] sm:$0xff]  ;;  %v245_v7 = vld [vmem:[#allocation2 + $0x32] sm:$0x1]  ;;  %v317_v12 = vld [vmem:[#allocation2 + $0x8] sm:$0xff]  ;;  %v6969_v22 = vpack.c.bf16 %v523_v11, %v523_v11 }
  0x2c   : > { %v7838_v6 = vpack.c.bf16 %v1026_v5, %v1026_v5  ;;  %v243_v8 = vld [vmem:[#allocation2 + $0x2] sm:$0x1]  ;;  %264 = vst.msk [vmem:[#allocation2 + $0x30] sm:$0x1] %vm261_vm1, %v245_v7  ;;  %v524_v13 = vld [vmem:[#allocation2 + $0xb1] sm:$0xff]  ;;  %v6924_v14 = vpack.c.bf16 %v317_v12, %v317_v12  ;;  %v325_v20 = vld [vmem:[#allocation2 + $0x68] sm:$0xff] }
  0x2d   : > { %262 = vst.msk [vmem:[#allocation2] sm:$0x1] %vm261_vm1, %v243_v8  ;;  %v246_v15 = vld [vmem:[#allocation2 + $0x4a] sm:$0x1]  ;;  %v323_v16 = vld [vmem:[#allocation2 + $0x50] sm:$0xff]  ;;  %v7848_v17 = vld [vmem:[#allocation2 + $0xc1] sm:$0xff]  ;;  %v7855_v23 = vpack.c.bf16 %v325_v20, %v325_v20  ;;  %v6970_v27 = vpack.c.bf16 %v524_v13, %v524_v13 }
  0x2e   : > { %653 = vrot.lane.b32.xlu0 %v7822_v54, %s7681_s18  ;;  %480 = vst.msk [vmem:[#allocation3 + $0xc] sm:$0xf] %vm476_vm2, %v7835_v4  ;;  %482 = vst.msk [vmem:[#allocation3 + $0x14] sm:$0xf] %vm476_vm2, %v7838_v6  ;;  %v7851_v18 = vpack.c.bf16 %v323_v16, %v323_v16  ;;  %v247_v19 = vld [vmem:[#allocation2 + $0x62] sm:$0x1]  ;;  %v6971_v49 = vpack.c.bf16 %v7848_v17, %v7848_v17 }
  0x2f   : > { %655 = vrot.lane.b32.xlu1 %v7824_v55, %s7681_s18  ;;  %265 = vst.msk [vmem:[#allocation2 + $0x48] sm:$0x1] %vm261_vm1, %v246_v15  ;;  %v248_v21 = vld [vmem:[#allocation2 + $0x7a] sm:$0x1]  ;;  %266 = vst.msk [vmem:[#allocation2 + $0x60] sm:$0x1] %vm261_vm1, %v247_v19 }
  0x30   : > { %478 = vst.msk [vmem:[#allocation3 + $0x4] sm:$0xf] %vm476_vm2, %v6924_v14  ;;  %v327_v24 = vld [vmem:[#allocation2 + $0x80] sm:$0xff]  ;;  %v249_v25 = vld [vmem:[#allocation2 + $0x92] sm:$0x1]  ;;  %v329_v26 = vld [vmem:[#allocation2 + $0x98] sm:$0xff] }
  0x31   : > { %267 = vst.msk [vmem:[#allocation2 + $0x78] sm:$0x1] %vm261_vm1, %v248_v21  ;;  %v7860_v29 = vld [vmem:[#allocation2 + $0xc9] sm:$0xff]  ;;  %v7864_v30 = vpack.c.bf16 %v327_v24, %v327_v24  ;;  %268 = vst.msk [vmem:[#allocation2 + $0x90] sm:$0x1] %vm261_vm1, %v249_v25  ;;  %v7867_v32 = vpack.c.bf16 %v329_v26, %v329_v26  ;;  %v7874_v41 = vld [vmem:[#allocation2 + $0xd9] sm:$0xff] }
  0x32   : > { %657 = vrot.lane.b32.xlu0 %v6965_v61, %s7681_s18  ;;  %484 = vst.msk [vmem:[#allocation3 + $0x1c] sm:$0xf] %vm476_vm2, %v7851_v18  ;;  %v250_v33 = vld [vmem:[#allocation2 + $0xaa] sm:$0x1]  ;;  %v331_v36 = vld [vmem:[#allocation2 + $0xb0] sm:$0xff]  ;;  %v1023_v37 = vld [vmem:[#allocation2 + $0x18] sm:$0xff]  ;;  %v6972_v50 = vpack.c.bf16 %v7860_v29, %v7860_v29  ;;  %v6973_v8 = vpack.c.bf16 %v7874_v41, %v7874_v41 }
  0x33   : > { %659 = vrot.lane.b32.xlu1 %v6966_v62, %s7681_s18  ;;  %486 = vst.msk [vmem:[#allocation3 + $0x24] sm:$0xf] %vm476_vm2, %v7855_v23  ;;  %v7872_v38 = vpack.c.bf16 %v331_v36, %v331_v36  ;;  %v251_v39 = vld [vmem:[#allocation2 + $0xc2] sm:$0x1]  ;;  %v333_v40 = vld [vmem:[#allocation2 + $0xc8] sm:$0xff]  ;;  %v7876_v42 = vpack.c.bf16 %v1023_v37, %v1023_v37  ;;  %v1025_v51 = vld [vmem:[#allocation2 + $0x30] sm:$0xff] }
  0x34   : > { %269 = vst.msk [vmem:[#allocation2 + $0xa8] sm:$0x1] %vm261_vm1, %v250_v33  ;;  %270 = vst.msk [vmem:[#allocation2 + $0xc0] sm:$0x1] %vm261_vm1, %v251_v39  ;;  %v7883_v43 = vpack.c.bf16 %v333_v40, %v333_v40  ;;  %v252_v46 = vld [vmem:[#allocation2 + $0xda] sm:$0x1]  ;;  %v7897_v57 = vpack.c.bf16 %v1025_v51, %v1025_v51 }
  0x35   : > { %488 = vst.msk [vmem:[#allocation3 + $0x2c] sm:$0xf] %vm476_vm2, %v7864_v30  ;;  %490 = vst.msk [vmem:[#allocation3 + $0x34] sm:$0xf] %vm476_vm2, %v7867_v32  ;;  %v335_v47 = vld [vmem:[#allocation2 + $0xe0] sm:$0xff]  ;;  %v337_v56 = vld [vmem:[#allocation2 + $0xf8] sm:$0xff] }
  0x36   : > { %661 = vrot.lane.b32.xlu0 %v6967_v9, %s7681_s18  ;;  %v253_v48 = vld [vmem:[#allocation2 + $0xf2] sm:$0x1]  ;;  %v316_v52 = vld [vmem:[#allocation2] sm:$0xff]  ;;  %492 = vst.msk [vmem:[#allocation3 + $0x3c] sm:$0xf] %vm476_vm2, %v7872_v38  ;;  %v7892_v53 = vpack.c.bf16 %v335_v47, %v335_v47  ;;  %v7903_v59 = vpack.c.bf16 %v337_v56, %v337_v56  ;;  %v322_v0 = vld [vmem:[#allocation2 + $0x48] sm:$0xff] }
  0x37   : > { %663 = vrot.lane.b32.xlu1 %v6968_v10, %s7681_s18  ;;  %271 = vst.msk [vmem:[#allocation2 + $0xd8] sm:$0x1] %vm261_vm1, %v252_v46  ;;  %272 = vst.msk [vmem:[#allocation2 + $0xf0] sm:$0x1] %vm261_vm1, %v253_v48  ;;  %v6923_v58 = vpack.c.bf16 %v316_v52, %v316_v52  ;;  %v254_v60 = vld [vmem:[#allocation2 + $0x10a] sm:$0x1]  ;;  %v7914_v3 = vpack.c.bf16 %v322_v0, %v322_v0 }
  0x38   : > { %479 = vst.msk [vmem:[#allocation3 + $0x8] sm:$0xf] %vm476_vm2, %v7876_v42  ;;  %494 = vst.msk [vmem:[#allocation3 + $0x44] sm:$0xf] %vm476_vm2, %v7883_v43  ;;  %v339_v61 = vld [vmem:[#allocation2 + $0x110] sm:$0xff]  ;;  %v528_v63 = vld [vmem:[#allocation2 + $0xe1] sm:$0xff] }
  0x39   : > { %v255_v62 = vld [vmem:[#allocation2 + $0x122] sm:$0x1]  ;;  %496 = vst.msk [vmem:[#allocation3 + $0x4c] sm:$0xf] %vm476_vm2, %v7892_v53  ;;  %v7908_v1 = vpack.c.bf16 %v339_v61, %v339_v61  ;;  %v256_v2 = vld [vmem:[#allocation2 + $0x13a] sm:$0x1]  ;;  %v6974_v14 = vpack.c.bf16 %v528_v63, %v528_v63 }
  0x3a   : > { %665 = vrot.lane.b32.xlu0 %v6969_v22, %s7681_s18  ;;  %273 = vst.msk [vmem:[#allocation2 + $0x108] sm:$0x1] %vm261_vm1, %v254_v60  ;;  %274 = vst.msk [vmem:[#allocation2 + $0x120] sm:$0x1] %vm261_vm1, %v255_v62  ;;  %v324_v5 = vld [vmem:[#allocation2 + $0x60] sm:$0xff]  ;;  %v326_v7 = vld [vmem:[#allocation2 + $0x78] sm:$0xff] }
  0x3b   : > { %667 = vrot.lane.b32.xlu1 %v6970_v27, %s7681_s18  ;;  %477 = vst.msk [vmem:[#allocation3] sm:$0xf] %vm476_vm2, %v6923_v58  ;;  %481 = vst.msk [vmem:[#allocation3 + $0x10] sm:$0xf] %vm476_vm2, %v7897_v57  ;;  %v7921_v9 = vpack.c.bf16 %v324_v5, %v324_v5  ;;  %v7923_v10 = vpack.c.bf16 %v326_v7, %v326_v7  ;;  %v328_v11 = vld [vmem:[#allocation2 + $0x90] sm:$0xff]  ;;  %v341_v12 = vld [vmem:[#allocation2 + $0x128] sm:$0xff] }
  0x3c   : > { %498 = vst.msk [vmem:[#allocation3 + $0x54] sm:$0xf] %vm476_vm2, %v7903_v59  ;;  %500 = vst.msk [vmem:[#allocation3 + $0x5c] sm:$0xf] %vm476_vm2, %v7908_v1  ;;  %v257_v13 = vld [vmem:[#allocation2 + $0x152] sm:$0x1]  ;;  %v7931_v15 = vpack.c.bf16 %v328_v11, %v328_v11  ;;  %v6948_v17 = vpack.c.bf16 %v341_v12, %v341_v12 }
  0x3d   : > { %275 = vst.msk [vmem:[#allocation2 + $0x138] sm:$0x1] %vm261_vm1, %v256_v2  ;;  %v330_v16 = vld [vmem:[#allocation2 + $0xa8] sm:$0xff]  ;;  %276 = vst.msk [vmem:[#allocation2 + $0x150] sm:$0x1] %vm261_vm1, %v257_v13  ;;  %v529_v19 = vld [vmem:[#allocation2 + $0xf1] sm:$0xff] }
  0x3e   : > { %669 = vrot.lane.b32.xlu0 %v6971_v49, %s7681_s18  ;;  %483 = vst.msk [vmem:[#allocation3 + $0x18] sm:$0xf] %vm476_vm2, %v7914_v3  ;;  %v530_v20 = vld [vmem:[#allocation2 + $0xf9] sm:$0xff]  ;;  %485 = vst.msk [vmem:[#allocation3 + $0x20] sm:$0xf] %vm476_vm2, %v7921_v9  ;;  %v7938_v21 = vpack.c.bf16 %v330_v16, %v330_v16  ;;  %v336_v26 = vld [vmem:[#allocation2 + $0xf0] sm:$0xff]  ;;  %v6975_v37 = vpack.c.bf16 %v529_v19, %v529_v19 }
  0x3f   : > { %671 = vrot.lane.b32.xlu1 %v6972_v50, %s7681_s18  ;;  %487 = vst.msk [vmem:[#allocation3 + $0x28] sm:$0xf] %vm476_vm2, %v7923_v10  ;;  %v332_v22 = vld [vmem:[#allocation2 + $0xc0] sm:$0xff]  ;;  %489 = vst.msk [vmem:[#allocation3 + $0x30] sm:$0xf] %vm476_vm2, %v7931_v15  ;;  %v334_v25 = vld [vmem:[#allocation2 + $0xd8] sm:$0xff]  ;;  %v7949_v29 = vpack.c.bf16 %v336_v26, %v336_v26  ;;  %v6976_v39 = vpack.c.bf16 %v530_v20, %v530_v20 }
  0x40   : > { %v7942_v24 = vpack.c.bf16 %v332_v22, %v332_v22  ;;  %502 = vst.msk [vmem:[#allocation3 + $0x64] sm:$0xf] %vm476_vm2, %v6948_v17  ;;  %491 = vst.msk [vmem:[#allocation3 + $0x38] sm:$0xf] %vm476_vm2, %v7938_v21  ;;  %v7947_v27 = vpack.c.bf16 %v334_v25, %v334_v25  ;;  %v343_v33 = vld [vmem:[#allocation2 + $0x140] sm:$0xff]  ;;  %v531_v40 = vld [vmem:[#allocation2 + $0x109] sm:$0xff] }
  0x41   : > { %v258_v36 = vld [vmem:[#allocation2 + $0x16a] sm:$0x1]  ;;  %v340_v46 = vld [vmem:[#allocation2 + $0x120] sm:$0xff]  ;;  %v6950_v47 = vpack.c.bf16 %v343_v33, %v343_v33  ;;  %v532_v48 = vld [vmem:[#allocation2 + $0x111] sm:$0xff]  ;;  %497 = vst.msk [vmem:[#allocation3 + $0x50] sm:$0xf] %vm476_vm2, %v7949_v29  ;;  %v6977_v56 = vpack.c.bf16 %v531_v40, %v531_v40 }
  0x42   : > { %673 = vrot.lane.b32.xlu0 %v6973_v8, %s7681_s18  ;;  %493 = vst.msk [vmem:[#allocation3 + $0x40] sm:$0xf] %vm476_vm2, %v7942_v24  ;;  %v338_v41 = vld [vmem:[#allocation2 + $0x108] sm:$0xff]  ;;  %495 = vst.msk [vmem:[#allocation3 + $0x48] sm:$0xf] %vm476_vm2, %v7947_v27  ;;  %v6947_v50 = vpack.c.bf16 %v340_v46, %v340_v46  ;;  %v345_v60 = vld [vmem:[#allocation2 + $0x158] sm:$0xff]  ;;  %v6978_v61 = vpack.c.bf16 %v532_v48, %v532_v48 }
  0x43   : > { %675 = vrot.lane.b32.xlu1 %v6974_v14, %s7681_s18  ;;  %277 = vst.msk [vmem:[#allocation2 + $0x168] sm:$0x1] %vm261_vm1, %v258_v36  ;;  %v7960_v49 = vpack.c.bf16 %v338_v41, %v338_v41  ;;  %v533_v62 = vld [vmem:[#allocation2 + $0x121] sm:$0xff]  ;;  %v6952_v0 = vpack.c.bf16 %v345_v60, %v345_v60  ;;  %v534_v2 = vld [vmem:[#allocation2 + $0x129] sm:$0xff]  ;;  %v535_v14 = vld [vmem:[#allocation2 + $0x139] sm:$0xff] }
  0x44   : > { %v342_v51 = vld [vmem:[#allocation2 + $0x138] sm:$0xff]  ;;  %504 = vst.msk [vmem:[#allocation3 + $0x6c] sm:$0xf] %vm476_vm2, %v6950_v47  ;;  %501 = vst.msk [vmem:[#allocation3 + $0x60] sm:$0xf] %vm476_vm2, %v6947_v50  ;;  %v344_v58 = vld [vmem:[#allocation2 + $0x150] sm:$0xff]  ;;  %v6979_v5 = vpack.c.bf16 %v533_v62, %v533_v62  ;;  %v6980_v11 = vpack.c.bf16 %v534_v2, %v534_v2  ;;  %v6981_v17 = vpack.c.bf16 %v535_v14, %v535_v14 }
  0x45   : > { %v6949_v52 = vpack.c.bf16 %v342_v51, %v342_v51  ;;  %499 = vst.msk [vmem:[#allocation3 + $0x58] sm:$0xf] %vm476_vm2, %v7960_v49  ;;  %v6951_v63 = vpack.c.bf16 %v344_v58, %v344_v58  ;;  %506 = vst.msk [vmem:[#allocation3 + $0x74] sm:$0xf] %vm476_vm2, %v6952_v0  ;;  %v347_v8 = vld [vmem:[#allocation2 + $0x170] sm:$0xff]  ;;  %v536_v16 = vld [vmem:[#allocation2 + $0x141] sm:$0xff] }
  0x46   : > { %677 = vrot.lane.b32.xlu0 %v6975_v37, %s7681_s18  ;;  %v6954_v13 = vpack.c.bf16 %v347_v8, %v347_v8  ;;  %v6982_v19 = vpack.c.bf16 %v536_v16, %v536_v16  ;;  %v537_v20 = vld [vmem:[#allocation2 + $0x151] sm:$0xff]  ;;  %v538_v22 = vld [vmem:[#allocation2 + $0x159] sm:$0xff]  ;;  %v539_v33 = vld [vmem:[#allocation2 + $0x169] sm:$0xff] }
  0x47   : > { %679 = vrot.lane.b32.xlu1 %v6976_v39, %s7681_s18  ;;  %503 = vst.msk [vmem:[#allocation3 + $0x68] sm:$0xf] %vm476_vm2, %v6949_v52  ;;  %505 = vst.msk [vmem:[#allocation3 + $0x70] sm:$0xf] %vm476_vm2, %v6951_v63  ;;  %v6983_v25 = vpack.c.bf16 %v537_v20, %v537_v20  ;;  %v6984_v26 = vpack.c.bf16 %v538_v22, %v538_v22  ;;  %v540_v36 = vld [vmem:[#allocation2 + $0x171] sm:$0xff]  ;;  %v6985_v37 = vpack.c.bf16 %v539_v33, %v539_v33  ;;  %v766_v40 = vld [vmem:[#allocation2 + $0x2] sm:$0xff] }
  0x48   : > { %508 = vst.msk [vmem:[#allocation3 + $0x7c] sm:$0xf] %vm476_vm2, %v6954_v13  ;;  %v6986_v39 = vpack.c.bf16 %v540_v36, %v540_v36  ;;  %v767_v41 = vld [vmem:[#allocation2 + $0xa] sm:$0xff]  ;;  %v6987_v46 = vpack.c.bf16 %v766_v40, %v766_v40  ;;  %v768_v48 = vld [vmem:[#allocation2 + $0x1a] sm:$0xff]  ;;  %v769_v50 = vld [vmem:[#allocation2 + $0x22] sm:$0xff] }
  0x49   : > { %v6988_v47 = vpack.c.bf16 %v767_v41, %v767_v41  ;;  %v7985_v51 = vpack.c.bf16 %v768_v48, %v768_v48  ;;  %v7987_v52 = vpack.c.bf16 %v769_v50, %v769_v50  ;;  %v771_v58 = vld [vmem:[#allocation2 + $0x3a] sm:$0xff]  ;;  %v772_v62 = vld [vmem:[#allocation2 + $0x4a] sm:$0xff]  ;;  %v773_v63 = vld [vmem:[#allocation2 + $0x52] sm:$0xff] }
  0x4a   : > { %v346_v7 = vld [vmem:[#allocation2 + $0x168] sm:$0xff]  ;;  %681 = vrot.lane.b32.xlu0 %v6977_v56, %s7681_s18  ;;  %v770_v56 = vld [vmem:[#allocation2 + $0x32] sm:$0xff]  ;;  %v8001_v0 = vpack.c.bf16 %v772_v62, %v772_v62  ;;  %v8003_v2 = vpack.c.bf16 %v773_v63, %v773_v63 }
  0x4b   : > { %683 = vrot.lane.b32.xlu1 %v6978_v61, %s7681_s18  ;;  %v6953_v12 = vpack.c.bf16 %v346_v7, %v346_v7  ;;  %v7993_v60 = vpack.c.bf16 %v770_v56, %v770_v56  ;;  %v7995_v61 = vpack.c.bf16 %v771_v58, %v771_v58  ;;  %v775_v7 = vld [vmem:[#allocation2 + $0x6a] sm:$0xff]  ;;  %v777_v13 = vld [vmem:[#allocation2 + $0x82] sm:$0xff] }
  0x4c   : > { %v8019_v16 = vpack.c.bf16 %v777_v13, %v777_v13 }
  0x4d   : > { %507 = vst.msk [vmem:[#allocation3 + $0x78] sm:$0xf] %vm476_vm2, %v6953_v12  ;;  %v776_v12 = vld [vmem:[#allocation2 + $0x7a] sm:$0xff] }
  0x4e   : > { %685 = vrot.lane.b32.xlu0 %v6979_v5, %s7681_s18  ;;  %v774_v5 = vld [vmem:[#allocation2 + $0x62] sm:$0xff]  ;;  %v8017_v14 = vpack.c.bf16 %v776_v12, %v776_v12 }
  0x4f   : > { %687 = vrot.lane.b32.xlu1 %v6980_v11, %s7681_s18  ;;  %v8009_v8 = vpack.c.bf16 %v774_v5, %v774_v5  ;;  %v8011_v11 = vpack.c.bf16 %v775_v7, %v775_v7  ;;  %v7631_v5 = vld [vmem:[%s10471_s1 + $0x10] ss:$0 sps:$4 sm:$0x33]   ;;  %v7632_v12 = vld [vmem:[%s10471_s1 + $0x8] sm:$0xff]  }
  0x50   : > { %7613 = vmatprep.subr.msk.bf16.mxu0 %vm2747_vm4, %v7631_v5 }
  0x52   : > { %689 = vrot.lane.b32.xlu0 %v6981_v17, %s7681_s18  ;;  %v778_v17 = vld [vmem:[#allocation2 + $0x92] sm:$0xff] }
  0x53   : > { %691 = vrot.lane.b32.xlu1 %v6982_v19, %s7681_s18  ;;  %v779_v19 = vld [vmem:[#allocation2 + $0x9a] sm:$0xff]  ;;  %v8025_v20 = vpack.c.bf16 %v778_v17, %v778_v17 }
  0x54   : > { %v8027_v22 = vpack.c.bf16 %v779_v19, %v779_v19  ;;  %v7633_v19 = vld [vmem:[%s10471_s1] sm:$0xff]  }
  0x56   : > { %693 = vrot.lane.b32.xlu0 %v6983_v25, %s7681_s18  ;;  %v780_v25 = vld [vmem:[#allocation2 + $0xaa] sm:$0xff] }
  0x57   : > { %695 = vrot.lane.b32.xlu1 %v6984_v26, %s7681_s18  ;;  %v781_v26 = vld [vmem:[#allocation2 + $0xb2] sm:$0xff]  ;;  %v8033_v33 = vpack.c.bf16 %v780_v25, %v780_v25 }
  0x58   : > { %v8035_v36 = vpack.c.bf16 %v781_v26, %v781_v26 }
  0x5a   : > { %697 = vrot.lane.b32.xlu0 %v6985_v37, %s7681_s18  ;;  %v782_v37 = vld [vmem:[#allocation2 + $0xc2] sm:$0xff] }
  0x5b   : > { %699 = vrot.lane.b32.xlu1 %v6986_v39, %s7681_s18  ;;  %v783_v39 = vld [vmem:[#allocation2 + $0xca] sm:$0xff]  ;;  %v7003_v40 = vpack.c.bf16 %v782_v37, %v782_v37 }
  0x5c   : > { %v7004_v41 = vpack.c.bf16 %v783_v39, %v783_v39 }
  0x5e   : > { %894 = vrot.lane.b32.xlu0 %v6987_v46, %s7682_s19  ;;  %v784_v46 = vld [vmem:[#allocation2 + $0xda] sm:$0xff] }
  0x5f   : > { %896 = vrot.lane.b32.xlu1 %v6988_v47, %s7682_s19  ;;  %v785_v47 = vld [vmem:[#allocation2 + $0xe2] sm:$0xff]  ;;  %v7005_v48 = vpack.c.bf16 %v784_v46, %v784_v46 }
  0x60   : > { %v7006_v50 = vpack.c.bf16 %v785_v47, %v785_v47 }
  0x62   : > { %898 = vrot.lane.b32.xlu0 %v7985_v51, %s7682_s19 }
  0x63   : > { %900 = vrot.lane.b32.xlu1 %v7987_v52, %s7682_s19 }
  0x66   : > { %902 = vrot.lane.b32.xlu0 %v7993_v60, %s7682_s19 }
  0x67   : > { %904 = vrot.lane.b32.xlu1 %v7995_v61, %s7682_s19 }
  0x6a   : > { %906 = vrot.lane.b32.xlu0 %v8001_v0, %s7682_s19 }
  0x6b   : > { %908 = vrot.lane.b32.xlu1 %v8003_v2, %s7682_s19 }
  0x6e   : > { %910 = vrot.lane.b32.xlu0 %v8009_v8, %s7682_s19 }
  0x6f   : > { %912 = vrot.lane.b32.xlu1 %v8011_v11, %s7682_s19 }
  0x72   : > { %914 = vrot.lane.b32.xlu0 %v8017_v14, %s7682_s19 }
  0x73   : > { %916 = vrot.lane.b32.xlu1 %v8019_v16, %s7682_s19 }
  0x76   : > { %918 = vrot.lane.b32.xlu0 %v8025_v20, %s7682_s19 }
  0x77   : > { %920 = vrot.lane.b32.xlu1 %v8027_v22, %s7682_s19 }
  0x7a   : > { %922 = vrot.lane.b32.xlu0 %v8033_v33, %s7682_s19 }
  0x7b   : > { %924 = vrot.lane.b32.xlu1 %v8035_v36, %s7682_s19 }
  0x7e   : > { %926 = vrot.lane.b32.xlu0 %v7003_v40, %s7682_s19 }
  0x7f   : > { %928 = vrot.lane.b32.xlu1 %v7004_v41, %s7682_s19 }
  0x82   : > { %930 = vrot.lane.b32.xlu0 %v7005_v48, %s7682_s19 }
  0x83   : > { %932 = vrot.lane.b32.xlu1 %v7006_v50, %s7682_s19 }
  0x86   : > { %1151 = vrot.lane.b32.xlu0 %v7876_v42, %s7683_s20 }
  0x87   : > { %1153 = vrot.lane.b32.xlu1 %v7835_v4, %s7683_s20 }
  0x8a   : > { %1155 = vrot.lane.b32.xlu0 %v7897_v57, %s7683_s20 }
  0x8b   : > { %1157 = vrot.lane.b32.xlu1 %v7838_v6, %s7683_s20 }
  0x8e   : > { %1408 = vrot.lane.b32.xlu0 %v7777_v28, %s7684_s21 }
  0x8f   : > { %1410 = vrot.lane.b32.xlu1 %v7782_v31, %s7684_s21 }
  0x90   : > { %v638_v56 = vpop.permute.xlu0 %637 }
  0x91   : > { %v642_v58 = vpop.permute.xlu1 %641  ;;  %734 = vst.msk [vmem:[#allocation3] sm:$0xf] %vm733_vm3, %v638_v56  ;;  %v290_v56 = vld [vmem:[#allocation2 + $0xff] sm:$0x1] }
  0x92   : > { %736 = vst.msk [vmem:[#allocation3 + $0x8] sm:$0xf] %vm733_vm3, %v642_v58  ;;  %1412 = vrot.lane.b32.xlu0 %v7787_v34, %s7684_s21  ;;  %v2059_v58 = vld [vmem:[#allocation2 + $0x81] sm:$0xff] }
  0x93   : > { %1414 = vrot.lane.b32.xlu1 %v7789_v35, %s7684_s21  ;;  %308 = vst.msk [vmem:[#allocation2 + $0x101] sm:$0x1] %vm261_vm1, %v290_v56 }
  0x94   : > { %v640_v4 = vpop.permute.xlu0 %639 }
  0x95   : > { %v644_v42 = vpop.permute.xlu1 %643  ;;  %735 = vst.msk [vmem:[#allocation3 + $0x4] sm:$0xf] %vm733_vm3, %v640_v4  ;;  %v2058_v4 = vld [vmem:[#allocation2 + $0x79] sm:$0xff] }
  0x96   : > { %737 = vst.msk [vmem:[#allocation3 + $0xc] sm:$0xf] %vm733_vm3, %v644_v42  ;;  %1665 = vrot.lane.b32.xlu0 %v7985_v51, %s7685_s22 }
  0x97   : > { %1667 = vrot.lane.b32.xlu1 %v7987_v52, %s7685_s22 }
  0x98   : > { %v646_v28 = vpop.permute.xlu0 %645 }
  0x99   : > { %v648_v31 = vpop.permute.xlu1 %647  ;;  %738 = vst.msk [vmem:[#allocation3 + $0x10] sm:$0xf] %vm733_vm3, %v646_v28 }
  0x9a   : > { %739 = vst.msk [vmem:[#allocation3 + $0x14] sm:$0xf] %vm733_vm3, %v648_v31  ;;  %1669 = vrot.lane.b32.xlu0 %v7993_v60, %s7685_s22  ;;  %v7154_v31 = vpack.c.bf16 %v2059_v58, %v2059_v58  ;;  %v1550_v58 = vld [vmem:[#allocation2 + $0xb2] sm:$0xff] }
  0x9b   : > { %1671 = vrot.lane.b32.xlu1 %v7995_v61, %s7685_s22 }
  0x9c   : > { %v650_v62 = vpop.permute.xlu0 %649 }
  0x9d   : > { %v652_v63 = vpop.permute.xlu1 %651  ;;  %740 = vst.msk [vmem:[#allocation3 + $0x18] sm:$0xf] %vm733_vm3, %v650_v62  ;;  %v7153_v62 = vpack.c.bf16 %v2058_v4, %v2058_v4  ;;  %v1549_v4 = vld [vmem:[#allocation2 + $0xaa] sm:$0xff] }
  0x9e   : > { %741 = vst.msk [vmem:[#allocation3 + $0x1c] sm:$0xf] %vm733_vm3, %v652_v63  ;;  %1923 = vrot.lane.b32.xlu0 %v7897_v57, %s7686_s23 }
  0x9f   : > { %1925 = vrot.lane.b32.xlu1 %v7838_v6, %s7686_s23  ;;  %v2749_v6 = vsel %vm2747_vm4, %v7631_v5, 0 }
  0xa0   : > { %v654_v51 = vpop.permute.xlu0 %653  ;;  %7538 = vmatpush3.bf16.msra.mxu0 %v2749_v6 }
  0xa1   : > { %v656_v52 = vpop.permute.xlu1 %655  ;;  %742 = vst.msk [vmem:[#allocation3 + $0x20] sm:$0xf] %vm733_vm3, %v654_v51  ;;  %7539 = vmatprep.subr.bf16.mxu0 %v7632_v12 }
  0xa2   : > { %743 = vst.msk [vmem:[#allocation3 + $0x24] sm:$0xf] %vm733_vm3, %v656_v52  ;;  %1927 = vrot.lane.b32.xlu0 %v7914_v3, %s7686_s23 }
  0xa3   : > { %1929 = vrot.lane.b32.xlu1 %v7851_v18, %s7686_s23 }
  0xa4   : > { %v658_v57 = vpop.permute.xlu0 %657  ;;  %7540 = vmatpush3.bf16.msra.mxu0 %v7632_v12 }
  0xa5   : > { %v660_v7 = vpop.permute.xlu1 %659  ;;  %744 = vst.msk [vmem:[#allocation3 + $0x28] sm:$0xf] %vm733_vm3, %v658_v57  ;;  %7541 = vmatprep.subr.bf16.mxu0 %v7633_v19 }
  0xa6   : > { %745 = vst.msk [vmem:[#allocation3 + $0x2c] sm:$0xf] %vm733_vm3, %v660_v7  ;;  %2180 = vrot.lane.b32.xlu0 %v7787_v34, %s7687_s28 }
  0xa7   : > { %2182 = vrot.lane.b32.xlu1 %v7789_v35, %s7687_s28 }
  0xa8   : > { %v662_v13 = vpop.permute.xlu0 %661  ;;  %7542 = vmatpush3.bf16.msra.mxu0 %v7633_v19 }
  0xa9   : > { %v664_v17 = vpop.permute.xlu1 %663  ;;  %746 = vst.msk [vmem:[#allocation3 + $0x30] sm:$0xf] %vm733_vm3, %v662_v13  ;;  %v291_v13 = vld [vmem:[#allocation2 + $0x117] sm:$0x1] }
  0xaa   : > { %747 = vst.msk [vmem:[#allocation3 + $0x34] sm:$0xf] %vm733_vm3, %v664_v17  ;;  %2184 = vrot.lane.b32.xlu0 %v7805_v44, %s7687_s28  ;;  %v1291_v17 = vld [vmem:[#allocation2 + $0x99] sm:$0xff] }
  0xab   : > { %2186 = vrot.lane.b32.xlu1 %v7807_v45, %s7687_s28  ;;  %309 = vst.msk [vmem:[#allocation2 + $0x119] sm:$0x1] %vm261_vm1, %v291_v13 }
  0xac   : > { %v666_v34 = vpop.permute.xlu0 %665 }
  0xad   : > { %v668_v35 = vpop.permute.xlu1 %667  ;;  %748 = vst.msk [vmem:[#allocation3 + $0x38] sm:$0xf] %vm733_vm3, %v666_v34 }
  0xae   : > { %749 = vst.msk [vmem:[#allocation3 + $0x3c] sm:$0xf] %vm733_vm3, %v668_v35  ;;  %2437 = vrot.lane.b32.xlu0 %v7993_v60, %s7688_s4 }
  0xaf   : > { %2439 = vrot.lane.b32.xlu1 %v7995_v61, %s7688_s4 }
  0xb0   : > { %v670_v25 = vpop.permute.xlu0 %669 }
  0xb1   : > { %v672_v26 = vpop.permute.xlu1 %671  ;;  %750 = vst.msk [vmem:[#allocation3 + $0x40] sm:$0xf] %vm733_vm3, %v670_v25 }
  0xb2   : > { %751 = vst.msk [vmem:[#allocation3 + $0x44] sm:$0xf] %vm733_vm3, %v672_v26  ;;  %2441 = vrot.lane.b32.xlu0 %v8001_v0, %s7688_s4 }
  0xb3   : > { %2443 = vrot.lane.b32.xlu1 %v8003_v2, %s7688_s4 }
  0xb4   : > { %v674_v37 = vpop.permute.xlu0 %673 }
  0xb5   : > { %v676_v39 = vpop.permute.xlu1 %675  ;;  %752 = vst.msk [vmem:[#allocation3 + $0x48] sm:$0xf] %vm733_vm3, %v674_v37 }
  0xb6   : > { %753 = vst.msk [vmem:[#allocation3 + $0x4c] sm:$0xf] %vm733_vm3, %v676_v39  ;;  %1159 = vrot.lane.b32.xlu0 %v7914_v3, %s7683_s20 }
  0xb7   : > { %1161 = vrot.lane.b32.xlu1 %v7851_v18, %s7683_s20 }
  0xb8   : > { %v678_v60 = vpop.permute.xlu0 %677 }
  0xb9   : > { %v680_v61 = vpop.permute.xlu1 %679  ;;  %754 = vst.msk [vmem:[#allocation3 + $0x50] sm:$0xf] %vm733_vm3, %v678_v60 }
  0xba   : > { %755 = vst.msk [vmem:[#allocation3 + $0x54] sm:$0xf] %vm733_vm3, %v680_v61  ;;  %1163 = vrot.lane.b32.xlu0 %v7921_v9, %s7683_s20 }
  0xbb   : > { %1165 = vrot.lane.b32.xlu1 %v7855_v23, %s7683_s20 }
  0xbc   : > { %v682_v40 = vpop.permute.xlu0 %681 }
  0xbd   : > { %v684_v41 = vpop.permute.xlu1 %683  ;;  %756 = vst.msk [vmem:[#allocation3 + $0x58] sm:$0xf] %vm733_vm3, %v682_v40 }
  0xbe   : > { %757 = vst.msk [vmem:[#allocation3 + $0x5c] sm:$0xf] %vm733_vm3, %v684_v41  ;;  %1416 = vrot.lane.b32.xlu0 %v7805_v44, %s7684_s21 }
  0xbf   : > { %1418 = vrot.lane.b32.xlu1 %v7807_v45, %s7684_s21 }
  0xc0   : > { %v686_v18 = vpop.permute.xlu0 %685 }
  0xc1   : > { %v688_v3 = vpop.permute.xlu1 %687  ;;  %758 = vst.msk [vmem:[#allocation3 + $0x60] sm:$0xf] %vm733_vm3, %v686_v18  ;;  %v2063_v18 = vld [vmem:[#allocation2 + $0xb1] sm:$0xff] }
  0xc2   : > { %759 = vst.msk [vmem:[#allocation3 + $0x64] sm:$0xf] %vm733_vm3, %v688_v3  ;;  %1420 = vrot.lane.b32.xlu0 %v7822_v54, %s7684_s21  ;;  %v2062_v3 = vld [vmem:[#allocation2 + $0xa9] sm:$0xff] }
  0xc3   : > { %1422 = vrot.lane.b32.xlu1 %v7824_v55, %s7684_s21 }
  0xc4   : > { %v690_v46 = vpop.permute.xlu0 %689 }
  0xc5   : > { %v692_v47 = vpop.permute.xlu1 %691  ;;  %760 = vst.msk [vmem:[#allocation3 + $0x68] sm:$0xf] %vm733_vm3, %v690_v46 }
  0xc6   : > { %761 = vst.msk [vmem:[#allocation3 + $0x6c] sm:$0xf] %vm733_vm3, %v692_v47  ;;  %1673 = vrot.lane.b32.xlu0 %v8001_v0, %s7685_s22  ;;  %v2057_v0 = vld [vmem:[#allocation2 + $0x69] sm:$0xff]  ;;  %v7157_v47 = vpack.c.bf16 %v2062_v3, %v2062_v3 }
  0xc7   : > { %1675 = vrot.lane.b32.xlu1 %v8003_v2, %s7685_s22  ;;  %v2056_v2 = vld [vmem:[#allocation2 + $0x61] sm:$0xff] }
  0xc8   : > { %v694_v44 = vpop.permute.xlu0 %693 }
  0xc9   : > { %v696_v45 = vpop.permute.xlu1 %695  ;;  %762 = vst.msk [vmem:[#allocation3 + $0x70] sm:$0xf] %vm733_vm3, %v694_v44 }
  0xca   : > { %763 = vst.msk [vmem:[#allocation3 + $0x74] sm:$0xf] %vm733_vm3, %v696_v45  ;;  %1677 = vrot.lane.b32.xlu0 %v8009_v8, %s7685_s22 }
  0xcb   : > { %1679 = vrot.lane.b32.xlu1 %v8011_v11, %s7685_s22 }
  0xcc   : > { %v698_v54 = vpop.permute.xlu0 %697 }
  0xcd   : > { %v700_v55 = vpop.permute.xlu1 %699  ;;  %764 = vst.msk [vmem:[#allocation3 + $0x78] sm:$0xf] %vm733_vm3, %v698_v54  ;;  %v292_v54 = vld [vmem:[#allocation2 + $0x12f] sm:$0x1] }
  0xce   : > { %765 = vst.msk [vmem:[#allocation3 + $0x7c] sm:$0xf] %vm733_vm3, %v700_v55  ;;  %1931 = vrot.lane.b32.xlu0 %v7921_v9, %s7686_s23  ;;  %v7151_v9 = vpack.c.bf16 %v2056_v2, %v2056_v2 }
  0xcf   : > { %1933 = vrot.lane.b32.xlu1 %v7855_v23, %s7686_s23  ;;  %v7152_v23 = vpack.c.bf16 %v2057_v0, %v2057_v0  ;;  %310 = vst.msk [vmem:[#allocation2 + $0x131] sm:$0x1] %vm261_vm1, %v292_v54  ;;  %v1298_v54 = vld [vmem:[#allocation2 + $0xf1] sm:$0xff] }
  0xd0   : > { %v895_v48 = vpop.permute.xlu0 %894 }
  0xd1   : > { %v897_v50 = vpop.permute.xlu1 %896  ;;  %991 = vst.msk [vmem:[#allocation3] sm:$0xf] %vm990_vm5, %v895_v48 }
  0xd2   : > { %992 = vst.msk [vmem:[#allocation3 + $0x4] sm:$0xf] %vm990_vm5, %v897_v50  ;;  %1935 = vrot.lane.b32.xlu0 %v7923_v10, %s7686_s23 }
  0xd3   : > { %1937 = vrot.lane.b32.xlu1 %v7864_v30, %s7686_s23 }
  0xd4   : > { %v899_v42 = vpop.permute.xlu0 %898 }
  0xd5   : > { %v901_v28 = vpop.permute.xlu1 %900  ;;  %993 = vst.msk [vmem:[#allocation3 + $0x8] sm:$0xf] %vm990_vm5, %v899_v42 }
  0xd6   : > { %994 = vst.msk [vmem:[#allocation3 + $0xc] sm:$0xf] %vm990_vm5, %v901_v28  ;;  %2188 = vrot.lane.b32.xlu0 %v7151_v9, %s7687_s28 }
  0xd7   : > { %2190 = vrot.lane.b32.xlu1 %v7152_v23, %s7687_s28 }
  0xd8   : > { %v903_v63 = vpop.permute.xlu0 %902 }
  0xd9   : > { %v905_v51 = vpop.permute.xlu1 %904  ;;  %995 = vst.msk [vmem:[#allocation3 + $0x10] sm:$0xf] %vm990_vm5, %v903_v63  ;;  %v7095_v63 = vpack.c.bf16 %v1549_v4, %v1549_v4 }
  0xda   : > { %996 = vst.msk [vmem:[#allocation3 + $0x14] sm:$0xf] %vm990_vm5, %v905_v51  ;;  %2192 = vrot.lane.b32.xlu0 %v7153_v62, %s7687_s28  ;;  %v1552_v51 = vld [vmem:[#allocation2 + $0xca] sm:$0xff] }
  0xdb   : > { %2194 = vrot.lane.b32.xlu1 %v7154_v31, %s7687_s28 }
  0xdc   : > { %v907_v52 = vpop.permute.xlu0 %906 }
  0xdd   : > { %v909_v5 = vpop.permute.xlu1 %908  ;;  %997 = vst.msk [vmem:[#allocation3 + $0x18] sm:$0xf] %vm990_vm5, %v907_v52  ;;  %v1551_v52 = vld [vmem:[#allocation2 + $0xc2] sm:$0xff] }
  0xde   : > { %998 = vst.msk [vmem:[#allocation3 + $0x1c] sm:$0xf] %vm990_vm5, %v909_v5  ;;  %2445 = vrot.lane.b32.xlu0 %v8009_v8, %s7688_s4 }
  0xdf   : > { %2447 = vrot.lane.b32.xlu1 %v8011_v11, %s7688_s4 }
  0xe0   : > { %v911_v6 = vpop.permute.xlu0 %910 }
  0xe1   : > { %v913_v57 = vpop.permute.xlu1 %912  ;;  %999 = vst.msk [vmem:[#allocation3 + $0x20] sm:$0xf] %vm990_vm5, %v911_v6 }
  0xe2   : > { %1000 = vst.msk [vmem:[#allocation3 + $0x24] sm:$0xf] %vm990_vm5, %v913_v57  ;;  %2449 = vrot.lane.b32.xlu0 %v8017_v14, %s7688_s4  ;;  %v7098_v57 = vpack.c.bf16 %v1552_v51, %v1552_v51 }
  0xe3   : > { %2451 = vrot.lane.b32.xlu1 %v8019_v16, %s7688_s4 }
  0xe4   : > { %v915_v7 = vpop.permute.xlu0 %914 }
  0xe5   : > { %v917_v12 = vpop.permute.xlu1 %916  ;;  %1001 = vst.msk [vmem:[#allocation3 + $0x28] sm:$0xf] %vm990_vm5, %v915_v7  ;;  %v7097_v7 = vpack.c.bf16 %v1551_v52, %v1551_v52 }
  0xe6   : > { %1002 = vst.msk [vmem:[#allocation3 + $0x2c] sm:$0xf] %vm990_vm5, %v917_v12  ;;  %1167 = vrot.lane.b32.xlu0 %v7923_v10, %s7683_s20  ;;  %v7062_v10 = vpack.c.bf16 %v1291_v17, %v1291_v17 }
  0xe7   : > { %1169 = vrot.lane.b32.xlu1 %v7864_v30, %s7683_s20  ;;  %v1290_v30 = vld [vmem:[#allocation2 + $0x91] sm:$0xff] }
  0xe8   : > { %v919_v8 = vpop.permute.xlu0 %918  ;;  %v7061_v35 = vpack.c.bf16 %v1290_v30, %v1290_v30 }
  0xe9   : > { %v921_v11 = vpop.permute.xlu1 %920  ;;  %1003 = vst.msk [vmem:[#allocation3 + $0x30] sm:$0xf] %vm990_vm5, %v919_v8 }
  0xea   : > { %1004 = vst.msk [vmem:[#allocation3 + $0x34] sm:$0xf] %vm990_vm5, %v921_v11  ;;  %1171 = vrot.lane.b32.xlu0 %v7931_v15, %s7683_s20 }
  0xeb   : > { %1173 = vrot.lane.b32.xlu1 %v7867_v32, %s7683_s20 }
  0xec   : > { %v923_v19 = vpop.permute.xlu0 %922 }
  0xed   : > { %v925_v34 = vpop.permute.xlu1 %924  ;;  %1005 = vst.msk [vmem:[#allocation3 + $0x38] sm:$0xf] %vm990_vm5, %v923_v19 }
  0xee   : > { %1006 = vst.msk [vmem:[#allocation3 + $0x3c] sm:$0xf] %vm990_vm5, %v925_v34  ;;  %1424 = vrot.lane.b32.xlu0 %v7153_v62, %s7684_s21  ;;  %v7096_v62 = vpack.c.bf16 %v1550_v58, %v1550_v58 }
  0xef   : > { %1426 = vrot.lane.b32.xlu1 %v7154_v31, %s7684_s21  ;;  %v293_v31 = vld [vmem:[#allocation2 + $0x147] sm:$0x1] }
  0xf0   : > { %v927_v25 = vpop.permute.xlu0 %926  ;;  %311 = vst.msk [vmem:[#allocation2 + $0x149] sm:$0x1] %vm261_vm1, %v293_v31 }
  0xf1   : > { %v929_v26 = vpop.permute.xlu1 %928  ;;  %1007 = vst.msk [vmem:[#allocation3 + $0x40] sm:$0xf] %vm990_vm5, %v927_v25 }
  0xf2   : > { %1008 = vst.msk [vmem:[#allocation3 + $0x44] sm:$0xf] %vm990_vm5, %v929_v26  ;;  %1428 = vrot.lane.b32.xlu0 %v7061_v35, %s7684_s21 }
  0xf3   : > { %1430 = vrot.lane.b32.xlu1 %v7062_v10, %s7684_s21 }
  0xf4   : > { %v931_v37 = vpop.permute.xlu0 %930 }
  0xf5   : > { %v933_v39 = vpop.permute.xlu1 %932  ;;  %1009 = vst.msk [vmem:[#allocation3 + $0x48] sm:$0xf] %vm990_vm5, %v931_v37 }
  0xf6   : > { %1010 = vst.msk [vmem:[#allocation3 + $0x4c] sm:$0xf] %vm990_vm5, %v933_v39  ;;  %1681 = vrot.lane.b32.xlu0 %v8017_v14, %s7685_s22 }
  0xf7   : > { %1683 = vrot.lane.b32.xlu1 %v8019_v16, %s7685_s22 }
  0xf8   : > { %v1152_v61 = vpop.permute.xlu0 %1151 }
  0xf9   : > { %v1154_v60 = vpop.permute.xlu1 %1153  ;;  %1248 = vst.msk [vmem:[#allocation3] sm:$0xf] %vm1247_vm6, %v1152_v61  ;;  %v2323_v61 = vld [vmem:[#allocation2 + $0xda] sm:$0xff] }
  0xfa   : > { %1249 = vst.msk [vmem:[#allocation3 + $0x4] sm:$0xf] %vm1247_vm6, %v1154_v60  ;;  %1685 = vrot.lane.b32.xlu0 %v8025_v20, %s7685_s22  ;;  %v2324_v60 = vld [vmem:[#allocation2 + $0xe2] sm:$0xff] }
  0xfb   : > { %1687 = vrot.lane.b32.xlu1 %v8027_v22, %s7685_s22 }
  0xfc   : > { %v1156_v41 = vpop.permute.xlu0 %1155 }
  0xfd   : > { %v1158_v40 = vpop.permute.xlu1 %1157  ;;  %1250 = vst.msk [vmem:[#allocation3 + $0x8] sm:$0xf] %vm1247_vm6, %v1156_v41 }
  0xfe   : > { %1251 = vst.msk [vmem:[#allocation3 + $0xc] sm:$0xf] %vm1247_vm6, %v1158_v40  ;;  %1939 = vrot.lane.b32.xlu0 %v7931_v15, %s7686_s23  ;;  %v7158_v15 = vpack.c.bf16 %v2063_v18, %v2063_v18 }
  0xff   : > { %1941 = vrot.lane.b32.xlu1 %v7867_v32, %s7686_s23 }
 0x100   : > { %v1409_v16 = vpop.permute.xlu0 %1408 }
 0x101   : > { %v1411_v14 = vpop.permute.xlu1 %1410  ;;  %1505 = vst.msk [vmem:[#allocation3] sm:$0xf] %vm1504_vm7, %v1409_v16  ;;  %v7193_v16 = vpack.c.bf16 %v2323_v61, %v2323_v61  ;;  %v1045_v61 = vld [vmem:[#allocation2 + $0x120] sm:$0xff] }
 0x102   : > { %1506 = vst.msk [vmem:[#allocation3 + $0x4] sm:$0xf] %vm1504_vm7, %v1411_v14  ;;  %1943 = vrot.lane.b32.xlu0 %v7938_v21, %s7686_s23  ;;  %v7194_v14 = vpack.c.bf16 %v2324_v60, %v2324_v60  ;;  %v1046_v60 = vld [vmem:[#allocation2 + $0x128] sm:$0xff] }
 0x103   : > { %1945 = vrot.lane.b32.xlu1 %v7872_v38, %s7686_s23 }
 0x104   : > { %v1413_v32 = vpop.permute.xlu0 %1412 }
 0x105   : > { %v1415_v46 = vpop.permute.xlu1 %1414  ;;  %1507 = vst.msk [vmem:[#allocation3 + $0x8] sm:$0xf] %vm1504_vm7, %v1413_v32 }
 0x106   : > { %1508 = vst.msk [vmem:[#allocation3 + $0xc] sm:$0xf] %vm1504_vm7, %v1415_v46  ;;  %2196 = vrot.lane.b32.xlu0 %v7061_v35, %s7687_s28  ;;  %v2066_v35 = vld [vmem:[#allocation2 + $0xd9] sm:$0xff] }
 0x107   : > { %2198 = vrot.lane.b32.xlu1 %v7062_v10, %s7687_s28  ;;  %v2067_v10 = vld [vmem:[#allocation2 + $0xe1] sm:$0xff]  ;;  %v7161_v26 = vpack.c.bf16 %v2066_v35, %v2066_v35  ;;  %v294_v46 = vld [vmem:[#allocation2 + $0x15f] sm:$0x1]  ;;  %v1044_v35 = vld [vmem:[#allocation2 + $0x110] sm:$0xff] }
 0x108   : > { %v1666_v45 = vpop.permute.xlu0 %1665  ;;  %312 = vst.msk [vmem:[#allocation2 + $0x161] sm:$0x1] %vm261_vm1, %v294_v46  ;;  %v260_v46 = vld [vmem:[#allocation2 + $0x19a] sm:$0x1] }
 0x109   : > { %v1668_v44 = vpop.permute.xlu1 %1667  ;;  %1762 = vst.msk [vmem:[#allocation3] sm:$0xf] %vm1761_vm8, %v1666_v45  ;;  %v1299_v45 = vld [vmem:[#allocation2 + $0xf9] sm:$0xff] }
 0x10a   : > { %1763 = vst.msk [vmem:[#allocation3 + $0x4] sm:$0xf] %vm1761_vm8, %v1668_v44  ;;  %2200 = vrot.lane.b32.xlu0 %v7157_v47, %s7687_s28 }
 0x10b   : > { %2202 = vrot.lane.b32.xlu1 %v7158_v15, %s7687_s28  ;;  %279 = vst.msk [vmem:[#allocation2 + $0x198] sm:$0x1] %vm261_vm1, %v260_v46 }
 0x10c   : > { %v1670_v0 = vpop.permute.xlu0 %1669 }
 0x10d   : > { %v1672_v55 = vpop.permute.xlu1 %1671  ;;  %1764 = vst.msk [vmem:[#allocation3 + $0x8] sm:$0xf] %vm1761_vm8, %v1670_v0 }
 0x10e   : > { %1765 = vst.msk [vmem:[#allocation3 + $0xc] sm:$0xf] %vm1761_vm8, %v1672_v55  ;;  %2453 = vrot.lane.b32.xlu0 %v8025_v20, %s7688_s4 }
 0x10f   : > { %2455 = vrot.lane.b32.xlu1 %v8027_v22, %s7688_s4 }
 0x110   : > { %v1924_v48 = vpop.permute.xlu0 %1923 }
 0x111   : > { %v1926_v2 = vpop.permute.xlu1 %1925  ;;  %2020 = vst.msk [vmem:[#allocation3] sm:$0xf] %vm2019_vm9, %v1924_v48 }
 0x112   : > { %2021 = vst.msk [vmem:[#allocation3 + $0x4] sm:$0xf] %vm2019_vm9, %v1926_v2  ;;  %2457 = vrot.lane.b32.xlu0 %v8033_v33, %s7688_s4  ;;  %v1295_v33 = vld [vmem:[#allocation2 + $0xc9] sm:$0xff] }
 0x113   : > { %2459 = vrot.lane.b32.xlu1 %v8035_v36, %s7688_s4  ;;  %v1294_v36 = vld [vmem:[#allocation2 + $0xc1] sm:$0xff] }
 0x114   : > { %v1928_v56 = vpop.permute.xlu0 %1927  ;;  %v7065_v9 = vpack.c.bf16 %v1294_v36, %v1294_v36 }
 0x115   : > { %v1930_v50 = vpop.permute.xlu1 %1929  ;;  %2022 = vst.msk [vmem:[#allocation3 + $0x8] sm:$0xf] %vm2019_vm9, %v1928_v56  ;;  %v1555_v56 = vld [vmem:[#allocation2 + $0xf2] sm:$0xff] }
 0x116   : > { %2023 = vst.msk [vmem:[#allocation3 + $0xc] sm:$0xf] %vm2019_vm9, %v1930_v50  ;;  %1175 = vrot.lane.b32.xlu0 %v7938_v21, %s7683_s20  ;;  %v7066_v21 = vpack.c.bf16 %v1295_v33, %v1295_v33  ;;  %v1556_v50 = vld [vmem:[#allocation2 + $0xfa] sm:$0xff]  ;;  %v8343_v36 = vpack.c.bf16 %v1555_v56, %v1555_v56 }
 0x117   : > { %1177 = vrot.lane.b32.xlu1 %v7872_v38, %s7683_s20  ;;  %v8341_v33 = vpack.c.bf16 %v1556_v50, %v1556_v50 }
 0x118   : > { %v2181_v22 = vpop.permute.xlu0 %2180 }
 0x119   : > { %v2183_v20 = vpop.permute.xlu1 %2182  ;;  %2277 = vst.msk [vmem:[#allocation3] sm:$0xf] %vm2276_vm10, %v2181_v22 }
 0x11a   : > { %2278 = vst.msk [vmem:[#allocation3 + $0x4] sm:$0xf] %vm2276_vm10, %v2183_v20  ;;  %1179 = vrot.lane.b32.xlu0 %v7942_v24, %s7683_s20 }
 0x11b   : > { %1181 = vrot.lane.b32.xlu1 %v7883_v43, %s7683_s20 }
 0x11c   : > { %v2185_v38 = vpop.permute.xlu0 %2184 }
 0x11d   : > { %v2187_v23 = vpop.permute.xlu1 %2186  ;;  %2279 = vst.msk [vmem:[#allocation3 + $0x8] sm:$0xf] %vm2276_vm10, %v2185_v38 }
 0x11e   : > { %2280 = vst.msk [vmem:[#allocation3 + $0xc] sm:$0xf] %vm2276_vm10, %v2187_v23  ;;  %1432 = vrot.lane.b32.xlu0 %v7157_v47, %s7684_s21 }
 0x11f   : > { %1434 = vrot.lane.b32.xlu1 %v7158_v15, %s7684_s21 }
 0x120   : > { %v2438_v28 = vpop.permute.xlu0 %2437 }
 0x121   : > { %v2440_v42 = vpop.permute.xlu1 %2439  ;;  %2534 = vst.msk [vmem:[#allocation3] sm:$0xf] %vm2533_vm11, %v2438_v28 }
 0x122   : > { %2535 = vst.msk [vmem:[#allocation3 + $0x4] sm:$0xf] %vm2533_vm11, %v2440_v42  ;;  %1436 = vrot.lane.b32.xlu0 %v7065_v9, %s7684_s21 }
 0x123   : > { %1438 = vrot.lane.b32.xlu1 %v7066_v21, %s7684_s21 }
 0x124   : > { %v2442_v6 = vpop.permute.xlu0 %2441 }
 0x125   : > { %v2444_v5 = vpop.permute.xlu1 %2443  ;;  %2536 = vst.msk [vmem:[#allocation3 + $0x8] sm:$0xf] %vm2533_vm11, %v2442_v6 }
 0x126   : > { %2537 = vst.msk [vmem:[#allocation3 + $0xc] sm:$0xf] %vm2533_vm11, %v2444_v5  ;;  %1689 = vrot.lane.b32.xlu0 %v7095_v63, %s7685_s22 }
 0x127   : > { %1691 = vrot.lane.b32.xlu1 %v7096_v62, %s7685_s22  ;;  %v202_v62 = vld [vmem:[%s7725_s17 + $0xf0] sm:$0xff] }
 0x128   : > { %v1160_v8 = vpop.permute.xlu0 %1159  ;;  %236 = vst.msk [vmem:[#allocation2 + $0x181] sm:$0xff] %vm205_vm0, %v202_v62  ;;  %v2075_v62 = vld [vmem:[#allocation2 + $0x141] sm:$0xff] }
 0x129   : > { %v1162_v12 = vpop.permute.xlu1 %1161  ;;  %v7634_v11 = vld [vmem:[#allocation3] sm:$0xff]   ;;  %1252 = vst.msk [vmem:[#allocation3 + $0x10] sm:$0xf] %vm1247_vm6, %v1160_v8 }
 0x12a   : > { %1253 = vst.msk [vmem:[#allocation3 + $0x14] sm:$0xf] %vm1247_vm6, %v1162_v12  ;;  %1693 = vrot.lane.b32.xlu0 %v7097_v7, %s7685_s22  ;;  %7543 = vmatprep.mubr.msk.bf16.mxu0 %vm2698_vm12, %v7634_v11  ;;  %v2327_v12 = vld [vmem:[#allocation2 + $0x10a] sm:$0xff] }
 0x12b   : > { %1695 = vrot.lane.b32.xlu1 %v7098_v57, %s7685_s22 }
 0x12c   : > { %v1164_v17 = vpop.permute.xlu0 %1163 }
 0x12d   : > { %v1166_v13 = vpop.permute.xlu1 %1165  ;;  %v7635_v30 = vld [vmem:[#allocation3 + $0x8] sm:$0xff]   ;;  %1254 = vst.msk [vmem:[#allocation3 + $0x18] sm:$0xf] %vm1247_vm6, %v1164_v17  ;;  %v8393_v17 = vpack.c.bf16 %v2327_v12, %v2327_v12 }
 0x12e   : > { %1255 = vst.msk [vmem:[#allocation3 + $0x1c] sm:$0xf] %vm1247_vm6, %v1166_v13  ;;  %1947 = vrot.lane.b32.xlu0 %v7942_v24, %s7686_s23  ;;  %7544 = vmatmul.mubr.msk.bf16.vlgmr.msra.gmra.mxu0 %vm2698_vm12, %v7635_v30  ;;  %v7162_v24 = vpack.c.bf16 %v2067_v10, %v2067_v10 }
 0x12f   : > { %1949 = vrot.lane.b32.xlu1 %v7883_v43, %s7686_s23 }
 0x130   : > { %v1417_v34 = vpop.permute.xlu0 %1416 }
 0x131   : > { %v1419_v19 = vpop.permute.xlu1 %1418  ;;  %1509 = vst.msk [vmem:[#allocation3 + $0x10] sm:$0xf] %vm1504_vm7, %v1417_v34 }
 0x132   : > { %1510 = vst.msk [vmem:[#allocation3 + $0x14] sm:$0xf] %vm1504_vm7, %v1419_v19  ;;  %1951 = vrot.lane.b32.xlu0 %v7947_v27, %s7686_s23 }
 0x133   : > { %1953 = vrot.lane.b32.xlu1 %v7892_v53, %s7686_s23 }
 0x134   : > { %v1421_v25 = vpop.permute.xlu0 %1420 }
 0x135   : > { %v1423_v43 = vpop.permute.xlu1 %1422  ;;  %1511 = vst.msk [vmem:[#allocation3 + $0x18] sm:$0xf] %vm1504_vm7, %v1421_v25 }
 0x136   : > { %1512 = vst.msk [vmem:[#allocation3 + $0x1c] sm:$0xf] %vm1504_vm7, %v1423_v43  ;;  %2204 = vrot.lane.b32.xlu0 %v7065_v9, %s7687_s28  ;;  %v295_v9 = vld [vmem:[#allocation2 + $0x177] sm:$0x1]  ;;  %v1043_v43 = vld [vmem:[#allocation2 + $0x108] sm:$0xff] }
 0x137   : > { %2206 = vrot.lane.b32.xlu1 %v7066_v21, %s7687_s28  ;;  %313 = vst.msk [vmem:[#allocation2 + $0x179] sm:$0x1] %vm261_vm1, %v295_v9 }
 0x138   : > { %v1674_v39 = vpop.permute.xlu0 %1673 }
 0x139   : > { %v1676_v37 = vpop.permute.xlu1 %1675  ;;  %1766 = vst.msk [vmem:[#allocation3 + $0x10] sm:$0xf] %vm1761_vm8, %v1674_v39  ;;  %v7039_v39 = vpack.c.bf16 %v1043_v43, %v1043_v43 }
 0x13a   : > { %1767 = vst.msk [vmem:[#allocation3 + $0x14] sm:$0xf] %vm1761_vm8, %v1676_v37  ;;  %2208 = vrot.lane.b32.xlu0 %v7161_v26, %s7687_s28  ;;  %v7040_v37 = vpack.c.bf16 %v1044_v35, %v1044_v35  ;;  %v1049_v35 = vld [vmem:[#allocation2 + $0x150] sm:$0xff] }
 0x13b   : > { %2210 = vrot.lane.b32.xlu1 %v7162_v24, %s7687_s28 }
 0x13c   : > { %v1678_v41 = vpop.permute.xlu0 %1677 }
 0x13d   : > { %v1680_v40 = vpop.permute.xlu1 %1679  ;;  %1768 = vst.msk [vmem:[#allocation3 + $0x18] sm:$0xf] %vm1761_vm8, %v1678_v41 }
 0x13e   : > { %1769 = vst.msk [vmem:[#allocation3 + $0x1c] sm:$0xf] %vm1761_vm8, %v1680_v40  ;;  %2461 = vrot.lane.b32.xlu0 %v7097_v7, %s7688_s4  ;;  %v2328_v7 = vld [vmem:[#allocation2 + $0x112] sm:$0xff] }
 0x13f   : > { %2463 = vrot.lane.b32.xlu1 %v7098_v57, %s7688_s4  ;;  %v203_v57 = vld [vmem:[%s7725_s17 + $0xf8] sm:$0xff]  ;;  %v8391_v13 = vpack.c.bf16 %v2328_v7, %v2328_v7 }
 0x140   : > { %v1932_v3 = vpop.permute.xlu0 %1931  ;;  %237 = vst.msk [vmem:[#allocation2 + $0x189] sm:$0xff] %vm205_vm0, %v203_v57  ;;  %v2331_v57 = vld [vmem:[#allocation2 + $0x13a] sm:$0xff] }
 0x141   : > { %v1934_v18 = vpop.permute.xlu1 %1933  ;;  %2024 = vst.msk [vmem:[#allocation3 + $0x10] sm:$0xf] %vm2019_vm9, %v1932_v3 }
 0x142   : > { %2025 = vst.msk [vmem:[#allocation3 + $0x14] sm:$0xf] %vm2019_vm9, %v1934_v18  ;;  %2465 = vrot.lane.b32.xlu0 %v7193_v16, %s7688_s4 }
 0x143   : > { %2467 = vrot.lane.b32.xlu1 %v7194_v14, %s7688_s4 }
 0x144   : > { %v1936_v15 = vpop.permute.xlu0 %1935 }
 0x145   : > { %v1938_v32 = vpop.permute.xlu1 %1937  ;;  %2026 = vst.msk [vmem:[#allocation3 + $0x18] sm:$0xf] %vm2019_vm9, %v1936_v15  ;;  %v1302_v15 = vld [vmem:[#allocation2 + $0x121] sm:$0xff] }
 0x146   : > { %2027 = vst.msk [vmem:[#allocation3 + $0x1c] sm:$0xf] %vm2019_vm9, %v1938_v32  ;;  %1183 = vrot.lane.b32.xlu0 %v7947_v27, %s7683_s20  ;;  %v7069_v27 = vpack.c.bf16 %v1298_v54, %v1298_v54  ;;  %v1303_v32 = vld [vmem:[#allocation2 + $0x129] sm:$0xff]  ;;  %v7073_v54 = vpack.c.bf16 %v1302_v15, %v1302_v15  ;;  %v1564_v15 = vld [vmem:[#allocation2 + $0x15a] sm:$0xff] }
 0x147   : > { %1185 = vrot.lane.b32.xlu1 %v7892_v53, %s7683_s20  ;;  %v7070_v53 = vpack.c.bf16 %v1299_v45, %v1299_v45  ;;  %v7074_v45 = vpack.c.bf16 %v1303_v32, %v1303_v32 }
 0x148   : > { %v2189_v44 = vpop.permute.xlu0 %2188 }
 0x149   : > { %v2191_v47 = vpop.permute.xlu1 %2190  ;;  %2281 = vst.msk [vmem:[#allocation3 + $0x10] sm:$0xf] %vm2276_vm10, %v2189_v44 }
 0x14a   : > { %2282 = vst.msk [vmem:[#allocation3 + $0x14] sm:$0xf] %vm2276_vm10, %v2191_v47  ;;  %1187 = vrot.lane.b32.xlu0 %v7949_v29, %s7683_s20 }
 0x14b   : > { %1189 = vrot.lane.b32.xlu1 %v7903_v59, %s7683_s20 }
 0x14c   : > { %v2193_v0 = vpop.permute.xlu0 %2192 }
 0x14d   : > { %v2195_v55 = vpop.permute.xlu1 %2194  ;;  %2283 = vst.msk [vmem:[#allocation3 + $0x18] sm:$0xf] %vm2276_vm10, %v2193_v0 }
 0x14e   : > { %2284 = vst.msk [vmem:[#allocation3 + $0x1c] sm:$0xf] %vm2276_vm10, %v2195_v55  ;;  %1440 = vrot.lane.b32.xlu0 %v7161_v26, %s7684_s21  ;;  %v296_v26 = vld [vmem:[#allocation2 + $0x18f] sm:$0x1] }
 0x14f   : > { %1442 = vrot.lane.b32.xlu1 %v7162_v24, %s7684_s21  ;;  %314 = vst.msk [vmem:[#allocation2 + $0x191] sm:$0x1] %vm261_vm1, %v296_v26  ;;  %v7045_v26 = vpack.c.bf16 %v1049_v35, %v1049_v35  ;;  %v1310_v35 = vld [vmem:[#allocation2 + $0x181] sm:$0xff] }
 0x150   : > { %v2446_v48 = vpop.permute.xlu0 %2445 }
 0x151   : > { %v2448_v2 = vpop.permute.xlu1 %2447  ;;  %2538 = vst.msk [vmem:[#allocation3 + $0x10] sm:$0xf] %vm2533_vm11, %v2446_v48 }
 0x152   : > { %2539 = vst.msk [vmem:[#allocation3 + $0x14] sm:$0xf] %vm2533_vm11, %v2448_v2  ;;  %1444 = vrot.lane.b32.xlu0 %v7069_v27, %s7684_s21  ;;  %v1559_v2 = vld [vmem:[#allocation2 + $0x122] sm:$0xff] }
 0x153   : > { %1446 = vrot.lane.b32.xlu1 %v7070_v53, %s7684_s21 }
 0x154   : > { %v2450_v22 = vpop.permute.xlu0 %2449 }
 0x155   : > { %v2452_v20 = vpop.permute.xlu1 %2451  ;;  %2540 = vst.msk [vmem:[#allocation3 + $0x18] sm:$0xf] %vm2533_vm11, %v2450_v22  ;;  %v7105_v22 = vpack.c.bf16 %v1559_v2, %v1559_v2  ;;  %v1821_v2 = vld [vmem:[#allocation2 + $0x168] sm:$0xff] }
 0x156   : > { %2541 = vst.msk [vmem:[#allocation3 + $0x1c] sm:$0xf] %vm2533_vm11, %v2452_v20  ;;  %1697 = vrot.lane.b32.xlu0 %v7193_v16, %s7685_s22  ;;  %v7041_v16 = vpack.c.bf16 %v1045_v61, %v1045_v61  ;;  %v1307_v61 = vld [vmem:[#allocation2 + $0x159] sm:$0xff] }
 0x157   : > { %1699 = vrot.lane.b32.xlu1 %v7194_v14, %s7685_s22  ;;  %v7042_v14 = vpack.c.bf16 %v1046_v60, %v1046_v60 }
 0x158   : > { %v1168_v38 = vpop.permute.xlu0 %1167 }
 0x159   : > { %v1170_v23 = vpop.permute.xlu1 %1169  ;;  %v7636_v21 = vld [vmem:[#allocation3 + $0x10] sm:$0xff]   ;;  %1256 = vst.msk [vmem:[#allocation3 + $0x20] sm:$0xf] %vm1247_vm6, %v1168_v38 }
 0x15a   : > { %1257 = vst.msk [vmem:[#allocation3 + $0x24] sm:$0xf] %vm1247_vm6, %v1170_v23  ;;  %1701 = vrot.lane.b32.xlu0 %v8343_v36, %s7685_s22  ;;  %7547 = vmatprep.mubr.msk.bf16.mxu0 %vm2698_vm12, %v7636_v21  ;;  %v297_v23 = vld [vmem:[#allocation2 + $0x1a7] sm:$0x1]  ;;  %v1817_v21 = vld [vmem:[#allocation2 + $0x138] sm:$0xff] }
 0x15b   : > { %1703 = vrot.lane.b32.xlu1 %v8341_v33, %s7685_s22  ;;  %315 = vst.msk [vmem:[#allocation2 + $0x1a9] sm:$0x1] %vm261_vm1, %v297_v23  ;;  %v1818_v38 = vld [vmem:[#allocation2 + $0x140] sm:$0xff]  ;;  %v2078_v23 = vld [vmem:[#allocation2 + $0x169] sm:$0xff] }
 0x15c   : > { %v1172_v4 = vpop.permute.xlu0 %1171 }
 0x15d   : > { %v1174_v58 = vpop.permute.xlu1 %1173  ;;  %v7637_v42 = vld [vmem:[#allocation3 + $0x18] sm:$0xff]   ;;  %1258 = vst.msk [vmem:[#allocation3 + $0x28] sm:$0xf] %vm1247_vm6, %v1172_v4  ;;  %v7138_v4 = vpack.c.bf16 %v1818_v38, %v1818_v38 }
 0x15e   : > { %1259 = vst.msk [vmem:[#allocation3 + $0x2c] sm:$0xf] %vm1247_vm6, %v1174_v58  ;;  %1955 = vrot.lane.b32.xlu0 %v7949_v29, %s7686_s23  ;;  %7548 = vmatmul.mubr.msk.bf16.gmra.mxu0 %vm2698_vm12, %v7637_v42  ;;  %v2070_v29 = vld [vmem:[#allocation2 + $0x109] sm:$0xff]  ;;  %v7137_v42 = vpack.c.bf16 %v1817_v21, %v1817_v21 }
 0x15f   : > { %1957 = vrot.lane.b32.xlu1 %v7903_v59, %s7686_s23  ;;  %v2071_v59 = vld [vmem:[#allocation2 + $0x111] sm:$0xff]  ;;  %v8374_v5 = vpack.c.bf16 %v2070_v29, %v2070_v29 }
 0x160   : > { %v1425_v31 = vpop.permute.xlu0 %1424  ;;  %v8372_v52 = vpack.c.bf16 %v2071_v59, %v2071_v59  ;;  %v2074_v59 = vld [vmem:[#allocation2 + $0x139] sm:$0xff] }
 0x161   : > { %v1427_v28 = vpop.permute.xlu1 %1426  ;;  %1513 = vst.msk [vmem:[#allocation3 + $0x20] sm:$0xf] %vm1504_vm7, %v1425_v31 }
 0x162   : > { %1514 = vst.msk [vmem:[#allocation3 + $0x24] sm:$0xf] %vm1504_vm7, %v1427_v28  ;;  %1959 = vrot.lane.b32.xlu0 %v7960_v49, %s7686_s23  ;;  %v259_v49 = vld [vmem:[#allocation2 + $0x182] sm:$0x1] }
 0x163   : > { %1961 = vrot.lane.b32.xlu1 %v7908_v1, %s7686_s23  ;;  %278 = vst.msk [vmem:[#allocation2 + $0x180] sm:$0x1] %vm261_vm1, %v259_v49 }
 0x164   : > { %v1429_v51 = vpop.permute.xlu0 %1428 }
 0x165   : > { %v1431_v63 = vpop.permute.xlu1 %1430  ;;  %1515 = vst.msk [vmem:[#allocation3 + $0x28] sm:$0xf] %vm1504_vm7, %v1429_v51  ;;  %v7170_v51 = vpack.c.bf16 %v2075_v62, %v2075_v62 }
 0x166   : > { %1516 = vst.msk [vmem:[#allocation3 + $0x2c] sm:$0xf] %vm1504_vm7, %v1431_v63  ;;  %2212 = vrot.lane.b32.xlu0 %v7069_v27, %s7687_s28  ;;  %v1560_v27 = vld [vmem:[#allocation2 + $0x12a] sm:$0xff] }
 0x167   : > { %2214 = vrot.lane.b32.xlu1 %v7070_v53, %s7687_s28  ;;  %v8440_v20 = vpack.c.bf16 %v1560_v27, %v1560_v27  ;;  %v1822_v27 = vld [vmem:[#allocation2 + $0x170] sm:$0xff] }
 0x168   : > { %v1682_v6 = vpop.permute.xlu0 %1681 }
 0x169   : > { %v1684_v1 = vpop.permute.xlu1 %1683  ;;  %1770 = vst.msk [vmem:[#allocation3 + $0x20] sm:$0xf] %vm1761_vm8, %v1682_v6  ;;  %v2332_v6 = vld [vmem:[#allocation2 + $0x142] sm:$0xff] }
 0x16a   : > { %1771 = vst.msk [vmem:[#allocation3 + $0x24] sm:$0xf] %vm1761_vm8, %v1684_v1  ;;  %2216 = vrot.lane.b32.xlu0 %v8374_v5, %s7687_s28  ;;  %v7202_v12 = vpack.c.bf16 %v2332_v6, %v2332_v6 }
 0x16b   : > { %2218 = vrot.lane.b32.xlu1 %v8372_v52, %s7687_s28 }
 0x16c   : > { %v1686_v11 = vpop.permute.xlu0 %1685 }
 0x16d   : > { %v1688_v8 = vpop.permute.xlu1 %1687  ;;  %1772 = vst.msk [vmem:[#allocation3 + $0x28] sm:$0xf] %vm1761_vm8, %v1686_v11 }
 0x16e   : > { %1773 = vst.msk [vmem:[#allocation3 + $0x2c] sm:$0xf] %vm1761_vm8, %v1688_v8  ;;  %2469 = vrot.lane.b32.xlu0 %v8343_v36, %s7688_s4  ;;  %v7201_v8 = vpack.c.bf16 %v2331_v57, %v2331_v57 }
 0x16f   : > { %2471 = vrot.lane.b32.xlu1 %v8341_v33, %s7688_s4 }
 0x170   : > { %v1940_v19 = vpop.permute.xlu0 %1939 }
 0x171   : > { %v1942_v30 = vpop.permute.xlu1 %1941  ;;  %2028 = vst.msk [vmem:[#allocation3 + $0x20] sm:$0xf] %vm2019_vm9, %v1940_v19 }
 0x172   : > { %2029 = vst.msk [vmem:[#allocation3 + $0x24] sm:$0xf] %vm2019_vm9, %v1942_v30  ;;  %2473 = vrot.lane.b32.xlu0 %v8393_v17, %s7688_s4 }
 0x173   : > { %2475 = vrot.lane.b32.xlu1 %v8391_v13, %s7688_s4 }
 0x174   : > { %v1944_v10 = vpop.permute.xlu0 %1943 }
 0x175   : > { %v1946_v34 = vpop.permute.xlu1 %1945  ;;  %2030 = vst.msk [vmem:[#allocation3 + $0x28] sm:$0xf] %vm2019_vm9, %v1944_v10  ;;  %v1050_v10 = vld [vmem:[#allocation2 + $0x158] sm:$0xff] }
 0x176   : > { %2031 = vst.msk [vmem:[#allocation3 + $0x2c] sm:$0xf] %vm2019_vm9, %v1946_v34  ;;  %934 = vrot.lane.b32.xlu0 %v8343_v36, %s7682_s19 }
 0x177   : > { %936 = vrot.lane.b32.xlu1 %v8341_v33, %s7682_s19 }
 0x178   : > { %v2197_v24 = vpop.permute.xlu0 %2196 }
 0x179   : > { %v2199_v25 = vpop.permute.xlu1 %2198  ;;  %2285 = vst.msk [vmem:[#allocation3 + $0x20] sm:$0xf] %vm2276_vm10, %v2197_v24  ;;  %v7046_v24 = vpack.c.bf16 %v1050_v10, %v1050_v10  ;;  %v1311_v10 = vld [vmem:[#allocation2 + $0x189] sm:$0xff] }
 0x17a   : > { %2286 = vst.msk [vmem:[#allocation3 + $0x24] sm:$0xf] %vm2276_vm10, %v2199_v25  ;;  %938 = vrot.lane.b32.xlu0 %v8393_v17, %s7682_s19 }
 0x17b   : > { %940 = vrot.lane.b32.xlu1 %v8391_v13, %s7682_s19 }
 0x17c   : > { %v2201_v41 = vpop.permute.xlu0 %2200 }
 0x17d   : > { %v2203_v40 = vpop.permute.xlu1 %2202  ;;  %2287 = vst.msk [vmem:[#allocation3 + $0x28] sm:$0xf] %vm2276_vm10, %v2201_v41 }
 0x17e   : > { %2288 = vst.msk [vmem:[#allocation3 + $0x2c] sm:$0xf] %vm2276_vm10, %v2203_v40  ;;  %1191 = vrot.lane.b32.xlu0 %v7039_v39, %s7683_s20  ;;  %v1306_v40 = vld [vmem:[#allocation2 + $0x151] sm:$0xff] }
 0x17f   : > { %1193 = vrot.lane.b32.xlu1 %v7040_v37, %s7683_s20 }
 0x180   : > { %v2454_v3 = vpop.permute.xlu0 %2453 }
 0x181   : > { %v2456_v18 = vpop.permute.xlu1 %2455  ;;  %2542 = vst.msk [vmem:[#allocation3 + $0x20] sm:$0xf] %vm2533_vm11, %v2454_v3  ;;  %v7077_v3 = vpack.c.bf16 %v1306_v40, %v1306_v40 }
 0x182   : > { %2543 = vst.msk [vmem:[#allocation3 + $0x24] sm:$0xf] %vm2533_vm11, %v2456_v18  ;;  %1195 = vrot.lane.b32.xlu0 %v7041_v16, %s7683_s20  ;;  %v7078_v18 = vpack.c.bf16 %v1307_v61, %v1307_v61  ;;  %v1567_v61 = vld [vmem:[#allocation2 + $0x182] sm:$0xff] }
 0x183   : > { %1197 = vrot.lane.b32.xlu1 %v7042_v14, %s7683_s20 }
 0x184   : > { %v2458_v44 = vpop.permute.xlu0 %2457 }
 0x185   : > { %v2460_v47 = vpop.permute.xlu1 %2459  ;;  %2544 = vst.msk [vmem:[#allocation3 + $0x28] sm:$0xf] %vm2533_vm11, %v2458_v44 }
 0x186   : > { %2545 = vst.msk [vmem:[#allocation3 + $0x2c] sm:$0xf] %vm2533_vm11, %v2460_v47  ;;  %1448 = vrot.lane.b32.xlu0 %v8374_v5, %s7684_s21  ;;  %v1563_v47 = vld [vmem:[#allocation2 + $0x152] sm:$0xff] }
 0x187   : > { %1450 = vrot.lane.b32.xlu1 %v8372_v52, %s7684_s21  ;;  %v7169_v52 = vpack.c.bf16 %v2074_v59, %v2074_v59 }
 0x188   : > { %v1176_v0 = vpop.permute.xlu0 %1175 }
 0x189   : > { %v1178_v55 = vpop.permute.xlu1 %1177  ;;  %v7638_v53 = vld [vmem:[#allocation3 + $0x20] sm:$0xff]   ;;  %1260 = vst.msk [vmem:[#allocation3 + $0x30] sm:$0xf] %vm1247_vm6, %v1176_v0 }
 0x18a   : > { %1261 = vst.msk [vmem:[#allocation3 + $0x34] sm:$0xf] %vm1247_vm6, %v1178_v55  ;;  %1452 = vrot.lane.b32.xlu0 %v7073_v54, %s7684_s21  ;;  %7551 = vmatprep.mubr.msk.bf16.mxu0 %vm2698_vm12, %v7638_v53  ;;  %v7109_v55 = vpack.c.bf16 %v1563_v47, %v1563_v47 }
 0x18b   : > { %1454 = vrot.lane.b32.xlu1 %v7074_v45, %s7684_s21 }
 0x18c   : > { %v1180_v50 = vpop.permute.xlu0 %1179 }
 0x18d   : > { %v1182_v48 = vpop.permute.xlu1 %1181  ;;  %v7639_v56 = vld [vmem:[#allocation3 + $0x28] sm:$0xff]   ;;  %1262 = vst.msk [vmem:[#allocation3 + $0x38] sm:$0xf] %vm1247_vm6, %v1180_v50 }
 0x18e   : > { %1263 = vst.msk [vmem:[#allocation3 + $0x3c] sm:$0xf] %vm1247_vm6, %v1182_v48  ;;  %1705 = vrot.lane.b32.xlu0 %v8393_v17, %s7685_s22  ;;  %7552 = vmatmul.mubr.msk.bf16.gmra.mxu0 %vm2698_vm12, %v7639_v56  ;;  %v7142_v56 = vpack.c.bf16 %v1822_v27, %v1822_v27 }
 0x18f   : > { %1707 = vrot.lane.b32.xlu1 %v8391_v13, %s7685_s22 }
 0x190   : > { %v1433_v36 = vpop.permute.xlu0 %1432 }
 0x191   : > { %v1435_v33 = vpop.permute.xlu1 %1434  ;;  %1517 = vst.msk [vmem:[#allocation3 + $0x30] sm:$0xf] %vm1504_vm7, %v1433_v36  ;;  %v2079_v36 = vld [vmem:[#allocation2 + $0x171] sm:$0xff] }
 0x192   : > { %1518 = vst.msk [vmem:[#allocation3 + $0x34] sm:$0xf] %vm1504_vm7, %v1435_v33  ;;  %1709 = vrot.lane.b32.xlu0 %v7105_v22, %s7685_s22 }
 0x193   : > { %1711 = vrot.lane.b32.xlu1 %v8440_v20, %s7685_s22 }
 0x194   : > { %v1437_v58 = vpop.permute.xlu0 %1436 }
 0x195   : > { %v1439_v9 = vpop.permute.xlu1 %1438  ;;  %1519 = vst.msk [vmem:[#allocation3 + $0x38] sm:$0xf] %vm1504_vm7, %v1437_v58  ;;  %v7173_v58 = vpack.c.bf16 %v2078_v23, %v2078_v23 }
 0x196   : > { %1520 = vst.msk [vmem:[#allocation3 + $0x3c] sm:$0xf] %vm1504_vm7, %v1439_v9  ;;  %1963 = vrot.lane.b32.xlu0 %v7041_v16, %s7686_s23  ;;  %v7174_v9 = vpack.c.bf16 %v2079_v36, %v2079_v36 }
 0x197   : > { %1965 = vrot.lane.b32.xlu1 %v7042_v14, %s7686_s23 }
 0x198   : > { %v1690_v31 = vpop.permute.xlu0 %1689 }
 0x199   : > { %v1692_v28 = vpop.permute.xlu1 %1691  ;;  %1774 = vst.msk [vmem:[#allocation3 + $0x30] sm:$0xf] %vm1761_vm8, %v1690_v31  ;;  %v2335_v31 = vld [vmem:[#allocation2 + $0x16a] sm:$0xff] }
 0x19a   : > { %1775 = vst.msk [vmem:[#allocation3 + $0x34] sm:$0xf] %vm1761_vm8, %v1692_v28  ;;  %1967 = vrot.lane.b32.xlu0 %v7137_v42, %s7686_s23  ;;  %v2336_v28 = vld [vmem:[#allocation2 + $0x172] sm:$0xff] }
 0x19b   : > { %1969 = vrot.lane.b32.xlu1 %v7138_v4, %s7686_s23 }
 0x19c   : > { %v1694_v63 = vpop.permute.xlu0 %1693 }
 0x19d   : > { %v1696_v29 = vpop.permute.xlu1 %1695  ;;  %1776 = vst.msk [vmem:[#allocation3 + $0x38] sm:$0xf] %vm1761_vm8, %v1694_v63  ;;  %v7205_v63 = vpack.c.bf16 %v2335_v31, %v2335_v31 }
 0x19e   : > { %1777 = vst.msk [vmem:[#allocation3 + $0x3c] sm:$0xf] %vm1761_vm8, %v1696_v29  ;;  %2220 = vrot.lane.b32.xlu0 %v7073_v54, %s7687_s28  ;;  %v7110_v54 = vpack.c.bf16 %v1564_v15, %v1564_v15  ;;  %v7206_v29 = vpack.c.bf16 %v2336_v28, %v2336_v28 }
 0x19f   : > { %2222 = vrot.lane.b32.xlu1 %v7074_v45, %s7687_s28 }
 0x1a0   : > { %v1948_v1 = vpop.permute.xlu0 %1947 }
 0x1a1   : > { %v1950_v5 = vpop.permute.xlu1 %1949  ;;  %2032 = vst.msk [vmem:[#allocation3 + $0x30] sm:$0xf] %vm2019_vm9, %v1948_v1 }
 0x1a2   : > { %2033 = vst.msk [vmem:[#allocation3 + $0x34] sm:$0xf] %vm2019_vm9, %v1950_v5  ;;  %2224 = vrot.lane.b32.xlu0 %v7169_v52, %s7687_s28 }
 0x1a3   : > { %2226 = vrot.lane.b32.xlu1 %v7170_v51, %s7687_s28 }
 0x1a4   : > { %v1952_v7 = vpop.permute.xlu0 %1951 }
 0x1a5   : > { %v1954_v49 = vpop.permute.xlu1 %1953  ;;  %2034 = vst.msk [vmem:[#allocation3 + $0x38] sm:$0xf] %vm2019_vm9, %v1952_v7  ;;  %v1054_v7 = vld [vmem:[#allocation2 + $0x188] sm:$0xff] }
 0x1a6   : > { %2035 = vst.msk [vmem:[#allocation3 + $0x3c] sm:$0xf] %vm2019_vm9, %v1954_v49  ;;  %2477 = vrot.lane.b32.xlu0 %v7105_v22, %s7688_s4 }
 0x1a7   : > { %2479 = vrot.lane.b32.xlu1 %v8440_v20, %s7688_s4 }
 0x1a8   : > { %v2205_v13 = vpop.permute.xlu0 %2204 }
 0x1a9   : > { %v2207_v11 = vpop.permute.xlu1 %2206  ;;  %2289 = vst.msk [vmem:[#allocation3 + $0x30] sm:$0xf] %vm2276_vm10, %v2205_v13 }
 0x1aa   : > { %2290 = vst.msk [vmem:[#allocation3 + $0x34] sm:$0xf] %vm2276_vm10, %v2207_v11  ;;  %2481 = vrot.lane.b32.xlu0 %v7201_v8, %s7688_s4 }
 0x1ab   : > { %2483 = vrot.lane.b32.xlu1 %v7202_v12, %s7688_s4 }
 0x1ac   : > { %v2209_v30 = vpop.permute.xlu0 %2208 }
 0x1ad   : > { %v2211_v17 = vpop.permute.xlu1 %2210  ;;  %2291 = vst.msk [vmem:[#allocation3 + $0x38] sm:$0xf] %vm2276_vm10, %v2209_v30 }
 0x1ae   : > { %2292 = vst.msk [vmem:[#allocation3 + $0x3c] sm:$0xf] %vm2276_vm10, %v2211_v17  ;;  %942 = vrot.lane.b32.xlu0 %v7105_v22, %s7682_s19  ;;  %v7050_v17 = vpack.c.bf16 %v1054_v7, %v1054_v7 }
 0x1af   : > { %944 = vrot.lane.b32.xlu1 %v8440_v20, %s7682_s19  ;;  %v7141_v20 = vpack.c.bf16 %v1821_v2, %v1821_v2 }
 0x1b0   : > { %v2462_v34 = vpop.permute.xlu0 %2461 }
 0x1b1   : > { %v2464_v19 = vpop.permute.xlu1 %2463  ;;  %2546 = vst.msk [vmem:[#allocation3 + $0x30] sm:$0xf] %vm2533_vm11, %v2462_v34 }
 0x1b2   : > { %2547 = vst.msk [vmem:[#allocation3 + $0x34] sm:$0xf] %vm2533_vm11, %v2464_v19  ;;  %946 = vrot.lane.b32.xlu0 %v7201_v8, %s7682_s19 }
 0x1b3   : > { %948 = vrot.lane.b32.xlu1 %v7202_v12, %s7682_s19 }
 0x1b4   : > { %v2466_v25 = vpop.permute.xlu0 %2465 }
 0x1b5   : > { %v2468_v43 = vpop.permute.xlu1 %2467  ;;  %2548 = vst.msk [vmem:[#allocation3 + $0x38] sm:$0xf] %vm2533_vm11, %v2466_v25 }
 0x1b6   : > { %2549 = vst.msk [vmem:[#allocation3 + $0x3c] sm:$0xf] %vm2533_vm11, %v2468_v43  ;;  %1199 = vrot.lane.b32.xlu0 %v7137_v42, %s7683_s20 }
 0x1b7   : > { %1201 = vrot.lane.b32.xlu1 %v7138_v4, %s7683_s20 }
 0x1b8   : > { %v1184_v39 = vpop.permute.xlu0 %1183 }
 0x1b9   : > { %v1186_v37 = vpop.permute.xlu1 %1185  ;;  %v7640_v60 = vld [vmem:[#allocation3 + $0x30] sm:$0xff]   ;;  %1264 = vst.msk [vmem:[#allocation3 + $0x40] sm:$0xf] %vm1247_vm6, %v1184_v39 }
 0x1ba   : > { %1265 = vst.msk [vmem:[#allocation3 + $0x44] sm:$0xf] %vm1247_vm6, %v1186_v37  ;;  %1203 = vrot.lane.b32.xlu0 %v7045_v26, %s7683_s20  ;;  %7555 = vmatprep.mubr.msk.bf16.mxu0 %vm2698_vm12, %v7640_v60  ;;  %v1568_v60 = vld [vmem:[#allocation2 + $0x18a] sm:$0xff] }
 0x1bb   : > { %1205 = vrot.lane.b32.xlu1 %v7046_v24, %s7683_s20 }
 0x1bc   : > { %v1188_v14 = vpop.permute.xlu0 %1187 }
 0x1bd   : > { %v1190_v41 = vpop.permute.xlu1 %1189  ;;  %v7641_v16 = vld [vmem:[#allocation3 + $0x38] sm:$0xff]   ;;  %1266 = vst.msk [vmem:[#allocation3 + $0x48] sm:$0xf] %vm1247_vm6, %v1188_v14  ;;  %v7114_v14 = vpack.c.bf16 %v1568_v60, %v1568_v60 }
 0x1be   : > { %1267 = vst.msk [vmem:[#allocation3 + $0x4c] sm:$0xf] %vm1247_vm6, %v1190_v41  ;;  %1456 = vrot.lane.b32.xlu0 %v7169_v52, %s7684_s21  ;;  %7556 = vmatmul.mubr.msk.bf16.gmra.mxu0 %vm2698_vm12, %v7641_v16  ;;  %v7113_v16 = vpack.c.bf16 %v1567_v61, %v1567_v61 }
 0x1bf   : > { %1458 = vrot.lane.b32.xlu1 %v7170_v51, %s7684_s21 }
 0x1c0   : > { %v1441_v32 = vpop.permute.xlu0 %1440 }
 0x1c1   : > { %v1443_v46 = vpop.permute.xlu1 %1442  ;;  %1521 = vst.msk [vmem:[#allocation3 + $0x40] sm:$0xf] %vm1504_vm7, %v1441_v32  ;;  %v1825_v32 = vld [vmem:[#allocation2 + $0x198] sm:$0xff] }
 0x1c2   : > { %1522 = vst.msk [vmem:[#allocation3 + $0x44] sm:$0xf] %vm1504_vm7, %v1443_v46  ;;  %1460 = vrot.lane.b32.xlu0 %v7077_v3, %s7684_s21  ;;  %v1826_v46 = vld [vmem:[#allocation2 + $0x1a0] sm:$0xff] }
 0x1c3   : > { %1462 = vrot.lane.b32.xlu1 %v7078_v18, %s7684_s21 }
 0x1c4   : > { %v1445_v45 = vpop.permute.xlu0 %1444 }
 0x1c5   : > { %v1447_v44 = vpop.permute.xlu1 %1446  ;;  %1523 = vst.msk [vmem:[#allocation3 + $0x48] sm:$0xf] %vm1504_vm7, %v1445_v45  ;;  %v7145_v45 = vpack.c.bf16 %v1825_v32, %v1825_v32 }
 0x1c6   : > { %1524 = vst.msk [vmem:[#allocation3 + $0x4c] sm:$0xf] %vm1504_vm7, %v1447_v44  ;;  %1713 = vrot.lane.b32.xlu0 %v7201_v8, %s7685_s22  ;;  %v7146_v44 = vpack.c.bf16 %v1826_v46, %v1826_v46 }
 0x1c7   : > { %1715 = vrot.lane.b32.xlu1 %v7202_v12, %s7685_s22  ;;  %v1053_v12 = vld [vmem:[#allocation2 + $0x180] sm:$0xff] }
 0x1c8   : > { %v1698_v53 = vpop.permute.xlu0 %1697  ;;  %v7049_v30 = vpack.c.bf16 %v1053_v12, %v1053_v12 }
 0x1c9   : > { %v1700_v0 = vpop.permute.xlu1 %1699  ;;  %1778 = vst.msk [vmem:[#allocation3 + $0x40] sm:$0xf] %vm1761_vm8, %v1698_v53  ;;  %v2082_v53 = vld [vmem:[#allocation2 + $0x199] sm:$0xff] }
 0x1ca   : > { %1779 = vst.msk [vmem:[#allocation3 + $0x44] sm:$0xf] %vm1761_vm8, %v1700_v0  ;;  %1717 = vrot.lane.b32.xlu0 %v7109_v55, %s7685_s22  ;;  %v2083_v0 = vld [vmem:[#allocation2 + $0x1a1] sm:$0xff] }
 0x1cb   : > { %1719 = vrot.lane.b32.xlu1 %v7110_v54, %s7685_s22 }
 0x1cc   : > { %v1702_v50 = vpop.permute.xlu0 %1701 }
 0x1cd   : > { %v1704_v48 = vpop.permute.xlu1 %1703  ;;  %1780 = vst.msk [vmem:[#allocation3 + $0x48] sm:$0xf] %vm1761_vm8, %v1702_v50  ;;  %v7177_v50 = vpack.c.bf16 %v2082_v53, %v2082_v53 }
 0x1ce   : > { %1781 = vst.msk [vmem:[#allocation3 + $0x4c] sm:$0xf] %vm1761_vm8, %v1704_v48  ;;  %1971 = vrot.lane.b32.xlu0 %v7045_v26, %s7686_s23  ;;  %v7081_v26 = vpack.c.bf16 %v1310_v35, %v1310_v35  ;;  %v7178_v48 = vpack.c.bf16 %v2083_v0, %v2083_v0 }
 0x1cf   : > { %1973 = vrot.lane.b32.xlu1 %v7046_v24, %s7686_s23  ;;  %v7082_v24 = vpack.c.bf16 %v1311_v10, %v1311_v10 }
 0x1d0   : > { %v1956_v33 = vpop.permute.xlu0 %1955 }
 0x1d1   : > { %v1958_v22 = vpop.permute.xlu1 %1957  ;;  %2036 = vst.msk [vmem:[#allocation3 + $0x40] sm:$0xf] %vm2019_vm9, %v1956_v33  ;;  %v2339_v33 = vld [vmem:[#allocation2 + $0x19a] sm:$0xff] }
 0x1d2   : > { %2037 = vst.msk [vmem:[#allocation3 + $0x44] sm:$0xf] %vm2019_vm9, %v1958_v22  ;;  %1975 = vrot.lane.b32.xlu0 %v7141_v20, %s7686_s23  ;;  %v2340_v22 = vld [vmem:[#allocation2 + $0x1a2] sm:$0xff] }
 0x1d3   : > { %1977 = vrot.lane.b32.xlu1 %v7142_v56, %s7686_s23 }
 0x1d4   : > { %v1960_v21 = vpop.permute.xlu0 %1959 }
 0x1d5   : > { %v1962_v38 = vpop.permute.xlu1 %1961  ;;  %2038 = vst.msk [vmem:[#allocation3 + $0x48] sm:$0xf] %vm2019_vm9, %v1960_v21  ;;  %v7209_v21 = vpack.c.bf16 %v2339_v33, %v2339_v33 }
 0x1d6   : > { %2039 = vst.msk [vmem:[#allocation3 + $0x4c] sm:$0xf] %vm2019_vm9, %v1962_v38  ;;  %2228 = vrot.lane.b32.xlu0 %v7077_v3, %s7687_s28  ;;  %v7210_v38 = vpack.c.bf16 %v2340_v22, %v2340_v22 }
 0x1d7   : > { %2230 = vrot.lane.b32.xlu1 %v7078_v18, %s7687_s28 }
 0x1d8   : > { %v2213_v42 = vpop.permute.xlu0 %2212 }
 0x1d9   : > { %v2215_v4 = vpop.permute.xlu1 %2214  ;;  %2293 = vst.msk [vmem:[#allocation3 + $0x40] sm:$0xf] %vm2276_vm10, %v2213_v42 }
 0x1da   : > { %2294 = vst.msk [vmem:[#allocation3 + $0x44] sm:$0xf] %vm2276_vm10, %v2215_v4  ;;  %2232 = vrot.lane.b32.xlu0 %v7173_v58, %s7687_s28 }
 0x1db   : > { %2234 = vrot.lane.b32.xlu1 %v7174_v9, %s7687_s28 }
 0x1dc   : > { %v2217_v59 = vpop.permute.xlu0 %2216 }
 0x1dd   : > { %v2219_v62 = vpop.permute.xlu1 %2218  ;;  %2295 = vst.msk [vmem:[#allocation3 + $0x48] sm:$0xf] %vm2276_vm10, %v2217_v59 }
 0x1de   : > { %2296 = vst.msk [vmem:[#allocation3 + $0x4c] sm:$0xf] %vm2276_vm10, %v2219_v62  ;;  %2485 = vrot.lane.b32.xlu0 %v7109_v55, %s7688_s4 }
 0x1df   : > { %2487 = vrot.lane.b32.xlu1 %v7110_v54, %s7688_s4 }
 0x1e0   : > { %v2470_v52 = vpop.permute.xlu0 %2469 }
 0x1e1   : > { %v2472_v51 = vpop.permute.xlu1 %2471  ;;  %2550 = vst.msk [vmem:[#allocation3 + $0x40] sm:$0xf] %vm2533_vm11, %v2470_v52 }
 0x1e2   : > { %2551 = vst.msk [vmem:[#allocation3 + $0x44] sm:$0xf] %vm2533_vm11, %v2472_v51  ;;  %2489 = vrot.lane.b32.xlu0 %v7205_v63, %s7688_s4 }
 0x1e3   : > { %2491 = vrot.lane.b32.xlu1 %v7206_v29, %s7688_s4 }
 0x1e4   : > { %v2474_v1 = vpop.permute.xlu0 %2473 }
 0x1e5   : > { %v2476_v5 = vpop.permute.xlu1 %2475  ;;  %2552 = vst.msk [vmem:[#allocation3 + $0x48] sm:$0xf] %vm2533_vm11, %v2474_v1 }
 0x1e6   : > { %2553 = vst.msk [vmem:[#allocation3 + $0x4c] sm:$0xf] %vm2533_vm11, %v2476_v5  ;;  %950 = vrot.lane.b32.xlu0 %v7109_v55, %s7682_s19 }
 0x1e7   : > { %952 = vrot.lane.b32.xlu1 %v7110_v54, %s7682_s19 }
 0x1e8   : > { %v935_v57 = vpop.permute.xlu0 %934 }
 0x1e9   : > { %v937_v6 = vpop.permute.xlu1 %936  ;;  %v7642_v49 = vld [vmem:[#allocation3 + $0x40] sm:$0xff]   ;;  %1011 = vst.msk [vmem:[#allocation3 + $0x50] sm:$0xf] %vm990_vm5, %v935_v57 }
 0x1ea   : > { %1012 = vst.msk [vmem:[#allocation3 + $0x54] sm:$0xf] %vm990_vm5, %v937_v6  ;;  %954 = vrot.lane.b32.xlu0 %v7205_v63, %s7682_s19  ;;  %7559 = vmatprep.mubr.msk.bf16.mxu0 %vm2698_vm12, %v7642_v49 }
 0x1eb   : > { %956 = vrot.lane.b32.xlu1 %v7206_v29, %s7682_s19 }
 0x1ec   : > { %v939_v11 = vpop.permute.xlu0 %938 }
 0x1ed   : > { %v941_v8 = vpop.permute.xlu1 %940  ;;  %v7643_v13 = vld [vmem:[#allocation3 + $0x48] sm:$0xff]   ;;  %1013 = vst.msk [vmem:[#allocation3 + $0x58] sm:$0xf] %vm990_vm5, %v939_v11 }
 0x1ee   : > { %1014 = vst.msk [vmem:[#allocation3 + $0x5c] sm:$0xf] %vm990_vm5, %v941_v8  ;;  %1207 = vrot.lane.b32.xlu0 %v7141_v20, %s7683_s20  ;;  %7560 = vmatmul.mubr.msk.bf16.gmra.mxu0 %vm2698_vm12, %v7643_v13 }
 0x1ef   : > { %1209 = vrot.lane.b32.xlu1 %v7142_v56, %s7683_s20 }
 0x1f0   : > { %v1192_v34 = vpop.permute.xlu0 %1191 }
 0x1f1   : > { %v1194_v19 = vpop.permute.xlu1 %1193  ;;  %1268 = vst.msk [vmem:[#allocation3 + $0x50] sm:$0xf] %vm1247_vm6, %v1192_v34 }
 0x1f2   : > { %1269 = vst.msk [vmem:[#allocation3 + $0x54] sm:$0xf] %vm1247_vm6, %v1194_v19  ;;  %1211 = vrot.lane.b32.xlu0 %v7049_v30, %s7683_s20 }
 0x1f3   : > { %1213 = vrot.lane.b32.xlu1 %v7050_v17, %s7683_s20 }
 0x1f4   : > { %v1196_v25 = vpop.permute.xlu0 %1195 }
 0x1f5   : > { %v1198_v43 = vpop.permute.xlu1 %1197  ;;  %1270 = vst.msk [vmem:[#allocation3 + $0x58] sm:$0xf] %vm1247_vm6, %v1196_v25 }
 0x1f6   : > { %1271 = vst.msk [vmem:[#allocation3 + $0x5c] sm:$0xf] %vm1247_vm6, %v1198_v43  ;;  %1464 = vrot.lane.b32.xlu0 %v7173_v58, %s7684_s21 }
 0x1f7   : > { %1466 = vrot.lane.b32.xlu1 %v7174_v9, %s7684_s21 }
 0x1f8   : > { %v1449_v39 = vpop.permute.xlu0 %1448 }
 0x1f9   : > { %v1451_v37 = vpop.permute.xlu1 %1450  ;;  %1525 = vst.msk [vmem:[#allocation3 + $0x50] sm:$0xf] %vm1504_vm7, %v1449_v39 }
 0x1fa   : > { %1526 = vst.msk [vmem:[#allocation3 + $0x54] sm:$0xf] %vm1504_vm7, %v1451_v37  ;;  %1468 = vrot.lane.b32.xlu0 %v7081_v26, %s7684_s21 }
 0x1fb   : > { %1470 = vrot.lane.b32.xlu1 %v7082_v24, %s7684_s21 }
 0x1fc   : > { %v1453_v41 = vpop.permute.xlu0 %1452 }
 0x1fd   : > { %v1455_v40 = vpop.permute.xlu1 %1454  ;;  %1527 = vst.msk [vmem:[#allocation3 + $0x58] sm:$0xf] %vm1504_vm7, %v1453_v41 }
 0x1fe   : > { %1528 = vst.msk [vmem:[#allocation3 + $0x5c] sm:$0xf] %vm1504_vm7, %v1455_v40  ;;  %1721 = vrot.lane.b32.xlu0 %v7205_v63, %s7685_s22 }
 0x1ff   : > { %1723 = vrot.lane.b32.xlu1 %v7206_v29, %s7685_s22 }
 0x200   : > { %v1706_v3 = vpop.permute.xlu0 %1705 }
 0x201   : > { %v1708_v18 = vpop.permute.xlu1 %1707  ;;  %1782 = vst.msk [vmem:[#allocation3 + $0x50] sm:$0xf] %vm1761_vm8, %v1706_v3 }
 0x202   : > { %1783 = vst.msk [vmem:[#allocation3 + $0x54] sm:$0xf] %vm1761_vm8, %v1708_v18  ;;  %1725 = vrot.lane.b32.xlu0 %v7113_v16, %s7685_s22 }
 0x203   : > { %1727 = vrot.lane.b32.xlu1 %v7114_v14, %s7685_s22 }
 0x204   : > { %v1710_v47 = vpop.permute.xlu0 %1709 }
 0x205   : > { %v1712_v15 = vpop.permute.xlu1 %1711  ;;  %1784 = vst.msk [vmem:[#allocation3 + $0x58] sm:$0xf] %vm1761_vm8, %v1710_v47 }
 0x206   : > { %1785 = vst.msk [vmem:[#allocation3 + $0x5c] sm:$0xf] %vm1761_vm8, %v1712_v15  ;;  %1979 = vrot.lane.b32.xlu0 %v7049_v30, %s7686_s23 }
 0x207   : > { %1981 = vrot.lane.b32.xlu1 %v7050_v17, %s7686_s23 }
 0x208   : > { %v1964_v55 = vpop.permute.xlu0 %1963 }
 0x209   : > { %v1966_v54 = vpop.permute.xlu1 %1965  ;;  %2040 = vst.msk [vmem:[#allocation3 + $0x50] sm:$0xf] %vm2019_vm9, %v1964_v55 }
 0x20a   : > { %2041 = vst.msk [vmem:[#allocation3 + $0x54] sm:$0xf] %vm2019_vm9, %v1966_v54  ;;  %1983 = vrot.lane.b32.xlu0 %v7145_v45, %s7686_s23 }
 0x20b   : > { %1985 = vrot.lane.b32.xlu1 %v7146_v44, %s7686_s23 }
 0x20c   : > { %v1968_v2 = vpop.permute.xlu0 %1967 }
 0x20d   : > { %v1970_v27 = vpop.permute.xlu1 %1969  ;;  %2042 = vst.msk [vmem:[#allocation3 + $0x58] sm:$0xf] %vm2019_vm9, %v1968_v2 }
 0x20e   : > { %2043 = vst.msk [vmem:[#allocation3 + $0x5c] sm:$0xf] %vm2019_vm9, %v1970_v27  ;;  %2236 = vrot.lane.b32.xlu0 %v7081_v26, %s7687_s28 }
 0x20f   : > { %2238 = vrot.lane.b32.xlu1 %v7082_v24, %s7687_s28 }
 0x210   : > { %v2221_v20 = vpop.permute.xlu0 %2220 }
 0x211   : > { %v2223_v56 = vpop.permute.xlu1 %2222  ;;  %2297 = vst.msk [vmem:[#allocation3 + $0x50] sm:$0xf] %vm2276_vm10, %v2221_v20 }
 0x212   : > { %2298 = vst.msk [vmem:[#allocation3 + $0x54] sm:$0xf] %vm2276_vm10, %v2223_v56  ;;  %2240 = vrot.lane.b32.xlu0 %v7177_v50, %s7687_s28 }
 0x213   : > { %2242 = vrot.lane.b32.xlu1 %v7178_v48, %s7687_s28 }
 0x214   : > { %v2225_v23 = vpop.permute.xlu0 %2224 }
 0x215   : > { %v2227_v36 = vpop.permute.xlu1 %2226  ;;  %2299 = vst.msk [vmem:[#allocation3 + $0x58] sm:$0xf] %vm2276_vm10, %v2225_v23 }
 0x216   : > { %2300 = vst.msk [vmem:[#allocation3 + $0x5c] sm:$0xf] %vm2276_vm10, %v2227_v36  ;;  %2493 = vrot.lane.b32.xlu0 %v7113_v16, %s7688_s4 }
 0x217   : > { %2495 = vrot.lane.b32.xlu1 %v7114_v14, %s7688_s4 }
 0x218   : > { %v2478_v58 = vpop.permute.xlu0 %2477 }
 0x219   : > { %v2480_v9 = vpop.permute.xlu1 %2479  ;;  %2554 = vst.msk [vmem:[#allocation3 + $0x50] sm:$0xf] %vm2533_vm11, %v2478_v58 }
 0x21a   : > { %2555 = vst.msk [vmem:[#allocation3 + $0x54] sm:$0xf] %vm2533_vm11, %v2480_v9  ;;  %2497 = vrot.lane.b32.xlu0 %v7209_v21, %s7688_s4 }
 0x21b   : > { %2499 = vrot.lane.b32.xlu1 %v7210_v38, %s7688_s4 }
 0x21c   : > { %v2482_v42 = vpop.permute.xlu0 %2481 }
 0x21d   : > { %v2484_v4 = vpop.permute.xlu1 %2483  ;;  %2556 = vst.msk [vmem:[#allocation3 + $0x58] sm:$0xf] %vm2533_vm11, %v2482_v42 }
 0x21e   : > { %2557 = vst.msk [vmem:[#allocation3 + $0x5c] sm:$0xf] %vm2533_vm11, %v2484_v4  ;;  %v8655_v4 = vpop.f32.mrf.mxu0 }
 0x220   : > { %v943_v31 = vpop.permute.xlu0 %942  ;;  %v8657_v42 = vpop.f32.mrf.mxu0 }
 0x221   : > { %v945_v28 = vpop.permute.xlu1 %944  ;;  %v7644_v62 = vld [vmem:[#allocation3 + $0x50] sm:$0xff]   ;;  %1015 = vst.msk [vmem:[#allocation3 + $0x60] sm:$0xf] %vm990_vm5, %v943_v31 }
 0x222   : > { %1016 = vst.msk [vmem:[#allocation3 + $0x64] sm:$0xf] %vm990_vm5, %v945_v28  ;;  %7563 = vmatprep.mubr.msk.bf16.mxu0 %vm2698_vm12, %v7644_v62  ;;  %v8659_v28 = vpop.f32.mrf.mxu0 }
 0x224   : > { %v947_v29 = vpop.permute.xlu0 %946  ;;  %v8661_v31 = vpop.f32.mrf.mxu0 }
 0x225   : > { %v949_v59 = vpop.permute.xlu1 %948  ;;  %v7645_v63 = vld [vmem:[#allocation3 + $0x58] sm:$0xff]   ;;  %1017 = vst.msk [vmem:[#allocation3 + $0x68] sm:$0xf] %vm990_vm5, %v947_v29 }
 0x226   : > { %1018 = vst.msk [vmem:[#allocation3 + $0x6c] sm:$0xf] %vm990_vm5, %v949_v59  ;;  %7564 = vmatmul.mubr.msk.bf16.gmra.mxu0 %vm2698_vm12, %v7645_v63  ;;  %v8663_v62 = vpop.f32.mrf.mxu0 }
 0x228   : > { %v1200_v52 = vpop.permute.xlu0 %1199  ;;  %v8665_v59 = vpop.f32.mrf.mxu0 }
 0x229   : > { %v1202_v51 = vpop.permute.xlu1 %1201  ;;  %1272 = vst.msk [vmem:[#allocation3 + $0x60] sm:$0xf] %vm1247_vm6, %v1200_v52 }
 0x22a   : > { %1273 = vst.msk [vmem:[#allocation3 + $0x64] sm:$0xf] %vm1247_vm6, %v1202_v51  ;;  %v8667_v29 = vpop.f32.mrf.mxu0  ;;  %v2913_v51 = vsel %vm205_vm0, %v8661_v31, 0.0 }
 0x22c   : > { %v1204_v1 = vpop.permute.xlu0 %1203  ;;  %v8669_v63 = vpop.f32.mrf.mxu0 }
 0x22d   : > { %v1206_v5 = vpop.permute.xlu1 %1205  ;;  %1274 = vst.msk [vmem:[#allocation3 + $0x68] sm:$0xf] %vm1247_vm6, %v1204_v1 }
 0x22e   : > { %1275 = vst.msk [vmem:[#allocation3 + $0x6c] sm:$0xf] %vm1247_vm6, %v1206_v5  ;;  %v2912_v5 = vsel %vm205_vm0, %v8657_v42, 0.0 }
 0x22f   : > { %v2914_v1 = vadd.f32 %v2913_v51, %v2912_v5 }
 0x230   : > { %v1457_v57 = vpop.permute.xlu0 %1456 }
 0x231   : > { %v1459_v6 = vpop.permute.xlu1 %1458  ;;  %1529 = vst.msk [vmem:[#allocation3 + $0x60] sm:$0xf] %vm1504_vm7, %v1457_v57  ;;  %v2915_v57 = vsel %vm205_vm0, %v8655_v4, 0.0 }
 0x232   : > { %1530 = vst.msk [vmem:[#allocation3 + $0x64] sm:$0xf] %vm1504_vm7, %v1459_v6 }
 0x234   : > { %v1461_v7 = vpop.permute.xlu0 %1460 }
 0x235   : > { %v1463_v49 = vpop.permute.xlu1 %1462  ;;  %1531 = vst.msk [vmem:[#allocation3 + $0x68] sm:$0xf] %vm1504_vm7, %v1461_v7 }
 0x236   : > { %1532 = vst.msk [vmem:[#allocation3 + $0x6c] sm:$0xf] %vm1504_vm7, %v1463_v49  ;;  %v2916_v49 = vadd.f32 %v2915_v57, %v2914_v1 }
 0x238   : > { %v1714_v8 = vpop.permute.xlu0 %1713 }
 0x239   : > { %v1716_v12 = vpop.permute.xlu1 %1715  ;;  %1786 = vst.msk [vmem:[#allocation3 + $0x60] sm:$0xf] %vm1761_vm8, %v1714_v8  ;;  %v2919_v8 = vsel %vm205_vm0, %v8665_v59, 0.0 }
 0x23a   : > { %1787 = vst.msk [vmem:[#allocation3 + $0x64] sm:$0xf] %vm1761_vm8, %v1716_v12  ;;  %v2917_v12 = vsel %vm205_vm0, %v8659_v28, 0.0 }
 0x23c   : > { %v1718_v13 = vpop.permute.xlu0 %1717 }
 0x23d   : > { %v1720_v11 = vpop.permute.xlu1 %1719  ;;  %1788 = vst.msk [vmem:[#allocation3 + $0x68] sm:$0xf] %vm1761_vm8, %v1718_v13  ;;  %v2921_v13 = vsel %vm205_vm0, %v8669_v63, 0.0 }
 0x23e   : > { %1789 = vst.msk [vmem:[#allocation3 + $0x6c] sm:$0xf] %vm1761_vm8, %v1720_v11  ;;  %v2918_v11 = vadd.f32 %v2917_v12, %v2916_v49 }
 0x240   : > { %v1972_v30 = vpop.permute.xlu0 %1971 }
 0x241   : > { %v1974_v17 = vpop.permute.xlu1 %1973  ;;  %2044 = vst.msk [vmem:[#allocation3 + $0x60] sm:$0xf] %vm2019_vm9, %v1972_v30 }
 0x242   : > { %2045 = vst.msk [vmem:[#allocation3 + $0x64] sm:$0xf] %vm2019_vm9, %v1974_v17  ;;  %v2920_v17 = vadd.f32 %v2919_v8, %v2918_v11 }
 0x244   : > { %v1976_v34 = vpop.permute.xlu0 %1975 }
 0x245   : > { %v1978_v19 = vpop.permute.xlu1 %1977  ;;  %2046 = vst.msk [vmem:[#allocation3 + $0x68] sm:$0xf] %vm2019_vm9, %v1976_v34 }
 0x246   : > { %2047 = vst.msk [vmem:[#allocation3 + $0x6c] sm:$0xf] %vm2019_vm9, %v1978_v19  ;;  %v2922_v19 = vadd.f32 %v2921_v13, %v2920_v17 }
 0x248   : > { %v2229_v35 = vpop.permute.xlu0 %2228 }
 0x249   : > { %v2231_v10 = vpop.permute.xlu1 %2230  ;;  %2301 = vst.msk [vmem:[#allocation3 + $0x60] sm:$0xf] %vm2276_vm10, %v2229_v35 }
 0x24a   : > { %2302 = vst.msk [vmem:[#allocation3 + $0x64] sm:$0xf] %vm2276_vm10, %v2231_v10  ;;  %v2923_v10 = vsel %vm205_vm0, %v8663_v62, 0.0 }
 0x24b   : > { %v2924_v35 = vadd.f32 %v2923_v10, %v2922_v19 }
 0x24c   : > { %v2233_v25 = vpop.permute.xlu0 %2232 }
 0x24d   : > { %v2235_v43 = vpop.permute.xlu1 %2234  ;;  %2303 = vst.msk [vmem:[#allocation3 + $0x68] sm:$0xf] %vm2276_vm10, %v2233_v25  ;;  %v2925_v25 = vsel %vm205_vm0, %v8667_v29, 0.0 }
 0x24e   : > { %2304 = vst.msk [vmem:[#allocation3 + $0x6c] sm:$0xf] %vm2276_vm10, %v2235_v43  ;;  %v8673_v52 = vpop.f32.mrf.mxu0 }
 0x250   : > { %v2486_v26 = vpop.permute.xlu0 %2485  ;;  %v8677_v6 = vpop.f32.mrf.mxu0 }
 0x251   : > { %v2488_v24 = vpop.permute.xlu1 %2487  ;;  %2558 = vst.msk [vmem:[#allocation3 + $0x60] sm:$0xf] %vm2533_vm11, %v2486_v26  ;;  %v2926_v26 = vadd.f32 %v2925_v25, %v2924_v35 }
 0x252   : > { %2559 = vst.msk [vmem:[#allocation3 + $0x64] sm:$0xf] %vm2533_vm11, %v2488_v24  ;;  %v8681_v7 = vpop.f32.mrf.mxu0  ;;  %v2927_v24 = vsel %vm205_vm0, %v8677_v6, 0.0 }
 0x254   : > { %v2490_v39 = vpop.permute.xlu0 %2489  ;;  %v8689_v30 = vpop.f32.mrf.mxu0 }
 0x255   : > { %v2492_v37 = vpop.permute.xlu1 %2491  ;;  %2560 = vst.msk [vmem:[#allocation3 + $0x68] sm:$0xf] %vm2533_vm11, %v2490_v39  ;;  %v2929_v39 = vsel %vm205_vm0, %v8689_v30, 0.0 }
 0x256   : > { %2561 = vst.msk [vmem:[#allocation3 + $0x6c] sm:$0xf] %vm2533_vm11, %v2492_v37 }
 0x258   : > { %v951_v61 = vpop.permute.xlu0 %950 }
 0x259   : > { %v953_v60 = vpop.permute.xlu1 %952  ;;  %v7646_v40 = vld [vmem:[#allocation3 + $0x60] sm:$0xff]   ;;  %1019 = vst.msk [vmem:[#allocation3 + $0x70] sm:$0xf] %vm990_vm5, %v951_v61 }
 0x25a   : > { %1020 = vst.msk [vmem:[#allocation3 + $0x74] sm:$0xf] %vm990_vm5, %v953_v60  ;;  %7567 = vmatprep.mubr.msk.bf16.mxu0 %vm2698_vm12, %v7646_v40  ;;  %v2928_v60 = vadd.f32 %v2927_v24, %v2926_v26 }
 0x25c   : > { %v955_v14 = vpop.permute.xlu0 %954  ;;  %v2930_v61 = vadd.f32 %v2929_v39, %v2928_v60 }
 0x25d   : > { %v957_v41 = vpop.permute.xlu1 %956  ;;  %v7647_v16 = vld [vmem:[#allocation3 + $0x68] sm:$0xff]   ;;  %1021 = vst.msk [vmem:[#allocation3 + $0x78] sm:$0xf] %vm990_vm5, %v955_v14  ;;  %v2931_v14 = vsel %vm205_vm0, %v8673_v52, 0.0 }
 0x25e   : > { %1022 = vst.msk [vmem:[#allocation3 + $0x7c] sm:$0xf] %vm990_vm5, %v957_v41  ;;  %7568 = vmatmul.mubr.msk.bf16.gmra.mxu0 %vm2698_vm12, %v7647_v16  ;;  %v2932_v16 = vadd.f32 %v2931_v14, %v2930_v61 }
 0x260   : > { %v1208_v3 = vpop.permute.xlu0 %1207 }
 0x261   : > { %v1210_v18 = vpop.permute.xlu1 %1209  ;;  %1276 = vst.msk [vmem:[#allocation3 + $0x70] sm:$0xf] %vm1247_vm6, %v1208_v3  ;;  %v2933_v3 = vsel %vm205_vm0, %v8681_v7, 0.0 }
 0x262   : > { %1277 = vst.msk [vmem:[#allocation3 + $0x74] sm:$0xf] %vm1247_vm6, %v1210_v18 }
 0x264   : > { %v1212_v32 = vpop.permute.xlu0 %1211 }
 0x265   : > { %v1214_v46 = vpop.permute.xlu1 %1213  ;;  %1278 = vst.msk [vmem:[#allocation3 + $0x78] sm:$0xf] %vm1247_vm6, %v1212_v32  ;;  %v2934_v32 = vadd.f32 %v2933_v3, %v2932_v16 }
 0x266   : > { %1279 = vst.msk [vmem:[#allocation3 + $0x7c] sm:$0xf] %vm1247_vm6, %v1214_v46 }
 0x268   : > { %v1465_v47 = vpop.permute.xlu0 %1464 }
 0x269   : > { %v1467_v15 = vpop.permute.xlu1 %1466  ;;  %1533 = vst.msk [vmem:[#allocation3 + $0x70] sm:$0xf] %vm1504_vm7, %v1465_v47 }
 0x26a   : > { %1534 = vst.msk [vmem:[#allocation3 + $0x74] sm:$0xf] %vm1504_vm7, %v1467_v15 }
 0x26c   : > { %v1469_v45 = vpop.permute.xlu0 %1468 }
 0x26d   : > { %v1471_v44 = vpop.permute.xlu1 %1470  ;;  %1535 = vst.msk [vmem:[#allocation3 + $0x78] sm:$0xf] %vm1504_vm7, %v1469_v45 }
 0x26e   : > { %1536 = vst.msk [vmem:[#allocation3 + $0x7c] sm:$0xf] %vm1504_vm7, %v1471_v44 }
 0x270   : > { %v1722_v55 = vpop.permute.xlu0 %1721 }
 0x271   : > { %v1724_v54 = vpop.permute.xlu1 %1723  ;;  %1790 = vst.msk [vmem:[#allocation3 + $0x70] sm:$0xf] %vm1761_vm8, %v1722_v55 }
 0x272   : > { %1791 = vst.msk [vmem:[#allocation3 + $0x74] sm:$0xf] %vm1761_vm8, %v1724_v54 }
 0x274   : > { %v1726_v53 = vpop.permute.xlu0 %1725 }
 0x275   : > { %v1728_v0 = vpop.permute.xlu1 %1727  ;;  %1792 = vst.msk [vmem:[#allocation3 + $0x78] sm:$0xf] %vm1761_vm8, %v1726_v53 }
 0x276   : > { %1793 = vst.msk [vmem:[#allocation3 + $0x7c] sm:$0xf] %vm1761_vm8, %v1728_v0 }
 0x278   : > { %v1980_v2 = vpop.permute.xlu0 %1979 }
 0x279   : > { %v1982_v27 = vpop.permute.xlu1 %1981  ;;  %2048 = vst.msk [vmem:[#allocation3 + $0x70] sm:$0xf] %vm2019_vm9, %v1980_v2 }
 0x27a   : > { %2049 = vst.msk [vmem:[#allocation3 + $0x74] sm:$0xf] %vm2019_vm9, %v1982_v27 }
 0x27c   : > { %v1984_v50 = vpop.permute.xlu0 %1983 }
 0x27d   : > { %v1986_v48 = vpop.permute.xlu1 %1985  ;;  %2050 = vst.msk [vmem:[#allocation3 + $0x78] sm:$0xf] %vm2019_vm9, %v1984_v50 }
 0x27e   : > { %2051 = vst.msk [vmem:[#allocation3 + $0x7c] sm:$0xf] %vm2019_vm9, %v1986_v48  ;;  %v8691_v34 = vpop.f32.mrf.mxu0 }
 0x27f   : > { %v2939_v55 = vsel %vm205_vm0, %v8691_v34, 0.0 }
 0x280   : > { %v2237_v20 = vpop.permute.xlu0 %2236  ;;  %v8695_v43 = vpop.f32.mrf.mxu0 }
 0x281   : > { %v2239_v56 = vpop.permute.xlu1 %2238  ;;  %2305 = vst.msk [vmem:[#allocation3 + $0x70] sm:$0xf] %vm2276_vm10, %v2237_v20  ;;  %v2935_v46 = vsel %vm205_vm0, %v8695_v43, 0.0 }
 0x282   : > { %2306 = vst.msk [vmem:[#allocation3 + $0x74] sm:$0xf] %vm2276_vm10, %v2239_v56  ;;  %v8701_v37 = vpop.f32.mrf.mxu0  ;;  %v2936_v47 = vadd.f32 %v2935_v46, %v2934_v32 }
 0x283   : > { %v2941_v27 = vsel %vm205_vm0, %v8701_v37, 0.0 }
 0x284   : > { %v2241_v33 = vpop.permute.xlu0 %2240  ;;  %v8705_v40 = vpop.f32.mrf.mxu0 }
 0x285   : > { %v2243_v22 = vpop.permute.xlu1 %2242  ;;  %2307 = vst.msk [vmem:[#allocation3 + $0x78] sm:$0xf] %vm2276_vm10, %v2241_v33  ;;  %v2937_v15 = vsel %vm205_vm0, %v8705_v40, 0.0 }
 0x286   : > { %2308 = vst.msk [vmem:[#allocation3 + $0x7c] sm:$0xf] %vm2276_vm10, %v2243_v22  ;;  %v2938_v45 = vadd.f32 %v2937_v15, %v2936_v47 }
 0x288   : > { %v2494_v23 = vpop.permute.xlu0 %2493  ;;  %v2940_v0 = vadd.f32 %v2939_v55, %v2938_v45 }
 0x289   : > { %v2496_v36 = vpop.permute.xlu1 %2495  ;;  %2562 = vst.msk [vmem:[#allocation3 + $0x70] sm:$0xf] %vm2533_vm11, %v2494_v23 }
 0x28a   : > { %2563 = vst.msk [vmem:[#allocation3 + $0x74] sm:$0xf] %vm2533_vm11, %v2496_v36  ;;  %v2942_v48 = vadd.f32 %v2941_v27, %v2940_v0 }
 0x28c   : > { %v2498_v21 = vpop.permute.xlu0 %2497 }
 0x28d   : > { %v2500_v38 = vpop.permute.xlu1 %2499  ;;  %2564 = vst.msk [vmem:[#allocation3 + $0x78] sm:$0xf] %vm2533_vm11, %v2498_v21 }
 0x28e   : > { %2565 = vst.msk [vmem:[#allocation3 + $0x7c] sm:$0xf] %vm2533_vm11, %v2500_v38 }
 0x291   : > { %v7648_v9 = vld [vmem:[#allocation3 + $0x70] sm:$0xff]  }
 0x292   : > { %7571 = vmatprep.mubr.msk.bf16.mxu0 %vm2698_vm12, %v7648_v9 }
 0x295   : > { %v7649_v58 = vld [vmem:[#allocation3 + $0x78] sm:$0xff]  }
 0x296   : > { %7572 = vmatmul.mubr.msk.bf16.gmra.mxu0 %vm2698_vm12, %v7649_v58 }
 0x2ae   : > { %v8707_v41 = vpop.f32.mrf.mxu0 }
 0x2af   : > { %v2947_v36 = vsel %vm205_vm0, %v8707_v41, 0.0 }
 0x2b0   : > { %v8711_v18 = vpop.f32.mrf.mxu0 }
 0x2b1   : > { %v2943_v2 = vsel %vm205_vm0, %v8711_v18, 0.0 }
 0x2b2   : > { %v8719_v44 = vpop.f32.mrf.mxu0  ;;  %v2944_v20 = vadd.f32 %v2943_v2, %v2942_v48 }
 0x2b3   : > { %v2949_v9 = vsel %vm205_vm0, %v8719_v44, 0.0 }
 0x2b4   : > { %v8721_v54 = vpop.f32.mrf.mxu0 }
 0x2b5   : > { %v2945_v56 = vsel %vm205_vm0, %v8721_v54, 0.0 }
 0x2b6   : > { %v2946_v22 = vadd.f32 %v2945_v56, %v2944_v20 }
 0x2b8   : > { %v2948_v23 = vadd.f32 %v2947_v36, %v2946_v22 }
 0x2ba   : > { %v2950_v51 = vadd.f32 %v2949_v9, %v2948_v23 }
 0x2e6   : > { %v8725_v53 = vpop.f32.mrf.mxu0 }
 0x2e7   : > { %v2955_v8 = vsel %vm205_vm0, %v8725_v53, 0.0 }
 0x2e8   : > { %v8731_v50 = vpop.f32.mrf.mxu0 }
 0x2e9   : > { %v2951_v58 = vsel %vm205_vm0, %v8731_v50, 0.0 }
 0x2ea   : > { %v8735_v33 = vpop.f32.mrf.mxu0  ;;  %v2952_v1 = vadd.f32 %v2951_v58, %v2950_v51 }
 0x2eb   : > { %v2957_v17 = vsel %vm205_vm0, %v8735_v33, 0.0 }
 0x2ec   : > { %v8739_v38 = vpop.f32.mrf.mxu0 }
 0x2ed   : > { %v2953_v5 = vsel %vm205_vm0, %v8739_v38, 0.0 }
 0x2ee   : > { %v2954_v49 = vadd.f32 %v2953_v5, %v2952_v1 }
 0x2f0   : > { %v2956_v11 = vadd.f32 %v2955_v8, %v2954_v49 }
 0x2f2   : > { %v2958_v10 = vadd.f32 %v2957_v17, %v2956_v11 }
 0x31e   : > { %v8741_v21 = vpop.f32.mrf.mxu0 }
 0x31f   : > { %v2963_v26 = vsel %vm205_vm0, %v8741_v21, 0.0 }
 0x320   : > { %v8749_v57 = vpop.f32.mrf.mxu0 }
 0x321   : > { %v2959_v19 = vsel %vm205_vm0, %v8749_v57, 0.0 }
 0x322   : > { %v8751_v12 = vpop.f32.mrf.mxu0  ;;  %v2960_v25 = vadd.f32 %v2959_v19, %v2958_v10 }
 0x323   : > { %v2965_v14 = vsel %vm205_vm0, %v8751_v12, 0.0 }
 0x324   : > { %v8755_v13 = vpop.f32.mrf.mxu0 }
 0x325   : > { %v2961_v35 = vsel %vm205_vm0, %v8755_v13, 0.0 }
 0x326   : > { %v2962_v24 = vadd.f32 %v2961_v35, %v2960_v25 }
 0x328   : > { %v2964_v39 = vadd.f32 %v2963_v26, %v2962_v24 }
 0x32a   : > { %v2966_v3 = vadd.f32 %v2965_v14, %v2964_v39 }
 0x356   : > { %v8765_v60 = vpop.f32.mrf.mxu0 }
 0x357   : > { %v2971_v55 = vsel %vm205_vm0, %v8765_v60, 0.0 }
 0x358   : > { %v8767_v61 = vpop.f32.mrf.mxu0 }
 0x359   : > { %v2967_v16 = vsel %vm205_vm0, %v8767_v61, 0.0 }
 0x35a   : > { %v8773_v46 = vpop.f32.mrf.mxu0  ;;  %v2968_v32 = vadd.f32 %v2967_v16, %v2966_v3 }
 0x35b   : > { %v2973_v27 = vsel %vm205_vm0, %v8773_v46, 0.0 }
 0x35c   : > { %v8775_v15 = vpop.f32.mrf.mxu0 }
 0x35d   : > { %v2969_v47 = vsel %vm205_vm0, %v8775_v15, 0.0 }
 0x35e   : > { %v2970_v45 = vadd.f32 %v2969_v47, %v2968_v32 }
 0x360   : > { %v2972_v0 = vadd.f32 %v2971_v55, %v2970_v45 }
 0x362   : > { %v2974_v2 = vadd.f32 %v2973_v27, %v2972_v0 }
 0x364   : > { %v2975_v48 = vrot.slane %v2974_v2, 4 }
 0x366   : > { %v2976_v56 = vadd.f32 %v2975_v48, %v2974_v2 }
 0x368   : > { %v2977_v20 = vrot.slane %v2976_v56, 2 }
 0x36a   : > { %v2978_v22 = vadd.f32 %v2977_v20, %v2976_v56 }
 0x36c   : > { %v2979_v36 = vrot.slane %v2978_v22, 1 }
 0x36e   : > { %v2980_v23 = vadd.f32 %v2979_v36, %v2978_v22 }
 0x370   : > { %v8783_v9 = vmul.f32 0.00390625, %v2980_v23 }
 0x372   : > { %v8787_v58 = vsub.f32 %v8657_v42, %v8783_v9  ;;  %v8791_v51 = vsub.f32 %v8661_v31, %v8783_v9  ;;  %v8795_v5 = vsub.f32 %v8655_v4, %v8783_v9  ;;  %v8799_v1 = vsub.f32 %v8659_v28, %v8783_v9 }
 0x373   : > { %v8807_v42 = vsub.f32 %v8665_v59, %v8783_v9  ;;  %v8813_v4 = vsub.f32 %v8669_v63, %v8783_v9  ;;  %v8821_v10 = vsub.f32 %v8663_v62, %v8783_v9  ;;  %v8828_v63 = vsub.f32 %v8667_v29, %v8783_v9 }
 0x374   : > { %v3015_v49 = vmul.f32 %v8787_v58, %v8787_v58  ;;  %v3016_v8 = vmul.f32 %v8791_v51, %v8791_v51  ;;  %v3017_v31 = vmul.f32 %v8795_v5, %v8795_v5  ;;  %v3018_v28 = vmul.f32 %v8799_v1, %v8799_v1 }
 0x375   : > { %v3019_v59 = vmul.f32 %v8807_v42, %v8807_v42  ;;  %v3020_v24 = vmul.f32 %v8813_v4, %v8813_v4  ;;  %v8835_v62 = vsub.f32 %v8677_v6, %v8783_v9  ;;  %v3021_v14 = vmul.f32 %v8821_v10, %v8821_v10 }
 0x376   : > { %v3047_v11 = vsel %vm205_vm0, %v3015_v49, 0.0  ;;  %v3048_v17 = vsel %vm205_vm0, %v3016_v8, 0.0  ;;  %v3050_v35 = vsel %vm205_vm0, %v3017_v31, 0.0  ;;  %v3052_v26 = vsel %vm205_vm0, %v3018_v28, 0.0 }
 0x377   : > { %v3049_v19 = vadd.f32 %v3048_v17, %v3047_v11  ;;  %v3054_v16 = vsel %vm205_vm0, %v3019_v59, 0.0  ;;  %v8842_v29 = vsub.f32 %v8689_v30, %v8783_v9  ;;  %v3022_v32 = vmul.f32 %v8828_v63, %v8828_v63 }
 0x378   : > { %v3056_v47 = vsel %vm205_vm0, %v3020_v24, 0.0  ;;  %v8849_v6 = vsub.f32 %v8673_v52, %v8783_v9  ;;  %v3023_v55 = vmul.f32 %v8835_v62, %v8835_v62  ;;  %v3058_v0 = vsel %vm205_vm0, %v3021_v14, 0.0 }
 0x379   : > { %v3051_v25 = vadd.f32 %v3050_v35, %v3049_v19  ;;  %v8856_v30 = vsub.f32 %v8681_v7, %v8783_v9  ;;  %v3024_v2 = vmul.f32 %v8842_v29, %v8842_v29  ;;  %v3060_v48 = vsel %vm205_vm0, %v3022_v32, 0.0 }
 0x37a   : > { %v8863_v52 = vsub.f32 %v8695_v43, %v8783_v9  ;;  %v3025_v20 = vmul.f32 %v8849_v6, %v8849_v6  ;;  %v3062_v22 = vsel %vm205_vm0, %v3023_v55, 0.0  ;;  %v8870_v7 = vsub.f32 %v8705_v40, %v8783_v9 }
 0x37b   : > { %v3053_v39 = vadd.f32 %v3052_v26, %v3051_v25  ;;  %v3026_v23 = vmul.f32 %v8856_v30, %v8856_v30  ;;  %v3064_v49 = vsel %vm205_vm0, %v3024_v2, 0.0  ;;  %v8877_v43 = vsub.f32 %v8691_v34, %v8783_v9 }
 0x37c   : > { %v3027_v31 = vmul.f32 %v8863_v52, %v8863_v52  ;;  %v3066_v28 = vsel %vm205_vm0, %v3025_v20, 0.0  ;;  %v8884_v40 = vsub.f32 %v8701_v37, %v8783_v9  ;;  %v3028_v17 = vmul.f32 %v8870_v7, %v8870_v7 }
 0x37d   : > { %v3055_v3 = vadd.f32 %v3054_v16, %v3053_v39  ;;  %v3068_v19 = vsel %vm205_vm0, %v3026_v23, 0.0  ;;  %v8891_v34 = vsub.f32 %v8711_v18, %v8783_v9  ;;  %v3029_v35 = vmul.f32 %v8877_v43, %v8877_v43 }
 0x37e   : > { %v3070_v25 = vsel %vm205_vm0, %v3027_v31, 0.0  ;;  %v8898_v37 = vsub.f32 %v8721_v54, %v8783_v9  ;;  %v3030_v26 = vmul.f32 %v8884_v40, %v8884_v40  ;;  %v3072_v39 = vsel %vm205_vm0, %v3028_v17, 0.0 }
 0x37f   : > { %v3057_v45 = vadd.f32 %v3056_v47, %v3055_v3  ;;  %v8905_v18 = vsub.f32 %v8707_v41, %v8783_v9  ;;  %v3031_v16 = vmul.f32 %v8891_v34, %v8891_v34  ;;  %v3074_v3 = vsel %vm205_vm0, %v3029_v35, 0.0 }
 0x380   : > { %v8912_v54 = vsub.f32 %v8719_v44, %v8783_v9  ;;  %v3032_v47 = vmul.f32 %v8898_v37, %v8898_v37  ;;  %v8919_v41 = vsub.f32 %v8731_v50, %v8783_v9  ;;  %v8926_v44 = vsub.f32 %v8739_v38, %v8783_v9 }
 0x381   : > { %v3059_v27 = vadd.f32 %v3058_v0, %v3057_v45  ;;  %v3076_v45 = vsel %vm205_vm0, %v3030_v26, 0.0  ;;  %v3033_v0 = vmul.f32 %v8905_v18, %v8905_v18  ;;  %v8933_v50 = vsub.f32 %v8725_v53, %v8783_v9 }
 0x382   : > { %v8940_v38 = vsub.f32 %v8735_v33, %v8783_v9  ;;  %v8947_v53 = vsub.f32 %v8749_v57, %v8783_v9  ;;  %v8954_v33 = vsub.f32 %v8755_v13, %v8783_v9  ;;  %v8961_v57 = vsub.f32 %v8741_v21, %v8783_v9 }
 0x383   : > { %v3061_v56 = vadd.f32 %v3060_v48, %v3059_v27  ;;  %v3078_v27 = vsel %vm205_vm0, %v3031_v16, 0.0  ;;  %v3034_v48 = vmul.f32 %v8912_v54, %v8912_v54  ;;  %v8968_v13 = vsub.f32 %v8751_v12, %v8783_v9 }
 0x384   : > { %v8975_v21 = vsub.f32 %v8767_v61, %v8783_v9  ;;  %v3012_v12 = vsub.f32 %v8775_v15, %v8783_v9 }
 0x385   : > { %v3063_v36 = vadd.f32 %v3062_v22, %v3061_v56  ;;  %v3080_v56 = vsel %vm205_vm0, %v3032_v47, 0.0  ;;  %v3035_v22 = vmul.f32 %v8919_v41, %v8919_v41 }
 0x386   : > { %v3043_v61 = vmul.f32 %v8975_v21, %v8975_v21 }
 0x387   : > { %v3065_v8 = vadd.f32 %v3064_v49, %v3063_v36  ;;  %v3082_v36 = vsel %vm205_vm0, %v3033_v0, 0.0  ;;  %v3036_v49 = vmul.f32 %v8926_v44, %v8926_v44 }
 0x389   : > { %v3067_v11 = vadd.f32 %v3066_v28, %v3065_v8  ;;  %v3084_v8 = vsel %vm205_vm0, %v3034_v48, 0.0  ;;  %v3037_v28 = vmul.f32 %v8933_v50, %v8933_v50 }
 0x38b   : > { %v3069_v59 = vadd.f32 %v3068_v19, %v3067_v11  ;;  %v3086_v11 = vsel %vm205_vm0, %v3035_v22, 0.0  ;;  %v3038_v19 = vmul.f32 %v8940_v38, %v8940_v38 }
 0x38d   : > { %v3071_v24 = vadd.f32 %v3070_v25, %v3069_v59  ;;  %v3088_v59 = vsel %vm205_vm0, %v3036_v49, 0.0  ;;  %v3039_v25 = vmul.f32 %v8947_v53, %v8947_v53 }
 0x38f   : > { %v3073_v14 = vadd.f32 %v3072_v39, %v3071_v24  ;;  %v3090_v24 = vsel %vm205_vm0, %v3037_v28, 0.0  ;;  %v3040_v39 = vmul.f32 %v8954_v33, %v8954_v33 }
 0x391   : > { %v3075_v32 = vadd.f32 %v3074_v3, %v3073_v14  ;;  %v3092_v14 = vsel %vm205_vm0, %v3038_v19, 0.0  ;;  %v3041_v3 = vmul.f32 %v8961_v57, %v8961_v57 }
 0x393   : > { %v3077_v55 = vadd.f32 %v3076_v45, %v3075_v32  ;;  %v3094_v32 = vsel %vm205_vm0, %v3039_v25, 0.0  ;;  %v3042_v45 = vmul.f32 %v8968_v13, %v8968_v13 }
 0x395   : > { %v3079_v2 = vadd.f32 %v3078_v27, %v3077_v55  ;;  %v3096_v55 = vsel %vm205_vm0, %v3040_v39, 0.0  ;;  %v3013_v27 = vsub.f32 %v8765_v60, %v8783_v9  ;;  %v3100_v15 = vsel %vm205_vm0, %v3042_v45, 0.0 }
 0x397   : > { %v3081_v20 = vadd.f32 %v3080_v56, %v3079_v2  ;;  %v3098_v2 = vsel %vm205_vm0, %v3041_v3, 0.0  ;;  %v3014_v56 = vsub.f32 %v8773_v46, %v8783_v9 }
 0x399   : > { %v3083_v23 = vadd.f32 %v3082_v36, %v3081_v20  ;;  %v3044_v20 = vmul.f32 %v3012_v12, %v3012_v12  ;;  %v3045_v36 = vmul.f32 %v3013_v27, %v3013_v27 }
 0x39b   : > { %v3085_v31 = vadd.f32 %v3084_v8, %v3083_v23  ;;  %v3102_v23 = vsel %vm205_vm0, %v3043_v61, 0.0  ;;  %v3046_v8 = vmul.f32 %v3014_v56, %v3014_v56  ;;  %v3104_v60 = vsel %vm205_vm0, %v3044_v20, 0.0 }
 0x39c   : > { %v3106_v28 = vsel %vm205_vm0, %v3045_v36, 0.0 }
 0x39d   : > { %v3087_v17 = vadd.f32 %v3086_v11, %v3085_v31 }
 0x39f   : > { %v3089_v35 = vadd.f32 %v3088_v59, %v3087_v17  ;;  %v3108_v17 = vsel %vm205_vm0, %v3046_v8, 0.0 }
 0x3a1   : > { %v3091_v26 = vadd.f32 %v3090_v24, %v3089_v35 }
 0x3a3   : > { %v3093_v16 = vadd.f32 %v3092_v14, %v3091_v26 }
 0x3a5   : > { %v3095_v47 = vadd.f32 %v3094_v32, %v3093_v16 }
 0x3a7   : > { %v3097_v0 = vadd.f32 %v3096_v55, %v3095_v47 }
 0x3a9   : > { %v3099_v48 = vadd.f32 %v3098_v2, %v3097_v0 }
 0x3ab   : > { %v3101_v22 = vadd.f32 %v3100_v15, %v3099_v48 }
 0x3ad   : > { %v3103_v49 = vadd.f32 %v3102_v23, %v3101_v22 }
 0x3af   : > { %v3105_v31 = vadd.f32 %v3104_v60, %v3103_v49 }
 0x3b1   : > { %v3107_v11 = vadd.f32 %v3106_v28, %v3105_v31 }
 0x3b3   : > { %v3109_v19 = vadd.f32 %v3108_v17, %v3107_v11 }
 0x3b5   : > { %v3110_v59 = vrot.slane %v3109_v19, 4 }
 0x3b7   : > { %v3111_v46 = vadd.f32 %v3110_v59, %v3109_v19 }
 0x3b9   : > { %v3112_v9 = vrot.slane %v3111_v46, 2 }
 0x3bb   : > { %v3113_v35 = vadd.f32 %v3112_v9, %v3111_v46 }
 0x3bd   : > { %v3114_v25 = vrot.slane %v3113_v35, 1 }
 0x3bf   : > { %v3115_v24 = vadd.f32 %v3114_v25, %v3113_v35 }
 0x3c1   : > { %v3116_v26 = vmul.f32 0.00390625, %v3115_v24 }
 0x3c3   : > { %v3117_v39 = vadd.f32 1e-05, %v3116_v26 }
 0x3c5   : > { %7669 = vrsqrt.f32 %v3117_v39 }
 0x3d2   : > { %v7670_v14 = vpop.eup %7669 }
 0x3d3   : > { %v3148_v16 = vmul.f32 %v7670_v14, %v3012_v12  ;;  %v3119_v3 = vmul.f32 %v7670_v14, %v8787_v58  ;;  %v3120_v32 = vmul.f32 %v7670_v14, %v8791_v51  ;;  %v3121_v47 = vmul.f32 %v7670_v14, %v8795_v5 }
 0x3d4   : > { %v3122_v45 = vmul.f32 %v7670_v14, %v8799_v1  ;;  %v3123_v55 = vmul.f32 %v7670_v14, %v8807_v42  ;;  %v3124_v0 = vmul.f32 %v7670_v14, %v8813_v4  ;;  %v3125_v61 = vmul.f32 %v7670_v14, %v8821_v10 }
 0x3d5   : > { %v3180_v2 = vmax.f32 %v3148_v16, 0.0  ;;  %v3126_v48 = vmul.f32 %v7670_v14, %v8828_v63  ;;  %v3127_v20 = vmul.f32 %v7670_v14, %v8835_v62  ;;  %v3128_v12 = vmul.f32 %v7670_v14, %v8842_v29 }
 0x3d6   : > { %v3129_v58 = vmul.f32 %v7670_v14, %v8849_v6  ;;  %v3130_v51 = vmul.f32 %v7670_v14, %v8856_v30  ;;  %v3131_v5 = vmul.f32 %v7670_v14, %v8863_v52  ;;  %v3132_v1 = vmul.f32 %v7670_v14, %v8870_v7 }
 0x3d7   : > { %3218 = vst.msk [vmem:[#allocation2 + $0x1a1] sm:$0xff] %vm205_vm0, %v3180_v2  ;;  %v3133_v42 = vmul.f32 %v7670_v14, %v8877_v43  ;;  %v9014_v4 = vmul.f32 %v7670_v14, %v8884_v40  ;;  %v9017_v10 = vmul.f32 %v7670_v14, %v8891_v34  ;;  %v9020_v63 = vmul.f32 %v7670_v14, %v8898_v37 }
 0x3d8   : > { %3212 = vst.msk [vmem:[#allocation2 + $0x171] sm:$0xff] %vm205_vm0, %v3180_v2  ;;  %v9024_v62 = vmul.f32 %v7670_v14, %v8905_v18  ;;  %v9027_v29 = vmul.f32 %v7670_v14, %v8912_v54  ;;  %v9030_v6 = vmul.f32 %v7670_v14, %v8919_v41  ;;  %v9033_v30 = vmul.f32 %v7670_v14, %v8926_v44 }
 0x3d9   : > { %v9036_v52 = vmul.f32 %v7670_v14, %v8933_v50  ;;  %v9039_v7 = vmul.f32 %v7670_v14, %v8940_v38  ;;  %v9042_v43 = vmul.f32 %v7670_v14, %v8947_v53  ;;  %v9045_v40 = vmul.f32 %v7670_v14, %v8954_v33 }
 0x3da   : > { %v9048_v34 = vmul.f32 %v7670_v14, %v8961_v57  ;;  %v9051_v37 = vmul.f32 %v7670_v14, %v8968_v13  ;;  %v9054_v18 = vmul.f32 %v7670_v14, %v8975_v21  ;;  %v9056_v54 = vmul.f32 %v7670_v14, %v3013_v27 }
 0x3db   : > { %v9058_v41 = vmul.f32 %v7670_v14, %v3014_v56  ;;  %v3154_v44 = vmax.f32 %v3122_v45, 0.0  ;;  %v3151_v50 = vmax.f32 %v3119_v3, 0.0  ;;  %v3152_v38 = vmax.f32 %v3120_v32, 0.0 }
 0x3dc   : > { %v3153_v53 = vmax.f32 %v3121_v47, 0.0  ;;  %v3155_v15 = vmax.f32 %v3123_v55, 0.0  ;;  %v3156_v33 = vmax.f32 %v3124_v0, 0.0  ;;  %v3157_v22 = vmax.f32 %v3125_v61, 0.0 }
 0x3dd   : > { %3216 = vst.msk [vmem:[#allocation2 + $0x9] sm:$0xff] %vm205_vm0, %v3154_v44  ;;  %v3158_v57 = vmax.f32 %v3126_v48, 0.0  ;;  %v3159_v36 = vmax.f32 %v3127_v20, 0.0  ;;  %v3160_v13 = vmax.f32 %v3128_v12, 0.0  ;;  %v3161_v23 = vmax.f32 %v3129_v58, 0.0  ;;  %3186 = vst.msk [vmem:[#allocation2 + $0x39] sm:$0xff] %vm205_vm0, %v3154_v44 }
 0x3de   : > { %3183 = vst.msk [vmem:[#allocation2 + $0x19] sm:$0xff] %vm205_vm0, %v3151_v50  ;;  %3184 = vst.msk [vmem:[#allocation2 + $0x21] sm:$0xff] %vm205_vm0, %v3152_v38  ;;  %v3162_v21 = vmax.f32 %v3130_v51, 0.0  ;;  %v3163_v27 = vmax.f32 %v3131_v5, 0.0  ;;  %v3164_v56 = vmax.f32 %v3132_v1, 0.0  ;;  %v3165_v49 = vmax.f32 %v3133_v42, 0.0 }
 0x3df   : > { %3215 = vst.msk [vmem:[#allocation2 + $0x1] sm:$0xff] %vm205_vm0, %v3153_v53  ;;  %3185 = vst.msk [vmem:[#allocation2 + $0x31] sm:$0xff] %vm205_vm0, %v3153_v53  ;;  %v3166_v8 = vmax.f32 %v9014_v4, 0.0  ;;  %v3167_v60 = vmax.f32 %v9017_v10, 0.0  ;;  %v3168_v31 = vmax.f32 %v9020_v63, 0.0  ;;  %v3169_v28 = vmax.f32 %v9024_v62, 0.0 }
 0x3e0   : > { %3187 = vst.msk [vmem:[#allocation2 + $0x49] sm:$0xff] %vm205_vm0, %v3155_v15  ;;  %3188 = vst.msk [vmem:[#allocation2 + $0x51] sm:$0xff] %vm205_vm0, %v3156_v33  ;;  %v3270_v11 = vld [vmem:[#allocation2 + $0x177] sm:$0x1]  ;;  %v3170_v17 = vmax.f32 %v9027_v29, 0.0  ;;  %v3171_v19 = vmax.f32 %v9030_v6, 0.0 }
 0x3e1   : > { %3189 = vst.msk [vmem:[#allocation2 + $0x61] sm:$0xff] %vm205_vm0, %v3157_v22  ;;  %3190 = vst.msk [vmem:[#allocation2 + $0x69] sm:$0xff] %vm205_vm0, %v3158_v57  ;;  %v3172_v59 = vmax.f32 %v9033_v30, 0.0  ;;  %v3173_v46 = vmax.f32 %v9036_v52, 0.0  ;;  %v3272_v9 = vld [vmem:[#allocation2 + $0x1a7] sm:$0x1] }
 0x3e2   : > { %3191 = vst.msk [vmem:[#allocation2 + $0x79] sm:$0xff] %vm205_vm0, %v3159_v36  ;;  %3192 = vst.msk [vmem:[#allocation2 + $0x81] sm:$0xff] %vm205_vm0, %v3160_v13  ;;  %v3174_v35 = vmax.f32 %v9039_v7, 0.0  ;;  %v3175_v25 = vmax.f32 %v9042_v43, 0.0  ;;  %v3176_v24 = vmax.f32 %v9045_v40, 0.0  ;;  %v3177_v26 = vmax.f32 %v9048_v34, 0.0 }
 0x3e3   : > { %3193 = vst.msk [vmem:[#allocation2 + $0x91] sm:$0xff] %vm205_vm0, %v3161_v23  ;;  %3194 = vst.msk [vmem:[#allocation2 + $0x99] sm:$0xff] %vm205_vm0, %v3162_v21  ;;  %v3178_v39 = vmax.f32 %v9051_v37, 0.0  ;;  %v3179_v14 = vmax.f32 %v9054_v18, 0.0  ;;  %v3181_v16 = vmax.f32 %v9056_v54, 0.0  ;;  %v3182_v3 = vmax.f32 %v9058_v41, 0.0 }
 0x3e4   : > { %3195 = vst.msk [vmem:[#allocation2 + $0xa9] sm:$0xff] %vm205_vm0, %v3163_v27  ;;  %3196 = vst.msk [vmem:[#allocation2 + $0xb1] sm:$0xff] %vm205_vm0, %v3164_v56  ;;  %v3484_v32 = vld [vmem:[#allocation2 + $0x9] sm:$0xff]  ;;  %v3488_v20 = vld [vmem:[#allocation2 + $0x39] sm:$0xff] }
 0x3e5   : > { %3197 = vst.msk [vmem:[#allocation2 + $0xc1] sm:$0xff] %vm205_vm0, %v3165_v49  ;;  %3198 = vst.msk [vmem:[#allocation2 + $0xc9] sm:$0xff] %vm205_vm0, %v3166_v8  ;;  %v7244_v47 = vpack.c.bf16 %v3484_v32, %v3484_v32  ;;  %v3486_v0 = vld [vmem:[#allocation2 + $0x21] sm:$0xff]  ;;  %v3485_v61 = vld [vmem:[#allocation2 + $0x19] sm:$0xff]  ;;  %v9122_v58 = vpack.c.bf16 %v3488_v20, %v3488_v20 }
 0x3e6   : > { %3288 = vst.msk [vmem:[#allocation2 + $0x179] sm:$0x1] %vm261_vm1, %v3270_v11  ;;  %3290 = vst.msk [vmem:[#allocation2 + $0x1a9] sm:$0x1] %vm261_vm1, %v3272_v9  ;;  %v3483_v45 = vld [vmem:[#allocation2 + $0x1] sm:$0xff]  ;;  %v9114_v2 = vpack.c.bf16 %v3486_v0, %v3486_v0  ;;  %v9116_v48 = vpack.c.bf16 %v3485_v61, %v3485_v61  ;;  %v3487_v12 = vld [vmem:[#allocation2 + $0x31] sm:$0xff] }
 0x3e7   : > { %3199 = vst.msk [vmem:[#allocation2 + $0xd9] sm:$0xff] %vm205_vm0, %v3167_v60  ;;  %3200 = vst.msk [vmem:[#allocation2 + $0xe1] sm:$0xff] %vm205_vm0, %v3168_v31  ;;  %v7243_v55 = vpack.c.bf16 %v3483_v45, %v3483_v45  ;;  %3613 = vrot.lane.b32.xlu1 %v7244_v47, %s7681_s18  ;;  %v9124_v51 = vpack.c.bf16 %v3487_v12, %v3487_v12  ;;  %v3490_v5 = vld [vmem:[#allocation2 + $0x51] sm:$0xff]  ;;  %v3255_v1 = vld [vmem:[#allocation2 + $0xf] sm:$0x1] }
 0x3e8   : > { %3201 = vst.msk [vmem:[#allocation2 + $0xf1] sm:$0xff] %vm205_vm0, %v3169_v28  ;;  %3202 = vst.msk [vmem:[#allocation2 + $0xf9] sm:$0xff] %vm205_vm0, %v3170_v17  ;;  %v3256_v42 = vld [vmem:[#allocation2 + $0x27] sm:$0x1]  ;;  %v3489_v4 = vld [vmem:[#allocation2 + $0x49] sm:$0xff]  ;;  %v9135_v52 = vpack.c.bf16 %v3490_v5, %v3490_v5 }
 0x3e9   : > { %3203 = vst.msk [vmem:[#allocation2 + $0x109] sm:$0xff] %vm205_vm0, %v3171_v19  ;;  %3204 = vst.msk [vmem:[#allocation2 + $0x111] sm:$0xff] %vm205_vm0, %v3172_v59  ;;  %3611 = vrot.lane.b32.xlu0 %v7243_v55, %s7681_s18  ;;  %v3996_v10 = vld [vmem:[#allocation2 + $0x20] sm:$0xff]  ;;  %v3220_v63 = vld [vmem:[#allocation2 + $0x1a] sm:$0x1]  ;;  %v9141_v37 = vpack.c.bf16 %v3489_v4, %v3489_v4 }
 0x3ea   : > { %3205 = vst.msk [vmem:[#allocation2 + $0x121] sm:$0xff] %vm205_vm0, %v3173_v46  ;;  %3206 = vst.msk [vmem:[#allocation2 + $0x129] sm:$0xff] %vm205_vm0, %v3174_v35  ;;  %v9132_v62 = vpack.c.bf16 %v3996_v10, %v3996_v10  ;;  %v3998_v29 = vld [vmem:[#allocation2 + $0x38] sm:$0xff]  ;;  %v3221_v6 = vld [vmem:[#allocation2 + $0x32] sm:$0x1] }
 0x3eb   : > { %3207 = vst.msk [vmem:[#allocation2 + $0x139] sm:$0xff] %vm205_vm0, %v3175_v25  ;;  %3208 = vst.msk [vmem:[#allocation2 + $0x141] sm:$0xff] %vm205_vm0, %v3176_v24  ;;  %3617 = vrot.lane.b32.xlu1 %v9114_v2, %s7681_s18  ;;  %v3257_v30 = vld [vmem:[#allocation2 + $0x3f] sm:$0x1]  ;;  %v3492_v7 = vld [vmem:[#allocation2 + $0x69] sm:$0xff]  ;;  %v9137_v43 = vpack.c.bf16 %v3998_v29, %v3998_v29 }
 0x3ec   : > { %3209 = vst.msk [vmem:[#allocation2 + $0x151] sm:$0xff] %vm205_vm0, %v3177_v26  ;;  %3210 = vst.msk [vmem:[#allocation2 + $0x159] sm:$0xff] %vm205_vm0, %v3178_v39  ;;  %v4766_v40 = vld [vmem:[#allocation2 + $0x50] sm:$0xff]  ;;  %v3222_v34 = vld [vmem:[#allocation2 + $0x4a] sm:$0x1]  ;;  %v9161_v13 = vpack.c.bf16 %v3492_v7, %v3492_v7 }
 0x3ed   : > { %3211 = vst.msk [vmem:[#allocation2 + $0x169] sm:$0xff] %vm205_vm0, %v3179_v14  ;;  %3213 = vst.msk [vmem:[#allocation2 + $0x181] sm:$0xff] %vm205_vm0, %v3181_v16  ;;  %3615 = vrot.lane.b32.xlu0 %v9116_v48, %s7681_s18  ;;  %v3491_v18 = vld [vmem:[#allocation2 + $0x61] sm:$0xff]  ;;  %v9143_v54 = vpack.c.bf16 %v4766_v40, %v4766_v40  ;;  %v3258_v41 = vld [vmem:[#allocation2 + $0x57] sm:$0x1] }
 0x3ee   : > { %3214 = vst.msk [vmem:[#allocation2 + $0x189] sm:$0xff] %vm205_vm0, %v3182_v3  ;;  %3217 = vst.msk [vmem:[#allocation2 + $0x199] sm:$0xff] %vm205_vm0, %v3179_v14  ;;  %v3292_v44 = vld [vmem:[#allocation2 + $0x8] sm:$0xff]  ;;  %v3219_v38 = vld [vmem:[#allocation2 + $0x2] sm:$0x1]  ;;  %v9169_v8 = vpack.c.bf16 %v3491_v18, %v3491_v18 }
 0x3ef   : > { %3621 = vrot.lane.b32.xlu1 %v9122_v58, %s7681_s18  ;;  %3273 = vst.msk [vmem:[#allocation2 + $0x11] sm:$0x1] %vm261_vm1, %v3255_v1  ;;  %3274 = vst.msk [vmem:[#allocation2 + $0x29] sm:$0x1] %vm261_vm1, %v3256_v42  ;;  %v7212_v50 = vpack.c.bf16 %v3292_v44, %v3292_v44  ;;  %v4002_v53 = vld [vmem:[#allocation2 + $0x68] sm:$0xff]  ;;  %v3302_v22 = vld [vmem:[#allocation2 + $0x80] sm:$0xff] }
 0x3f0   : > { %3238 = vst.msk [vmem:[#allocation2 + $0x18] sm:$0x1] %vm261_vm1, %v3220_v63  ;;  %3239 = vst.msk [vmem:[#allocation2 + $0x30] sm:$0x1] %vm261_vm1, %v3221_v6  ;;  %v3223_v15 = vld [vmem:[#allocation2 + $0x62] sm:$0x1]  ;;  %v9158_v33 = vpack.c.bf16 %v4002_v53, %v4002_v53  ;;  %v9164_v23 = vpack.c.bf16 %v3302_v22, %v3302_v22 }
 0x3f1   : > { %3619 = vrot.lane.b32.xlu0 %v9124_v51, %s7681_s18  ;;  %3275 = vst.msk [vmem:[#allocation2 + $0x41] sm:$0x1] %vm261_vm1, %v3257_v30  ;;  %3240 = vst.msk [vmem:[#allocation2 + $0x48] sm:$0x1] %vm261_vm1, %v3222_v34  ;;  %v3224_v57 = vld [vmem:[#allocation2 + $0x7a] sm:$0x1] }
 0x3f2   : > { %3454 = vst.msk [vmem:[#allocation3 + $0xc] sm:$0xf] %vm476_vm2, %v9132_v62  ;;  %3456 = vst.msk [vmem:[#allocation3 + $0x14] sm:$0xf] %vm476_vm2, %v9137_v43  ;;  %v3304_v36 = vld [vmem:[#allocation2 + $0x98] sm:$0xff]  ;;  %v3306_v56 = vld [vmem:[#allocation2 + $0xb0] sm:$0xff] }
 0x3f3   : > { %3625 = vrot.lane.b32.xlu1 %v9135_v52, %s7681_s18  ;;  %3276 = vst.msk [vmem:[#allocation2 + $0x59] sm:$0x1] %vm261_vm1, %v3258_v41  ;;  %3237 = vst.msk [vmem:[#allocation2] sm:$0x1] %vm261_vm1, %v3219_v38  ;;  %v9167_v21 = vpack.c.bf16 %v3304_v36, %v3304_v36  ;;  %v3225_v27 = vld [vmem:[#allocation2 + $0x92] sm:$0x1]  ;;  %v9174_v31 = vpack.c.bf16 %v3306_v56, %v3306_v56 }
 0x3f4   : > { %3458 = vst.msk [vmem:[#allocation3 + $0x1c] sm:$0xf] %vm476_vm2, %v9143_v54  ;;  %3452 = vst.msk [vmem:[#allocation3 + $0x4] sm:$0xf] %vm476_vm2, %v7212_v50  ;;  %v3226_v49 = vld [vmem:[#allocation2 + $0xaa] sm:$0x1] }
 0x3f5   : > { %3623 = vrot.lane.b32.xlu0 %v9141_v37, %s7681_s18  ;;  %3241 = vst.msk [vmem:[#allocation2 + $0x60] sm:$0x1] %vm261_vm1, %v3223_v15  ;;  %3242 = vst.msk [vmem:[#allocation2 + $0x78] sm:$0x1] %vm261_vm1, %v3224_v57  ;;  %v3494_v60 = vld [vmem:[#allocation2 + $0x81] sm:$0xff]  ;;  %v3493_v11 = vld [vmem:[#allocation2 + $0x79] sm:$0xff] }
 0x3f6   : > { %3460 = vst.msk [vmem:[#allocation3 + $0x24] sm:$0xf] %vm476_vm2, %v9158_v33  ;;  %v3259_v28 = vld [vmem:[#allocation2 + $0x6f] sm:$0x1]  ;;  %3462 = vst.msk [vmem:[#allocation3 + $0x2c] sm:$0xf] %vm476_vm2, %v9164_v23  ;;  %v9192_v24 = vpack.c.bf16 %v3494_v60, %v3494_v60  ;;  %v9197_v3 = vpack.c.bf16 %v3493_v11, %v3493_v11 }
 0x3f7   : > { %3243 = vst.msk [vmem:[#allocation2 + $0x90] sm:$0x1] %vm261_vm1, %v3225_v27  ;;  %3244 = vst.msk [vmem:[#allocation2 + $0xa8] sm:$0x1] %vm261_vm1, %v3226_v49  ;;  %3629 = vrot.lane.b32.xlu1 %v9161_v13, %s7681_s18  ;;  %v3995_v17 = vld [vmem:[#allocation2 + $0x18] sm:$0xff]  ;;  %v3308_v19 = vld [vmem:[#allocation2 + $0xc8] sm:$0xff] }
 0x3f8   : > { %3464 = vst.msk [vmem:[#allocation3 + $0x34] sm:$0xf] %vm476_vm2, %v9167_v21  ;;  %v3496_v59 = vld [vmem:[#allocation2 + $0x99] sm:$0xff]  ;;  %v9186_v46 = vpack.c.bf16 %v3995_v17, %v3995_v17  ;;  %v3997_v9 = vld [vmem:[#allocation2 + $0x30] sm:$0xff]  ;;  %3466 = vst.msk [vmem:[#allocation3 + $0x3c] sm:$0xf] %vm476_vm2, %v9174_v31  ;;  %v9190_v35 = vpack.c.bf16 %v3308_v19, %v3308_v19 }
 0x3f9   : > { %3277 = vst.msk [vmem:[#allocation2 + $0x71] sm:$0x1] %vm261_vm1, %v3259_v28  ;;  %3627 = vrot.lane.b32.xlu0 %v9169_v8, %s7681_s18  ;;  %v3227_v25 = vld [vmem:[#allocation2 + $0xc2] sm:$0x1]  ;;  %v9194_v26 = vpack.c.bf16 %v3997_v9, %v3997_v9  ;;  %v4765_v39 = vld [vmem:[#allocation2 + $0x48] sm:$0xff]  ;;  %v3495_v32 = vld [vmem:[#allocation2 + $0x91] sm:$0xff]  ;;  %v9225_v6 = vpack.c.bf16 %v3496_v59, %v3496_v59 }
 0x3fa   : > { %3245 = vst.msk [vmem:[#allocation2 + $0xc0] sm:$0x1] %vm261_vm1, %v3227_v25  ;;  %v3310_v14 = vld [vmem:[#allocation2 + $0xe0] sm:$0xff]  ;;  %v3228_v16 = vld [vmem:[#allocation2 + $0xda] sm:$0x1]  ;;  %v9199_v47 = vpack.c.bf16 %v4765_v39, %v4765_v39  ;;  %v3314_v5 = vld [vmem:[#allocation2 + $0x110] sm:$0xff]  ;;  %v9232_v41 = vpack.c.bf16 %v3495_v32, %v3495_v32 }
 0x3fb   : > { %3453 = vst.msk [vmem:[#allocation3 + $0x8] sm:$0xf] %vm476_vm2, %v9186_v46  ;;  %3468 = vst.msk [vmem:[#allocation3 + $0x44] sm:$0xf] %vm476_vm2, %v9190_v35  ;;  %v9205_v45 = vpack.c.bf16 %v3310_v14, %v3310_v14  ;;  %v3312_v55 = vld [vmem:[#allocation2 + $0xf8] sm:$0xff]  ;;  %3633 = vrot.lane.b32.xlu1 %v9192_v24, %s7681_s18  ;;  %v3291_v61 = vld [vmem:[#allocation2] sm:$0xff]  ;;  %v9223_v10 = vpack.c.bf16 %v3314_v5, %v3314_v5 }
 0x3fc   : > { %3246 = vst.msk [vmem:[#allocation2 + $0xd8] sm:$0x1] %vm261_vm1, %v3228_v16  ;;  %v3229_v0 = vld [vmem:[#allocation2 + $0xf2] sm:$0x1]  ;;  %v4001_v20 = vld [vmem:[#allocation2 + $0x60] sm:$0xff]  ;;  %v9212_v12 = vpack.c.bf16 %v3312_v55, %v3312_v55  ;;  %v7211_v1 = vpack.c.bf16 %v3291_v61, %v3291_v61  ;;  %v3301_v4 = vld [vmem:[#allocation2 + $0x78] sm:$0xff] }
 0x3fd   : > { %3455 = vst.msk [vmem:[#allocation3 + $0x10] sm:$0xf] %vm476_vm2, %v9194_v26  ;;  %3631 = vrot.lane.b32.xlu0 %v9197_v3, %s7681_s18  ;;  %3457 = vst.msk [vmem:[#allocation3 + $0x18] sm:$0xf] %vm476_vm2, %v9199_v47  ;;  %v9219_v42 = vpack.c.bf16 %v4001_v20, %v4001_v20  ;;  %v3230_v63 = vld [vmem:[#allocation2 + $0x10a] sm:$0x1]  ;;  %v9227_v30 = vpack.c.bf16 %v3301_v4, %v3301_v4 }
 0x3fe   : > { %3247 = vst.msk [vmem:[#allocation2 + $0xf0] sm:$0x1] %vm261_vm1, %v3229_v0  ;;  %v3316_v29 = vld [vmem:[#allocation2 + $0x128] sm:$0xff]  ;;  %v3303_v7 = vld [vmem:[#allocation2 + $0x90] sm:$0xff]  ;;  %3248 = vst.msk [vmem:[#allocation2 + $0x108] sm:$0x1] %vm261_vm1, %v3230_v63 }
 0x3ff   : > { %3470 = vst.msk [vmem:[#allocation3 + $0x4c] sm:$0xf] %vm476_vm2, %v9205_v45  ;;  %v3305_v40 = vld [vmem:[#allocation2 + $0xa8] sm:$0xff]  ;;  %3472 = vst.msk [vmem:[#allocation3 + $0x54] sm:$0xf] %vm476_vm2, %v9212_v12  ;;  %v7236_v34 = vpack.c.bf16 %v3316_v29, %v3316_v29  ;;  %v3498_v44 = vld [vmem:[#allocation2 + $0xb1] sm:$0xff]  ;;  %v9237_v50 = vpack.c.bf16 %v3303_v7, %v3303_v7  ;;  %3637 = vrot.lane.b32.xlu1 %v9225_v6, %s7681_s18 }
 0x400   : > { %v3231_v18 = vld [vmem:[#allocation2 + $0x122] sm:$0x1]  ;;  %3451 = vst.msk [vmem:[#allocation3] sm:$0xf] %vm476_vm2, %v7211_v1  ;;  %3459 = vst.msk [vmem:[#allocation3 + $0x20] sm:$0xf] %vm476_vm2, %v9219_v42  ;;  %v9239_v38 = vpack.c.bf16 %v3305_v40, %v3305_v40  ;;  %v7258_v11 = vpack.c.bf16 %v3498_v44, %v3498_v44 }
 0x401   : > { %3474 = vst.msk [vmem:[#allocation3 + $0x5c] sm:$0xf] %vm476_vm2, %v9223_v10  ;;  %v3318_v53 = vld [vmem:[#allocation2 + $0x140] sm:$0xff]  ;;  %v3232_v15 = vld [vmem:[#allocation2 + $0x13a] sm:$0x1]  ;;  %v3497_v22 = vld [vmem:[#allocation2 + $0xa9] sm:$0xff]  ;;  %3635 = vrot.lane.b32.xlu0 %v9232_v41, %s7681_s18 }
 0x402   : > { %3249 = vst.msk [vmem:[#allocation2 + $0x120] sm:$0x1] %vm261_vm1, %v3231_v18  ;;  %v7238_v57 = vpack.c.bf16 %v3318_v53, %v3318_v53  ;;  %3250 = vst.msk [vmem:[#allocation2 + $0x138] sm:$0x1] %vm261_vm1, %v3232_v15  ;;  %v3260_v36 = vld [vmem:[#allocation2 + $0x87] sm:$0x1]  ;;  %v7257_v59 = vpack.c.bf16 %v3497_v22, %v3497_v22 }
 0x403   : > { %3461 = vst.msk [vmem:[#allocation3 + $0x28] sm:$0xf] %vm476_vm2, %v9227_v30  ;;  %3476 = vst.msk [vmem:[#allocation3 + $0x64] sm:$0xf] %vm476_vm2, %v7236_v34  ;;  %v3320_v27 = vld [vmem:[#allocation2 + $0x158] sm:$0xff]  ;;  %v3307_v56 = vld [vmem:[#allocation2 + $0xc0] sm:$0xff]  ;;  %3641 = vrot.lane.b32.xlu1 %v7258_v11, %s7681_s18 }
 0x404   : > { %3463 = vst.msk [vmem:[#allocation3 + $0x30] sm:$0xf] %vm476_vm2, %v9237_v50  ;;  %3465 = vst.msk [vmem:[#allocation3 + $0x38] sm:$0xf] %vm476_vm2, %v9239_v38  ;;  %v7240_v49 = vpack.c.bf16 %v3320_v27, %v3320_v27  ;;  %v3233_v60 = vld [vmem:[#allocation2 + $0x152] sm:$0x1]  ;;  %v9257_v17 = vpack.c.bf16 %v3307_v56, %v3307_v56 }
 0x405   : > { %3278 = vst.msk [vmem:[#allocation2 + $0x89] sm:$0x1] %vm261_vm1, %v3260_v36  ;;  %v3261_v28 = vld [vmem:[#allocation2 + $0x9f] sm:$0x1]  ;;  %3251 = vst.msk [vmem:[#allocation2 + $0x150] sm:$0x1] %vm261_vm1, %v3233_v60  ;;  %3639 = vrot.lane.b32.xlu0 %v7257_v59, %s7681_s18 }
 0x406   : > { %v3309_v19 = vld [vmem:[#allocation2 + $0xd8] sm:$0xff]  ;;  %3478 = vst.msk [vmem:[#allocation3 + $0x6c] sm:$0xf] %vm476_vm2, %v7238_v57  ;;  %v3500_v9 = vld [vmem:[#allocation2 + $0xc9] sm:$0xff]  ;;  %3480 = vst.msk [vmem:[#allocation3 + $0x74] sm:$0xf] %vm476_vm2, %v7240_v49 }
 0x407   : > { %3279 = vst.msk [vmem:[#allocation2 + $0xa1] sm:$0x1] %vm261_vm1, %v3261_v28  ;;  %v9262_v25 = vpack.c.bf16 %v3309_v19, %v3309_v19  ;;  %v3311_v39 = vld [vmem:[#allocation2 + $0xf0] sm:$0xff]  ;;  %v3499_v14 = vld [vmem:[#allocation2 + $0xc1] sm:$0xff]  ;;  %v7260_v0 = vpack.c.bf16 %v3500_v9, %v3500_v9  ;;  %v3263_v5 = vld [vmem:[#allocation2 + $0xcf] sm:$0x1] }
 0x408   : > { %3467 = vst.msk [vmem:[#allocation3 + $0x40] sm:$0xf] %vm476_vm2, %v9257_v17  ;;  %v9268_v16 = vpack.c.bf16 %v3311_v39, %v3311_v39  ;;  %v3262_v32 = vld [vmem:[#allocation2 + $0xb7] sm:$0x1]  ;;  %v3313_v55 = vld [vmem:[#allocation2 + $0x108] sm:$0xff]  ;;  %v7259_v1 = vpack.c.bf16 %v3499_v14, %v3499_v14  ;;  %v3501_v7 = vld [vmem:[#allocation2 + $0xd9] sm:$0xff] }
 0x409   : > { %3469 = vst.msk [vmem:[#allocation3 + $0x48] sm:$0xf] %vm476_vm2, %v9262_v25  ;;  %v9276_v61 = vpack.c.bf16 %v3313_v55, %v3313_v55  ;;  %v3315_v20 = vld [vmem:[#allocation2 + $0x120] sm:$0xff]  ;;  %v3317_v29 = vld [vmem:[#allocation2 + $0x138] sm:$0xff]  ;;  %3645 = vrot.lane.b32.xlu1 %v7260_v0, %s7681_s18  ;;  %v7261_v22 = vpack.c.bf16 %v3501_v7, %v3501_v7  ;;  %v3266_v36 = vld [vmem:[#allocation2 + $0x117] sm:$0x1] }
 0x40a   : > { %3280 = vst.msk [vmem:[#allocation2 + $0xb9] sm:$0x1] %vm261_vm1, %v3262_v32  ;;  %v3502_v4 = vld [vmem:[#allocation2 + $0xe1] sm:$0xff]  ;;  %v7235_v63 = vpack.c.bf16 %v3315_v20, %v3315_v20  ;;  %3281 = vst.msk [vmem:[#allocation2 + $0xd1] sm:$0x1] %vm261_vm1, %v3263_v5  ;;  %v7237_v40 = vpack.c.bf16 %v3317_v29, %v3317_v29  ;;  %3643 = vrot.lane.b32.xlu0 %v7259_v1, %s7681_s18  ;;  %v3504_v57 = vld [vmem:[#allocation2 + $0xf9] sm:$0xff] }
 0x40b   : > { %3471 = vst.msk [vmem:[#allocation3 + $0x50] sm:$0xf] %vm476_vm2, %v9268_v16  ;;  %3473 = vst.msk [vmem:[#allocation3 + $0x58] sm:$0xf] %vm476_vm2, %v9276_v61  ;;  %v3264_v34 = vld [vmem:[#allocation2 + $0xe7] sm:$0x1]  ;;  %v7262_v44 = vpack.c.bf16 %v3502_v4, %v3502_v4  ;;  %v7264_v56 = vpack.c.bf16 %v3504_v57, %v3504_v57 }
 0x40c   : > { %3475 = vst.msk [vmem:[#allocation3 + $0x60] sm:$0xf] %vm476_vm2, %v7235_v63  ;;  %v3319_v18 = vld [vmem:[#allocation2 + $0x150] sm:$0xff]  ;;  %3477 = vst.msk [vmem:[#allocation3 + $0x68] sm:$0xf] %vm476_vm2, %v7237_v40  ;;  %v3507_v14 = vld [vmem:[#allocation2 + $0x121] sm:$0xff] }
 0x40d   : > { %3282 = vst.msk [vmem:[#allocation2 + $0xe9] sm:$0x1] %vm261_vm1, %v3264_v34  ;;  %v7239_v53 = vpack.c.bf16 %v3319_v18, %v3319_v18  ;;  %v3265_v15 = vld [vmem:[#allocation2 + $0xff] sm:$0x1]  ;;  %3649 = vrot.lane.b32.xlu1 %v7262_v44, %s7681_s18  ;;  %v3503_v27 = vld [vmem:[#allocation2 + $0xf1] sm:$0xff]  ;;  %v3505_v11 = vld [vmem:[#allocation2 + $0x109] sm:$0xff]  ;;  %v7267_v4 = vpack.c.bf16 %v3507_v14, %v3507_v14 }
 0x40e   : > { %3283 = vst.msk [vmem:[#allocation2 + $0x101] sm:$0x1] %vm261_vm1, %v3265_v15  ;;  %3284 = vst.msk [vmem:[#allocation2 + $0x119] sm:$0x1] %vm261_vm1, %v3266_v36  ;;  %3647 = vrot.lane.b32.xlu0 %v7261_v22, %s7681_s18  ;;  %v7263_v49 = vpack.c.bf16 %v3503_v27, %v3503_v27  ;;  %v3506_v60 = vld [vmem:[#allocation2 + $0x111] sm:$0xff]  ;;  %v7265_v9 = vpack.c.bf16 %v3505_v11, %v3505_v11  ;;  %v3508_v39 = vld [vmem:[#allocation2 + $0x129] sm:$0xff] }
 0x40f   : > { %3479 = vst.msk [vmem:[#allocation3 + $0x70] sm:$0xf] %vm476_vm2, %v7239_v53  ;;  %v3267_v28 = vld [vmem:[#allocation2 + $0x12f] sm:$0x1]  ;;  %v3268_v19 = vld [vmem:[#allocation2 + $0x147] sm:$0x1]  ;;  %v7266_v59 = vpack.c.bf16 %v3506_v60, %v3506_v60  ;;  %v7268_v5 = vpack.c.bf16 %v3508_v39, %v3508_v39 }
 0x410   : > { %3285 = vst.msk [vmem:[#allocation2 + $0x131] sm:$0x1] %vm261_vm1, %v3267_v28  ;;  %3286 = vst.msk [vmem:[#allocation2 + $0x149] sm:$0x1] %vm261_vm1, %v3268_v19  ;;  %v3269_v32 = vld [vmem:[#allocation2 + $0x15f] sm:$0x1] }
 0x411   : > { %3653 = vrot.lane.b32.xlu1 %v7264_v56, %s7681_s18  ;;  %v4790_v55 = vld [vmem:[#allocation2 + $0x170] sm:$0xff]  ;;  %3287 = vst.msk [vmem:[#allocation2 + $0x161] sm:$0x1] %vm261_vm1, %v3269_v32  ;;  %v3234_v20 = vld [vmem:[#allocation2 + $0x16a] sm:$0x1]  ;;  %v3510_v63 = vld [vmem:[#allocation2 + $0x141] sm:$0xff] }
 0x412   : > { %3651 = vrot.lane.b32.xlu0 %v7263_v49, %s7681_s18  ;;  %v9298_v0 = vpack.c.bf16 %v4790_v55, %v4790_v55  ;;  %3252 = vst.msk [vmem:[#allocation2 + $0x168] sm:$0x1] %vm261_vm1, %v3234_v20  ;;  %v3235_v1 = vld [vmem:[#allocation2 + $0x182] sm:$0x1]  ;;  %v3509_v29 = vld [vmem:[#allocation2 + $0x139] sm:$0xff]  ;;  %v7270_v34 = vpack.c.bf16 %v3510_v63, %v3510_v63  ;;  %v3511_v53 = vld [vmem:[#allocation2 + $0x151] sm:$0xff] }
 0x413   : > { %3253 = vst.msk [vmem:[#allocation2 + $0x180] sm:$0x1] %vm261_vm1, %v3235_v1  ;;  %v3271_v7 = vld [vmem:[#allocation2 + $0x18f] sm:$0x1]  ;;  %v3236_v40 = vld [vmem:[#allocation2 + $0x19a] sm:$0x1]  ;;  %v7269_v18 = vpack.c.bf16 %v3509_v29, %v3509_v29  ;;  %v7271_v36 = vpack.c.bf16 %v3511_v53, %v3511_v53 }
 0x414   : > { %3482 = vst.msk [vmem:[#allocation3 + $0x7c] sm:$0xf] %vm476_vm2, %v9298_v0  ;;  %v3512_v44 = vld [vmem:[#allocation2 + $0x159] sm:$0xff]  ;;  %v3740_v27 = vld [vmem:[#allocation2 + $0xa] sm:$0xff]  ;;  %v3739_v56 = vld [vmem:[#allocation2 + $0x2] sm:$0xff] }
 0x415   : > { %3657 = vrot.lane.b32.xlu1 %v7266_v59, %s7681_s18  ;;  %3289 = vst.msk [vmem:[#allocation2 + $0x191] sm:$0x1] %vm261_vm1, %v3271_v7  ;;  %3254 = vst.msk [vmem:[#allocation2 + $0x198] sm:$0x1] %vm261_vm1, %v3236_v40  ;;  %v7272_v22 = vpack.c.bf16 %v3512_v44, %v3512_v44  ;;  %v7276_v49 = vpack.c.bf16 %v3740_v27, %v3740_v27  ;;  %v7275_v60 = vpack.c.bf16 %v3739_v56, %v3739_v56  ;;  %v3742_v28 = vld [vmem:[#allocation2 + $0x22] sm:$0xff]  ;;  %v3741_v11 = vld [vmem:[#allocation2 + $0x1a] sm:$0xff] }
 0x416   : > { %3655 = vrot.lane.b32.xlu0 %v7265_v9, %s7681_s18  ;;  %v7278_v19 = vpack.c.bf16 %v3742_v28, %v3742_v28  ;;  %v7277_v59 = vpack.c.bf16 %v3741_v11, %v3741_v11 }
 0x419   : > { %3661 = vrot.lane.b32.xlu1 %v7268_v5, %s7681_s18  ;;  %v4789_v15 = vld [vmem:[#allocation2 + $0x168] sm:$0xff] }
 0x41a   : > { %3659 = vrot.lane.b32.xlu0 %v7267_v4, %s7681_s18  ;;  %v9310_v57 = vpack.c.bf16 %v4789_v15, %v4789_v15 }
 0x41c   : > { %3481 = vst.msk [vmem:[#allocation3 + $0x78] sm:$0xf] %vm476_vm2, %v9310_v57 }
 0x41d   : > { %3665 = vrot.lane.b32.xlu1 %v7270_v34, %s7681_s18 }
 0x41e   : > { %3663 = vrot.lane.b32.xlu0 %v7269_v18, %s7681_s18 }
 0x421   : > { %3669 = vrot.lane.b32.xlu1 %v7272_v22, %s7681_s18 }
 0x422   : > { %3667 = vrot.lane.b32.xlu0 %v7271_v36, %s7681_s18 }
 0x425   : > { %3869 = vrot.lane.b32.xlu1 %v7276_v49, %s7682_s19 }
 0x426   : > { %3867 = vrot.lane.b32.xlu0 %v7275_v60, %s7682_s19 }
 0x429   : > { %3873 = vrot.lane.b32.xlu1 %v7278_v19, %s7682_s19 }
 0x42a   : > { %3871 = vrot.lane.b32.xlu0 %v7277_v59, %s7682_s19 }
 0x42d   : > { %4125 = vrot.lane.b32.xlu1 %v9132_v62, %s7683_s20  ;;  %v4510_v62 = vld [vmem:[#allocation2 + $0x3a] sm:$0xff] }
 0x42e   : > { %4123 = vrot.lane.b32.xlu0 %v9186_v46, %s7683_s20  ;;  %v4509_v46 = vld [vmem:[#allocation2 + $0x32] sm:$0xff]  ;;  %v7374_v9 = vpack.c.bf16 %v4510_v62, %v4510_v62 }
 0x42f   : > { %v7373_v39 = vpack.c.bf16 %v4509_v46, %v4509_v46 }
 0x431   : > { %4129 = vrot.lane.b32.xlu1 %v9137_v43, %s7683_s20 }
 0x432   : > { %4127 = vrot.lane.b32.xlu0 %v9194_v26, %s7683_s20 }
 0x435   : > { %4381 = vrot.lane.b32.xlu1 %v9114_v2, %s7684_s21  ;;  %v7650_v2 = vld [vmem:[%s10472_s2 + $0x10] ss:$0 sps:$4 sm:$0x33]  }
 0x436   : > { %4379 = vrot.lane.b32.xlu0 %v9116_v48, %s7684_s21  ;;  %7614 = vmatprep.subr.msk.bf16.mxu1 %vm2747_vm4, %v7650_v2  ;;  %v5712_v48 = vsel %vm2747_vm4, %v7650_v2, 0 }
 0x437   : > { %7576 = vmatpush3.bf16.msra.mxu1 %v5712_v48 }
 0x439   : > { %4385 = vrot.lane.b32.xlu1 %v9122_v58, %s7684_s21 }
 0x43a   : > { %4383 = vrot.lane.b32.xlu0 %v9124_v51, %s7684_s21 }
 0x43d   : > { %4637 = vrot.lane.b32.xlu1 %v7278_v19, %s7685_s22 }
 0x43e   : > { %4635 = vrot.lane.b32.xlu0 %v7277_v59, %s7685_s22 }
 0x441   : > { %4641 = vrot.lane.b32.xlu1 %v7374_v9, %s7685_s22 }
 0x442   : > { %4639 = vrot.lane.b32.xlu0 %v7373_v39, %s7685_s22 }
 0x445   : > { %4893 = vrot.lane.b32.xlu1 %v9137_v43, %s7686_s23  ;;  %v7651_v43 = vld [vmem:[%s10472_s2 + $0x8] sm:$0xff]  }
 0x446   : > { %4891 = vrot.lane.b32.xlu0 %v9194_v26, %s7686_s23  ;;  %7577 = vmatprep.subr.bf16.mxu1 %v7651_v43  ;;  %v5278_v26 = vld [vmem:[#allocation2 + $0x52] sm:$0xff] }
 0x447   : > { %7578 = vmatpush3.bf16.msra.mxu1 %v7651_v43  ;;  %v7470_v14 = vpack.c.bf16 %v5278_v26, %v5278_v26 }
 0x449   : > { %4897 = vrot.lane.b32.xlu1 %v9143_v54, %s7686_s23 }
 0x44a   : > { %4895 = vrot.lane.b32.xlu0 %v9199_v47, %s7686_s23 }
 0x44d   : > { %5149 = vrot.lane.b32.xlu1 %v9122_v58, %s7687_s28  ;;  %v7652_v58 = vld [vmem:[%s10472_s2] sm:$0xff]  }
 0x44e   : > { %5147 = vrot.lane.b32.xlu0 %v9124_v51, %s7687_s28  ;;  %7579 = vmatprep.subr.bf16.mxu1 %v7652_v58  ;;  %v5277_v51 = vld [vmem:[#allocation2 + $0x4a] sm:$0xff] }
 0x44f   : > { %7580 = vmatpush3.bf16.msra.mxu1 %v7652_v58  ;;  %v7469_v32 = vpack.c.bf16 %v5277_v51, %v5277_v51 }
 0x451   : > { %5153 = vrot.lane.b32.xlu1 %v9135_v52, %s7687_s28 }
 0x452   : > { %5151 = vrot.lane.b32.xlu0 %v9141_v37, %s7687_s28 }
 0x455   : > { %5405 = vrot.lane.b32.xlu1 %v7374_v9, %s7688_s4 }
 0x456   : > { %5403 = vrot.lane.b32.xlu0 %v7373_v39, %s7688_s4 }
 0x459   : > { %5409 = vrot.lane.b32.xlu1 %v7470_v14, %s7688_s4  ;;  %v3614_v55 = vpop.permute.xlu1 %3613 }
 0x45a   : > { %5407 = vrot.lane.b32.xlu0 %v7469_v32, %s7688_s4  ;;  %3708 = vst.msk [vmem:[#allocation3 + $0x4] sm:$0xf] %vm733_vm3, %v3614_v55 }
 0x45b   : > { %v3612_v20 = vpop.permute.xlu0 %3611 }
 0x45c   : > { %3707 = vst.msk [vmem:[#allocation3] sm:$0xf] %vm733_vm3, %v3612_v20 }
 0x45d   : > { %3877 = vrot.lane.b32.xlu1 %v7374_v9, %s7682_s19  ;;  %v3618_v5 = vpop.permute.xlu1 %3617 }
 0x45e   : > { %3875 = vrot.lane.b32.xlu0 %v7373_v39, %s7682_s19  ;;  %3710 = vst.msk [vmem:[#allocation3 + $0xc] sm:$0xf] %vm733_vm3, %v3618_v5 }
 0x45f   : > { %v3616_v1 = vpop.permute.xlu0 %3615 }
 0x460   : > { %3709 = vst.msk [vmem:[#allocation3 + $0x8] sm:$0xf] %vm733_vm3, %v3616_v1 }
 0x461   : > { %3881 = vrot.lane.b32.xlu1 %v7470_v14, %s7682_s19  ;;  %v3622_v4 = vpop.permute.xlu1 %3621 }
 0x462   : > { %3879 = vrot.lane.b32.xlu0 %v7469_v32, %s7682_s19  ;;  %3712 = vst.msk [vmem:[#allocation3 + $0x14] sm:$0xf] %vm733_vm3, %v3622_v4 }
 0x463   : > { %v3620_v63 = vpop.permute.xlu0 %3619 }
 0x464   : > { %3711 = vst.msk [vmem:[#allocation3 + $0x10] sm:$0xf] %vm733_vm3, %v3620_v63 }
 0x465   : > { %4133 = vrot.lane.b32.xlu1 %v9143_v54, %s7683_s20  ;;  %v3626_v29 = vpop.permute.xlu1 %3625 }
 0x466   : > { %4131 = vrot.lane.b32.xlu0 %v9199_v47, %s7683_s20  ;;  %3714 = vst.msk [vmem:[#allocation3 + $0x1c] sm:$0xf] %vm733_vm3, %v3626_v29 }
 0x467   : > { %v3624_v7 = vpop.permute.xlu0 %3623 }
 0x468   : > { %3713 = vst.msk [vmem:[#allocation3 + $0x18] sm:$0xf] %vm733_vm3, %v3624_v7 }
 0x469   : > { %4137 = vrot.lane.b32.xlu1 %v9158_v33, %s7683_s20  ;;  %v3630_v40 = vpop.permute.xlu1 %3629 }
 0x46a   : > { %4135 = vrot.lane.b32.xlu0 %v9219_v42, %s7683_s20  ;;  %3716 = vst.msk [vmem:[#allocation3 + $0x24] sm:$0xf] %vm733_vm3, %v3630_v40 }
 0x46b   : > { %v3628_v34 = vpop.permute.xlu0 %3627 }
 0x46c   : > { %3715 = vst.msk [vmem:[#allocation3 + $0x20] sm:$0xf] %vm733_vm3, %v3628_v34 }
 0x46d   : > { %4389 = vrot.lane.b32.xlu1 %v9135_v52, %s7684_s21  ;;  %v3634_v54 = vpop.permute.xlu1 %3633  ;;  %v4514_v52 = vld [vmem:[#allocation2 + $0x6a] sm:$0xff] }
 0x46e   : > { %4387 = vrot.lane.b32.xlu0 %v9141_v37, %s7684_s21  ;;  %3718 = vst.msk [vmem:[#allocation3 + $0x2c] sm:$0xf] %vm733_vm3, %v3634_v54  ;;  %v4513_v37 = vld [vmem:[#allocation2 + $0x62] sm:$0xff]  ;;  %v7378_v15 = vpack.c.bf16 %v4514_v52, %v4514_v52  ;;  %v5028_v54 = vld [vmem:[#allocation2 + $0x99] sm:$0xff]  ;;  %v5030_v52 = vld [vmem:[#allocation2 + $0xb1] sm:$0xff] }
 0x46f   : > { %v3632_v47 = vpop.permute.xlu0 %3631  ;;  %v7377_v36 = vpack.c.bf16 %v4513_v37, %v4513_v37  ;;  %v5029_v37 = vld [vmem:[#allocation2 + $0xa9] sm:$0xff] }
 0x470   : > { %3717 = vst.msk [vmem:[#allocation3 + $0x28] sm:$0xf] %vm733_vm3, %v3632_v47  ;;  %v5027_v47 = vld [vmem:[#allocation2 + $0x91] sm:$0xff] }
 0x471   : > { %4393 = vrot.lane.b32.xlu1 %v9161_v13, %s7684_s21  ;;  %v3638_v18 = vpop.permute.xlu1 %3637 }
 0x472   : > { %4391 = vrot.lane.b32.xlu0 %v9169_v8, %s7684_s21  ;;  %3720 = vst.msk [vmem:[#allocation3 + $0x34] sm:$0xf] %vm733_vm3, %v3638_v18 }
 0x473   : > { %v3636_v44 = vpop.permute.xlu0 %3635 }
 0x474   : > { %3719 = vst.msk [vmem:[#allocation3 + $0x30] sm:$0xf] %vm733_vm3, %v3636_v44  ;;  %v7444_v44 = vpack.c.bf16 %v5028_v54, %v5028_v54 }
 0x475   : > { %4645 = vrot.lane.b32.xlu1 %v7470_v14, %s7685_s22  ;;  %v3642_v53 = vpop.permute.xlu1 %3641 }
 0x476   : > { %4643 = vrot.lane.b32.xlu0 %v7469_v32, %s7685_s22  ;;  %3722 = vst.msk [vmem:[#allocation3 + $0x3c] sm:$0xf] %vm733_vm3, %v3642_v53 }
 0x477   : > { %v3640_v22 = vpop.permute.xlu0 %3639 }
 0x478   : > { %3721 = vst.msk [vmem:[#allocation3 + $0x38] sm:$0xf] %vm733_vm3, %v3640_v22 }
 0x479   : > { %4649 = vrot.lane.b32.xlu1 %v7378_v15, %s7685_s22 }
 0x47a   : > { %4647 = vrot.lane.b32.xlu0 %v7377_v36, %s7685_s22 }
 0x47b   : > { %v3646_v27 = vpop.permute.xlu1 %3645 }
 0x47c   : > { %3724 = vst.msk [vmem:[#allocation3 + $0x44] sm:$0xf] %vm733_vm3, %v3646_v27  ;;  %v3644_v56 = vpop.permute.xlu0 %3643 }
 0x47d   : > { %3723 = vst.msk [vmem:[#allocation3 + $0x40] sm:$0xf] %vm733_vm3, %v3644_v56  ;;  %4901 = vrot.lane.b32.xlu1 %v9158_v33, %s7686_s23 }
 0x47e   : > { %4899 = vrot.lane.b32.xlu0 %v9219_v42, %s7686_s23 }
 0x47f   : > { %v3650_v49 = vpop.permute.xlu1 %3649 }
 0x480   : > { %3726 = vst.msk [vmem:[#allocation3 + $0x4c] sm:$0xf] %vm733_vm3, %v3650_v49  ;;  %v3648_v60 = vpop.permute.xlu0 %3647  ;;  %v5286_v49 = vld [vmem:[#allocation2 + $0xb2] sm:$0xff] }
 0x481   : > { %3725 = vst.msk [vmem:[#allocation3 + $0x48] sm:$0xf] %vm733_vm3, %v3648_v60  ;;  %4905 = vrot.lane.b32.xlu1 %v9164_v23, %s7686_s23  ;;  %v5285_v60 = vld [vmem:[#allocation2 + $0xaa] sm:$0xff] }
 0x482   : > { %4903 = vrot.lane.b32.xlu0 %v9227_v30, %s7686_s23 }
 0x483   : > { %v3654_v28 = vpop.permute.xlu1 %3653 }
 0x484   : > { %3728 = vst.msk [vmem:[#allocation3 + $0x54] sm:$0xf] %vm733_vm3, %v3654_v28  ;;  %v3652_v11 = vpop.permute.xlu0 %3651 }
 0x485   : > { %3727 = vst.msk [vmem:[#allocation3 + $0x50] sm:$0xf] %vm733_vm3, %v3652_v11  ;;  %5157 = vrot.lane.b32.xlu1 %v9161_v13, %s7687_s28  ;;  %v5282_v13 = vld [vmem:[#allocation2 + $0x82] sm:$0xff]  ;;  %v7478_v11 = vpack.c.bf16 %v5286_v49, %v5286_v49 }
 0x486   : > { %5155 = vrot.lane.b32.xlu0 %v9169_v8, %s7687_s28  ;;  %v5281_v8 = vld [vmem:[#allocation2 + $0x7a] sm:$0xff]  ;;  %v7474_v46 = vpack.c.bf16 %v5282_v13, %v5282_v13 }
 0x487   : > { %v3658_v33 = vpop.permute.xlu1 %3657  ;;  %v7473_v39 = vpack.c.bf16 %v5281_v8, %v5281_v8 }
 0x488   : > { %3730 = vst.msk [vmem:[#allocation3 + $0x5c] sm:$0xf] %vm733_vm3, %v3658_v33  ;;  %v3656_v42 = vpop.permute.xlu0 %3655 }
 0x489   : > { %3729 = vst.msk [vmem:[#allocation3 + $0x58] sm:$0xf] %vm733_vm3, %v3656_v42  ;;  %5161 = vrot.lane.b32.xlu1 %v9192_v24, %s7687_s28  ;;  %v7477_v42 = vpack.c.bf16 %v5285_v60, %v5285_v60 }
 0x48a   : > { %5159 = vrot.lane.b32.xlu0 %v9197_v3, %s7687_s28 }
 0x48b   : > { %v3662_v19 = vpop.permute.xlu1 %3661 }
 0x48c   : > { %3732 = vst.msk [vmem:[#allocation3 + $0x64] sm:$0xf] %vm733_vm3, %v3662_v19  ;;  %v3660_v59 = vpop.permute.xlu0 %3659 }
 0x48d   : > { %3731 = vst.msk [vmem:[#allocation3 + $0x60] sm:$0xf] %vm733_vm3, %v3660_v59  ;;  %5413 = vrot.lane.b32.xlu1 %v7378_v15, %s7688_s4 }
 0x48e   : > { %5411 = vrot.lane.b32.xlu0 %v7377_v36, %s7688_s4 }
 0x48f   : > { %v3666_v62 = vpop.permute.xlu1 %3665 }
 0x490   : > { %3734 = vst.msk [vmem:[#allocation3 + $0x6c] sm:$0xf] %vm733_vm3, %v3666_v62  ;;  %v3664_v9 = vpop.permute.xlu0 %3663 }
 0x491   : > { %3733 = vst.msk [vmem:[#allocation3 + $0x68] sm:$0xf] %vm733_vm3, %v3664_v9  ;;  %5417 = vrot.lane.b32.xlu1 %v7474_v46, %s7688_s4 }
 0x492   : > { %5415 = vrot.lane.b32.xlu0 %v7473_v39, %s7688_s4 }
 0x493   : > { %v3670_v2 = vpop.permute.xlu1 %3669 }
 0x494   : > { %3736 = vst.msk [vmem:[#allocation3 + $0x74] sm:$0xf] %vm733_vm3, %v3670_v2  ;;  %v3668_v48 = vpop.permute.xlu0 %3667 }
 0x495   : > { %3735 = vst.msk [vmem:[#allocation3 + $0x70] sm:$0xf] %vm733_vm3, %v3668_v48  ;;  %3885 = vrot.lane.b32.xlu1 %v7378_v15, %s7682_s19  ;;  %v7446_v15 = vpack.c.bf16 %v5030_v52, %v5030_v52 }
 0x496   : > { %3883 = vrot.lane.b32.xlu0 %v7377_v36, %s7682_s19  ;;  %v7445_v36 = vpack.c.bf16 %v5029_v37, %v5029_v37 }
 0x497   : > { %v3870_v43 = vpop.permute.xlu1 %3869 }
 0x498   : > { %3964 = vst.msk [vmem:[#allocation3 + $0x4] sm:$0xf] %vm990_vm5, %v3870_v43  ;;  %v3868_v58 = vpop.permute.xlu0 %3867 }
 0x499   : > { %3963 = vst.msk [vmem:[#allocation3] sm:$0xf] %vm990_vm5, %v3868_v58  ;;  %3889 = vrot.lane.b32.xlu1 %v7474_v46, %s7682_s19  ;;  %v4266_v58 = vld [vmem:[#allocation2 + $0xc9] sm:$0xff] }
 0x49a   : > { %3887 = vrot.lane.b32.xlu0 %v7473_v39, %s7682_s19 }
 0x49b   : > { %v3874_v26 = vpop.permute.xlu1 %3873 }
 0x49c   : > { %3966 = vst.msk [vmem:[#allocation3 + $0xc] sm:$0xf] %vm990_vm5, %v3874_v26  ;;  %v3872_v51 = vpop.permute.xlu0 %3871 }
 0x49d   : > { %3965 = vst.msk [vmem:[#allocation3 + $0x8] sm:$0xf] %vm990_vm5, %v3872_v51  ;;  %4141 = vrot.lane.b32.xlu1 %v9164_v23, %s7683_s20  ;;  %v7354_v51 = vpack.c.bf16 %v4266_v58, %v4266_v58 }
 0x49e   : > { %4139 = vrot.lane.b32.xlu0 %v9227_v30, %s7683_s20 }
 0x49f   : > { %v4126_v14 = vpop.permute.xlu1 %4125 }
 0x4a0   : > { %4220 = vst.msk [vmem:[#allocation3 + $0x4] sm:$0xf] %vm1247_vm6, %v4126_v14  ;;  %v4124_v32 = vpop.permute.xlu0 %4123 }
 0x4a1   : > { %4219 = vst.msk [vmem:[#allocation3] sm:$0xf] %vm1247_vm6, %v4124_v32  ;;  %4145 = vrot.lane.b32.xlu1 %v9167_v21, %s7683_s20 }
 0x4a2   : > { %4143 = vrot.lane.b32.xlu0 %v9237_v50, %s7683_s20 }
 0x4a3   : > { %v4130_v55 = vpop.permute.xlu1 %4129 }
 0x4a4   : > { %4222 = vst.msk [vmem:[#allocation3 + $0xc] sm:$0xf] %vm1247_vm6, %v4130_v55  ;;  %v4128_v20 = vpop.permute.xlu0 %4127 }
 0x4a5   : > { %4221 = vst.msk [vmem:[#allocation3 + $0x8] sm:$0xf] %vm1247_vm6, %v4128_v20  ;;  %4397 = vrot.lane.b32.xlu1 %v9192_v24, %s7684_s21  ;;  %v4518_v24 = vld [vmem:[#allocation2 + $0x9a] sm:$0xff] }
 0x4a6   : > { %4395 = vrot.lane.b32.xlu0 %v9197_v3, %s7684_s21  ;;  %v4517_v3 = vld [vmem:[#allocation2 + $0x92] sm:$0xff]  ;;  %v7382_v63 = vpack.c.bf16 %v4518_v24, %v4518_v24 }
 0x4a7   : > { %v4382_v23 = vpop.permute.xlu1 %4381  ;;  %v7381_v29 = vpack.c.bf16 %v4517_v3, %v4517_v3 }
 0x4a8   : > { %4476 = vst.msk [vmem:[#allocation3 + $0x4] sm:$0xf] %vm1504_vm7, %v4382_v23  ;;  %v4380_v30 = vpop.permute.xlu0 %4379  ;;  %v4522_v23 = vld [vmem:[#allocation2 + $0xca] sm:$0xff] }
 0x4a9   : > { %4475 = vst.msk [vmem:[#allocation3] sm:$0xf] %vm1504_vm7, %v4380_v30  ;;  %4401 = vrot.lane.b32.xlu1 %v9225_v6, %s7684_s21  ;;  %v4521_v30 = vld [vmem:[#allocation2 + $0xc2] sm:$0xff] }
 0x4aa   : > { %4399 = vrot.lane.b32.xlu0 %v9232_v41, %s7684_s21  ;;  %v7385_v3 = vpack.c.bf16 %v4521_v30, %v4521_v30 }
 0x4ab   : > { %v4386_v5 = vpop.permute.xlu1 %4385 }
 0x4ac   : > { %4478 = vst.msk [vmem:[#allocation3 + $0xc] sm:$0xf] %vm1504_vm7, %v4386_v5  ;;  %v4384_v1 = vpop.permute.xlu0 %4383 }
 0x4ad   : > { %4477 = vst.msk [vmem:[#allocation3 + $0x8] sm:$0xf] %vm1504_vm7, %v4384_v1  ;;  %4653 = vrot.lane.b32.xlu1 %v7474_v46, %s7685_s22  ;;  %v7386_v1 = vpack.c.bf16 %v4522_v23, %v4522_v23 }
 0x4ae   : > { %4651 = vrot.lane.b32.xlu0 %v7473_v39, %s7685_s22 }
 0x4af   : > { %v4638_v4 = vpop.permute.xlu1 %4637 }
 0x4b0   : > { %4732 = vst.msk [vmem:[#allocation3 + $0x4] sm:$0xf] %vm1761_vm8, %v4638_v4  ;;  %v4636_v6 = vpop.permute.xlu0 %4635 }
 0x4b1   : > { %4731 = vst.msk [vmem:[#allocation3] sm:$0xf] %vm1761_vm8, %v4636_v6  ;;  %4657 = vrot.lane.b32.xlu1 %v7382_v63, %s7685_s22 }
 0x4b2   : > { %4655 = vrot.lane.b32.xlu0 %v7381_v29, %s7685_s22 }
 0x4b3   : > { %v4642_v41 = vpop.permute.xlu1 %4641 }
 0x4b4   : > { %4734 = vst.msk [vmem:[#allocation3 + $0xc] sm:$0xf] %vm1761_vm8, %v4642_v41  ;;  %v4640_v7 = vpop.permute.xlu0 %4639 }
 0x4b5   : > { %4733 = vst.msk [vmem:[#allocation3 + $0x8] sm:$0xf] %vm1761_vm8, %v4640_v7  ;;  %4909 = vrot.lane.b32.xlu1 %v9167_v21, %s7686_s23 }
 0x4b6   : > { %4907 = vrot.lane.b32.xlu0 %v9237_v50, %s7686_s23  ;;  %v7443_v50 = vpack.c.bf16 %v5027_v47, %v5027_v47 }
 0x4b7   : > { %v4894_v40 = vpop.permute.xlu1 %4893 }
 0x4b8   : > { %4988 = vst.msk [vmem:[#allocation3 + $0x4] sm:$0xf] %vm2019_vm9, %v4894_v40  ;;  %v4892_v34 = vpop.permute.xlu0 %4891 }
 0x4b9   : > { %4987 = vst.msk [vmem:[#allocation3] sm:$0xf] %vm2019_vm9, %v4892_v34  ;;  %4913 = vrot.lane.b32.xlu1 %v9174_v31, %s7686_s23 }
 0x4ba   : > { %4911 = vrot.lane.b32.xlu0 %v9239_v38, %s7686_s23 }
 0x4bb   : > { %v4898_v18 = vpop.permute.xlu1 %4897 }
 0x4bc   : > { %4990 = vst.msk [vmem:[#allocation3 + $0xc] sm:$0xf] %vm2019_vm9, %v4898_v18  ;;  %v4896_v21 = vpop.permute.xlu0 %4895 }
 0x4bd   : > { %4989 = vst.msk [vmem:[#allocation3 + $0x8] sm:$0xf] %vm2019_vm9, %v4896_v21  ;;  %5165 = vrot.lane.b32.xlu1 %v7444_v44, %s7687_s28  ;;  %v5290_v21 = vld [vmem:[#allocation2 + $0xe2] sm:$0xff] }
 0x4be   : > { %5163 = vrot.lane.b32.xlu0 %v7443_v50, %s7687_s28  ;;  %v5289_v50 = vld [vmem:[#allocation2 + $0xda] sm:$0xff]  ;;  %v7482_v37 = vpack.c.bf16 %v5290_v21, %v5290_v21 }
 0x4bf   : > { %v5150_v53 = vpop.permute.xlu1 %5149 }
 0x4c0   : > { %5244 = vst.msk [vmem:[#allocation3 + $0x4] sm:$0xf] %vm2276_vm10, %v5150_v53  ;;  %v5148_v22 = vpop.permute.xlu0 %5147 }
 0x4c1   : > { %5243 = vst.msk [vmem:[#allocation3] sm:$0xf] %vm2276_vm10, %v5148_v22  ;;  %5169 = vrot.lane.b32.xlu1 %v7446_v15, %s7687_s28 }
 0x4c2   : > { %5167 = vrot.lane.b32.xlu0 %v7445_v36, %s7687_s28 }
 0x4c3   : > { %v5154_v27 = vpop.permute.xlu1 %5153 }
 0x4c4   : > { %5246 = vst.msk [vmem:[#allocation3 + $0xc] sm:$0xf] %vm2276_vm10, %v5154_v27  ;;  %v5152_v56 = vpop.permute.xlu0 %5151 }
 0x4c5   : > { %5245 = vst.msk [vmem:[#allocation3 + $0x8] sm:$0xf] %vm2276_vm10, %v5152_v56  ;;  %5421 = vrot.lane.b32.xlu1 %v7382_v63, %s7688_s4 }
 0x4c6   : > { %5419 = vrot.lane.b32.xlu0 %v7381_v29, %s7688_s4 }
 0x4c7   : > { %v5406_v28 = vpop.permute.xlu1 %5405 }
 0x4c8   : > { %5500 = vst.msk [vmem:[#allocation3 + $0x4] sm:$0xf] %vm2533_vm11, %v5406_v28  ;;  %v5404_v33 = vpop.permute.xlu0 %5403 }
 0x4c9   : > { %5499 = vst.msk [vmem:[#allocation3] sm:$0xf] %vm2533_vm11, %v5404_v33  ;;  %5425 = vrot.lane.b32.xlu1 %v7478_v11, %s7688_s4 }
 0x4ca   : > { %5423 = vrot.lane.b32.xlu0 %v7477_v42, %s7688_s4 }
 0x4cb   : > { %v5410_v19 = vpop.permute.xlu1 %5409 }
 0x4cc   : > { %5502 = vst.msk [vmem:[#allocation3 + $0xc] sm:$0xf] %vm2533_vm11, %v5410_v19  ;;  %v5408_v59 = vpop.permute.xlu0 %5407 }
 0x4cd   : > { %5501 = vst.msk [vmem:[#allocation3 + $0x8] sm:$0xf] %vm2533_vm11, %v5408_v59  ;;  %3893 = vrot.lane.b32.xlu1 %v7382_v63, %s7682_s19  ;;  %v4270_v59 = vld [vmem:[#allocation2 + $0xf9] sm:$0xff] }
 0x4ce   : > { %3891 = vrot.lane.b32.xlu0 %v7381_v29, %s7682_s19 }
 0x4cf   : > { %v3878_v13 = vpop.permute.xlu1 %3877 }
 0x4d0   : > { %3968 = vst.msk [vmem:[#allocation3 + $0x14] sm:$0xf] %vm990_vm5, %v3878_v13  ;;  %v3876_v8 = vpop.permute.xlu0 %3875  ;;  %v7653_v62 = vld [vmem:[#allocation3] sm:$0xff]  }
 0x4d1   : > { %3967 = vst.msk [vmem:[#allocation3 + $0x10] sm:$0xf] %vm990_vm5, %v3876_v8  ;;  %3897 = vrot.lane.b32.xlu1 %v7478_v11, %s7682_s19  ;;  %7581 = vmatprep.mubr.msk.bf16.mxu1 %vm2698_vm12, %v7653_v62  ;;  %v7358_v8 = vpack.c.bf16 %v4270_v59, %v4270_v59  ;;  %v4530_v59 = vld [vmem:[#allocation2 + $0x12a] sm:$0xff] }
 0x4d2   : > { %3895 = vrot.lane.b32.xlu0 %v7477_v42, %s7682_s19 }
 0x4d3   : > { %v3882_v46 = vpop.permute.xlu1 %3881 }
 0x4d4   : > { %3970 = vst.msk [vmem:[#allocation3 + $0x1c] sm:$0xf] %vm990_vm5, %v3882_v46  ;;  %v3880_v9 = vpop.permute.xlu0 %3879  ;;  %v7654_v39 = vld [vmem:[#allocation3 + $0x8] sm:$0xff]  }
 0x4d5   : > { %3969 = vst.msk [vmem:[#allocation3 + $0x18] sm:$0xf] %vm990_vm5, %v3880_v9  ;;  %4149 = vrot.lane.b32.xlu1 %v9174_v31, %s7683_s20  ;;  %7582 = vmatmul.mubr.msk.bf16.vlgmr.msra.gmra.mxu1 %vm2698_vm12, %v7654_v39 }
 0x4d6   : > { %4147 = vrot.lane.b32.xlu0 %v9239_v38, %s7683_s20  ;;  %v4265_v38 = vld [vmem:[#allocation2 + $0xc1] sm:$0xff] }
 0x4d7   : > { %v4134_v2 = vpop.permute.xlu1 %4133  ;;  %v7353_v32 = vpack.c.bf16 %v4265_v38, %v4265_v38 }
 0x4d8   : > { %4224 = vst.msk [vmem:[#allocation3 + $0x14] sm:$0xf] %vm1247_vm6, %v4134_v2  ;;  %v4132_v48 = vpop.permute.xlu0 %4131  ;;  %v4526_v2 = vld [vmem:[#allocation2 + $0xfa] sm:$0xff] }
 0x4d9   : > { %4223 = vst.msk [vmem:[#allocation3 + $0x10] sm:$0xf] %vm1247_vm6, %v4132_v48  ;;  %4153 = vrot.lane.b32.xlu1 %v9190_v35, %s7683_s20  ;;  %v4525_v48 = vld [vmem:[#allocation2 + $0xf2] sm:$0xff] }
 0x4da   : > { %4151 = vrot.lane.b32.xlu0 %v9257_v17, %s7683_s20  ;;  %v7389_v38 = vpack.c.bf16 %v4525_v48, %v4525_v48  ;;  %v4785_v48 = vld [vmem:[#allocation2 + $0x138] sm:$0xff] }
 0x4db   : > { %v4138_v43 = vpop.permute.xlu1 %4137 }
 0x4dc   : > { %4226 = vst.msk [vmem:[#allocation3 + $0x1c] sm:$0xf] %vm1247_vm6, %v4138_v43  ;;  %v4136_v31 = vpop.permute.xlu0 %4135 }
 0x4dd   : > { %4225 = vst.msk [vmem:[#allocation3 + $0x18] sm:$0xf] %vm1247_vm6, %v4136_v31  ;;  %4405 = vrot.lane.b32.xlu1 %v7446_v15, %s7684_s21  ;;  %v7481_v15 = vpack.c.bf16 %v5289_v50, %v5289_v50  ;;  %v7390_v31 = vpack.c.bf16 %v4526_v2, %v4526_v2  ;;  %v4786_v2 = vld [vmem:[#allocation2 + $0x140] sm:$0xff] }
 0x4de   : > { %4403 = vrot.lane.b32.xlu0 %v7445_v36, %s7684_s21 }
 0x4df   : > { %v4390_v26 = vpop.permute.xlu1 %4389 }
 0x4e0   : > { %4480 = vst.msk [vmem:[#allocation3 + $0x14] sm:$0xf] %vm1504_vm7, %v4390_v26  ;;  %v4388_v14 = vpop.permute.xlu0 %4387 }
 0x4e1   : > { %4479 = vst.msk [vmem:[#allocation3 + $0x10] sm:$0xf] %vm1504_vm7, %v4388_v14  ;;  %4409 = vrot.lane.b32.xlu1 %v7354_v51, %s7684_s21 }
 0x4e2   : > { %4407 = vrot.lane.b32.xlu0 %v7353_v32, %s7684_s21 }
 0x4e3   : > { %v4394_v55 = vpop.permute.xlu1 %4393 }
 0x4e4   : > { %4482 = vst.msk [vmem:[#allocation3 + $0x1c] sm:$0xf] %vm1504_vm7, %v4394_v55  ;;  %v4392_v20 = vpop.permute.xlu0 %4391 }
 0x4e5   : > { %4481 = vst.msk [vmem:[#allocation3 + $0x18] sm:$0xf] %vm1504_vm7, %v4392_v20  ;;  %4661 = vrot.lane.b32.xlu1 %v7478_v11, %s7685_s22 }
 0x4e6   : > { %4659 = vrot.lane.b32.xlu0 %v7477_v42, %s7685_s22 }
 0x4e7   : > { %v4646_v5 = vpop.permute.xlu1 %4645 }
 0x4e8   : > { %4736 = vst.msk [vmem:[#allocation3 + $0x14] sm:$0xf] %vm1761_vm8, %v4646_v5  ;;  %v4644_v24 = vpop.permute.xlu0 %4643 }
 0x4e9   : > { %4735 = vst.msk [vmem:[#allocation3 + $0x10] sm:$0xf] %vm1761_vm8, %v4644_v24  ;;  %4665 = vrot.lane.b32.xlu1 %v7386_v1, %s7685_s22  ;;  %v5294_v24 = vld [vmem:[#allocation2 + $0x112] sm:$0xff] }
 0x4ea   : > { %4663 = vrot.lane.b32.xlu0 %v7385_v3, %s7685_s22 }
 0x4eb   : > { %v4650_v4 = vpop.permute.xlu1 %4649 }
 0x4ec   : > { %4738 = vst.msk [vmem:[#allocation3 + $0x1c] sm:$0xf] %vm1761_vm8, %v4650_v4  ;;  %v4648_v63 = vpop.permute.xlu0 %4647 }
 0x4ed   : > { %4737 = vst.msk [vmem:[#allocation3 + $0x18] sm:$0xf] %vm1761_vm8, %v4648_v63  ;;  %4917 = vrot.lane.b32.xlu1 %v9190_v35, %s7686_s23  ;;  %v5034_v35 = vld [vmem:[#allocation2 + $0xe1] sm:$0xff]  ;;  %v9642_v63 = vpack.c.bf16 %v5294_v24, %v5294_v24 }
 0x4ee   : > { %4915 = vrot.lane.b32.xlu0 %v9257_v17, %s7686_s23  ;;  %v5033_v17 = vld [vmem:[#allocation2 + $0xd9] sm:$0xff]  ;;  %v7450_v34 = vpack.c.bf16 %v5034_v35, %v5034_v35 }
 0x4ef   : > { %v4902_v6 = vpop.permute.xlu1 %4901  ;;  %v7449_v47 = vpack.c.bf16 %v5033_v17, %v5033_v17 }
 0x4f0   : > { %4992 = vst.msk [vmem:[#allocation3 + $0x14] sm:$0xf] %vm2019_vm9, %v4902_v6  ;;  %v4900_v29 = vpop.permute.xlu0 %4899 }
 0x4f1   : > { %4991 = vst.msk [vmem:[#allocation3 + $0x10] sm:$0xf] %vm2019_vm9, %v4900_v29  ;;  %4921 = vrot.lane.b32.xlu1 %v9205_v45, %s7686_s23 }
 0x4f2   : > { %4919 = vrot.lane.b32.xlu0 %v9262_v25, %s7686_s23 }
 0x4f3   : > { %v4906_v41 = vpop.permute.xlu1 %4905 }
 0x4f4   : > { %4994 = vst.msk [vmem:[#allocation3 + $0x1c] sm:$0xf] %vm2019_vm9, %v4906_v41  ;;  %v4904_v7 = vpop.permute.xlu0 %4903 }
 0x4f5   : > { %4993 = vst.msk [vmem:[#allocation3 + $0x18] sm:$0xf] %vm2019_vm9, %v4904_v7  ;;  %5173 = vrot.lane.b32.xlu1 %v7354_v51, %s7687_s28 }
 0x4f6   : > { %5171 = vrot.lane.b32.xlu0 %v7353_v32, %s7687_s28 }
 0x4f7   : > { %v5158_v40 = vpop.permute.xlu1 %5157 }
 0x4f8   : > { %5248 = vst.msk [vmem:[#allocation3 + $0x14] sm:$0xf] %vm2276_vm10, %v5158_v40  ;;  %v5156_v54 = vpop.permute.xlu0 %5155 }
 0x4f9   : > { %5247 = vst.msk [vmem:[#allocation3 + $0x10] sm:$0xf] %vm2276_vm10, %v5156_v54  ;;  %5177 = vrot.lane.b32.xlu1 %v7450_v34, %s7687_s28  ;;  %v4015_v54 = vld [vmem:[#allocation2 + $0x108] sm:$0xff] }
 0x4fa   : > { %5175 = vrot.lane.b32.xlu0 %v7449_v47, %s7687_s28  ;;  %v7327_v21 = vpack.c.bf16 %v4015_v54, %v4015_v54 }
 0x4fb   : > { %v5162_v18 = vpop.permute.xlu1 %5161 }
 0x4fc   : > { %5250 = vst.msk [vmem:[#allocation3 + $0x1c] sm:$0xf] %vm2276_vm10, %v5162_v18  ;;  %v5160_v44 = vpop.permute.xlu0 %5159 }
 0x4fd   : > { %5249 = vst.msk [vmem:[#allocation3 + $0x18] sm:$0xf] %vm2276_vm10, %v5160_v44  ;;  %5429 = vrot.lane.b32.xlu1 %v7386_v1, %s7688_s4 }
 0x4fe   : > { %5427 = vrot.lane.b32.xlu0 %v7385_v3, %s7688_s4 }
 0x4ff   : > { %v5414_v52 = vpop.permute.xlu1 %5413 }
 0x500   : > { %5504 = vst.msk [vmem:[#allocation3 + $0x14] sm:$0xf] %vm2533_vm11, %v5414_v52  ;;  %v5412_v53 = vpop.permute.xlu0 %5411  ;;  %v4018_v52 = vld [vmem:[#allocation2 + $0x128] sm:$0xff] }
 0x501   : > { %5503 = vst.msk [vmem:[#allocation3 + $0x10] sm:$0xf] %vm2533_vm11, %v5412_v53  ;;  %5433 = vrot.lane.b32.xlu1 %v7482_v37, %s7688_s4 }
 0x502   : > { %5431 = vrot.lane.b32.xlu0 %v7481_v15, %s7688_s4 }
 0x503   : > { %v5418_v22 = vpop.permute.xlu1 %5417 }
 0x504   : > { %5506 = vst.msk [vmem:[#allocation3 + $0x1c] sm:$0xf] %vm2533_vm11, %v5418_v22  ;;  %v5416_v36 = vpop.permute.xlu0 %5415 }
 0x505   : > { %5505 = vst.msk [vmem:[#allocation3 + $0x18] sm:$0xf] %vm2533_vm11, %v5416_v36  ;;  %3901 = vrot.lane.b32.xlu1 %v7386_v1, %s7682_s19 }
 0x506   : > { %3899 = vrot.lane.b32.xlu0 %v7385_v3, %s7682_s19  ;;  %v5293_v3 = vld [vmem:[#allocation2 + $0x10a] sm:$0xff] }
 0x507   : > { %v3886_v27 = vpop.permute.xlu1 %3885  ;;  %v7485_v29 = vpack.c.bf16 %v5293_v3, %v5293_v3 }
 0x508   : > { %3972 = vst.msk [vmem:[#allocation3 + $0x24] sm:$0xf] %vm990_vm5, %v3886_v27  ;;  %v3884_v56 = vpop.permute.xlu0 %3883  ;;  %v7655_v49 = vld [vmem:[#allocation3 + $0x10] sm:$0xff]  }
 0x509   : > { %3971 = vst.msk [vmem:[#allocation3 + $0x20] sm:$0xf] %vm990_vm5, %v3884_v56  ;;  %3905 = vrot.lane.b32.xlu1 %v7482_v37, %s7682_s19  ;;  %7585 = vmatprep.mubr.msk.bf16.mxu1 %vm2698_vm12, %v7655_v49  ;;  %v4274_v49 = vld [vmem:[#allocation2 + $0x129] sm:$0xff] }
 0x50a   : > { %3903 = vrot.lane.b32.xlu0 %v7481_v15, %s7682_s19 }
 0x50b   : > { %v3890_v60 = vpop.permute.xlu1 %3889 }
 0x50c   : > { %3974 = vst.msk [vmem:[#allocation3 + $0x2c] sm:$0xf] %vm990_vm5, %v3890_v60  ;;  %v3888_v28 = vpop.permute.xlu0 %3887  ;;  %v7656_v11 = vld [vmem:[#allocation3 + $0x18] sm:$0xff]  }
 0x50d   : > { %3973 = vst.msk [vmem:[#allocation3 + $0x28] sm:$0xf] %vm990_vm5, %v3888_v28  ;;  %4157 = vrot.lane.b32.xlu1 %v9205_v45, %s7683_s20  ;;  %7586 = vmatmul.mubr.msk.bf16.gmra.mxu1 %vm2698_vm12, %v7656_v11  ;;  %v4273_v60 = vld [vmem:[#allocation2 + $0x121] sm:$0xff]  ;;  %v7362_v11 = vpack.c.bf16 %v4274_v49, %v4274_v49 }
 0x50e   : > { %4155 = vrot.lane.b32.xlu0 %v9262_v25, %s7683_s20  ;;  %v4269_v25 = vld [vmem:[#allocation2 + $0xf1] sm:$0xff]  ;;  %v4534_v49 = vld [vmem:[#allocation2 + $0x15a] sm:$0xff] }
 0x50f   : > { %v4142_v33 = vpop.permute.xlu1 %4141  ;;  %v7357_v46 = vpack.c.bf16 %v4269_v25, %v4269_v25  ;;  %v4529_v25 = vld [vmem:[#allocation2 + $0x122] sm:$0xff] }
 0x510   : > { %4228 = vst.msk [vmem:[#allocation3 + $0x24] sm:$0xf] %vm1247_vm6, %v4142_v33  ;;  %v4140_v42 = vpop.permute.xlu0 %4139 }
 0x511   : > { %4227 = vst.msk [vmem:[#allocation3 + $0x20] sm:$0xf] %vm1247_vm6, %v4140_v42  ;;  %4161 = vrot.lane.b32.xlu1 %v9212_v12, %s7683_s20  ;;  %v7361_v42 = vpack.c.bf16 %v4273_v60, %v4273_v60  ;;  %v4533_v60 = vld [vmem:[#allocation2 + $0x152] sm:$0xff] }
 0x512   : > { %4159 = vrot.lane.b32.xlu0 %v9268_v16, %s7683_s20 }
 0x513   : > { %v4146_v19 = vpop.permute.xlu1 %4145 }
 0x514   : > { %4230 = vst.msk [vmem:[#allocation3 + $0x2c] sm:$0xf] %vm1247_vm6, %v4146_v19  ;;  %v4144_v45 = vpop.permute.xlu0 %4143 }
 0x515   : > { %4229 = vst.msk [vmem:[#allocation3 + $0x28] sm:$0xf] %vm1247_vm6, %v4144_v45  ;;  %4413 = vrot.lane.b32.xlu1 %v7450_v34, %s7684_s21  ;;  %v4016_v34 = vld [vmem:[#allocation2 + $0x110] sm:$0xff] }
 0x516   : > { %4411 = vrot.lane.b32.xlu0 %v7449_v47, %s7684_s21  ;;  %v7328_v18 = vpack.c.bf16 %v4016_v34, %v4016_v34  ;;  %v4021_v34 = vld [vmem:[#allocation2 + $0x150] sm:$0xff] }
 0x517   : > { %v4398_v13 = vpop.permute.xlu1 %4397 }
 0x518   : > { %4484 = vst.msk [vmem:[#allocation3 + $0x24] sm:$0xf] %vm1504_vm7, %v4398_v13  ;;  %v4396_v62 = vpop.permute.xlu0 %4395 }
 0x519   : > { %4483 = vst.msk [vmem:[#allocation3 + $0x20] sm:$0xf] %vm1504_vm7, %v4396_v62  ;;  %4417 = vrot.lane.b32.xlu1 %v7358_v8, %s7684_s21 }
 0x51a   : > { %4415 = vrot.lane.b32.xlu0 %v7357_v46, %s7684_s21 }
 0x51b   : > { %v4402_v9 = vpop.permute.xlu1 %4401 }
 0x51c   : > { %4486 = vst.msk [vmem:[#allocation3 + $0x2c] sm:$0xf] %vm1504_vm7, %v4402_v9  ;;  %v4400_v39 = vpop.permute.xlu0 %4399 }
 0x51d   : > { %4485 = vst.msk [vmem:[#allocation3 + $0x28] sm:$0xf] %vm1504_vm7, %v4400_v39  ;;  %4669 = vrot.lane.b32.xlu1 %v7482_v37, %s7685_s22  ;;  %v4017_v37 = vld [vmem:[#allocation2 + $0x120] sm:$0xff] }
 0x51e   : > { %4667 = vrot.lane.b32.xlu0 %v7481_v15, %s7685_s22  ;;  %v7330_v15 = vpack.c.bf16 %v4018_v52, %v4018_v52  ;;  %v7329_v36 = vpack.c.bf16 %v4017_v37, %v4017_v37  ;;  %v4278_v52 = vld [vmem:[#allocation2 + $0x159] sm:$0xff]  ;;  %v4277_v37 = vld [vmem:[#allocation2 + $0x151] sm:$0xff] }
 0x51f   : > { %v4654_v43 = vpop.permute.xlu1 %4653 }
 0x520   : > { %4740 = vst.msk [vmem:[#allocation3 + $0x24] sm:$0xf] %vm1761_vm8, %v4654_v43  ;;  %v4652_v58 = vpop.permute.xlu0 %4651 }
 0x521   : > { %4739 = vst.msk [vmem:[#allocation3 + $0x20] sm:$0xf] %vm1761_vm8, %v4652_v58  ;;  %4673 = vrot.lane.b32.xlu1 %v7390_v31, %s7685_s22 }
 0x522   : > { %4671 = vrot.lane.b32.xlu0 %v7389_v38, %s7685_s22 }
 0x523   : > { %v4658_v26 = vpop.permute.xlu1 %4657 }
 0x524   : > { %4742 = vst.msk [vmem:[#allocation3 + $0x2c] sm:$0xf] %vm1761_vm8, %v4658_v26  ;;  %v4656_v51 = vpop.permute.xlu0 %4655 }
 0x525   : > { %4741 = vst.msk [vmem:[#allocation3 + $0x28] sm:$0xf] %vm1761_vm8, %v4656_v51  ;;  %4925 = vrot.lane.b32.xlu1 %v9212_v12, %s7686_s23  ;;  %v5038_v12 = vld [vmem:[#allocation2 + $0x111] sm:$0xff] }
 0x526   : > { %4923 = vrot.lane.b32.xlu0 %v9268_v16, %s7686_s23  ;;  %v5037_v16 = vld [vmem:[#allocation2 + $0x109] sm:$0xff]  ;;  %v9631_v30 = vpack.c.bf16 %v5038_v12, %v5038_v12 }
 0x527   : > { %v4910_v14 = vpop.permute.xlu1 %4909  ;;  %v7453_v5 = vpack.c.bf16 %v5037_v16, %v5037_v16 }
 0x528   : > { %4996 = vst.msk [vmem:[#allocation3 + $0x24] sm:$0xf] %vm2019_vm9, %v4910_v14  ;;  %v4908_v32 = vpop.permute.xlu0 %4907  ;;  %v5042_v14 = vld [vmem:[#allocation2 + $0x141] sm:$0xff] }
 0x529   : > { %4995 = vst.msk [vmem:[#allocation3 + $0x20] sm:$0xf] %vm2019_vm9, %v4908_v32  ;;  %4929 = vrot.lane.b32.xlu1 %v9223_v10, %s7686_s23  ;;  %v5041_v32 = vld [vmem:[#allocation2 + $0x139] sm:$0xff] }
 0x52a   : > { %4927 = vrot.lane.b32.xlu0 %v9276_v61, %s7686_s23  ;;  %v7457_v16 = vpack.c.bf16 %v5041_v32, %v5041_v32 }
 0x52b   : > { %v4914_v55 = vpop.permute.xlu1 %4913 }
 0x52c   : > { %4998 = vst.msk [vmem:[#allocation3 + $0x2c] sm:$0xf] %vm2019_vm9, %v4914_v55  ;;  %v4912_v20 = vpop.permute.xlu0 %4911 }
 0x52d   : > { %4997 = vst.msk [vmem:[#allocation3 + $0x28] sm:$0xf] %vm2019_vm9, %v4912_v20  ;;  %5181 = vrot.lane.b32.xlu1 %v7358_v8, %s7687_s28  ;;  %v7394_v8 = vpack.c.bf16 %v4530_v59, %v4530_v59  ;;  %v7458_v20 = vpack.c.bf16 %v5042_v14, %v5042_v14 }
 0x52e   : > { %5179 = vrot.lane.b32.xlu0 %v7357_v46, %s7687_s28  ;;  %v7393_v46 = vpack.c.bf16 %v4529_v25, %v4529_v25 }
 0x52f   : > { %v5166_v23 = vpop.permute.xlu1 %5165 }
 0x530   : > { %5252 = vst.msk [vmem:[#allocation3 + $0x24] sm:$0xf] %vm2276_vm10, %v5166_v23  ;;  %v5164_v10 = vpop.permute.xlu0 %5163 }
 0x531   : > { %5251 = vst.msk [vmem:[#allocation3 + $0x20] sm:$0xf] %vm2276_vm10, %v5164_v10  ;;  %5185 = vrot.lane.b32.xlu1 %v9631_v30, %s7687_s28  ;;  %v5298_v10 = vld [vmem:[#allocation2 + $0x142] sm:$0xff] }
 0x532   : > { %5183 = vrot.lane.b32.xlu0 %v7453_v5, %s7687_s28 }
 0x533   : > { %v5170_v61 = vpop.permute.xlu1 %5169 }
 0x534   : > { %5254 = vst.msk [vmem:[#allocation3 + $0x2c] sm:$0xf] %vm2276_vm10, %v5170_v61  ;;  %v5168_v1 = vpop.permute.xlu0 %5167 }
 0x535   : > { %5253 = vst.msk [vmem:[#allocation3 + $0x28] sm:$0xf] %vm2276_vm10, %v5168_v1  ;;  %5437 = vrot.lane.b32.xlu1 %v7390_v31, %s7688_s4  ;;  %v7490_v1 = vpack.c.bf16 %v5298_v10, %v5298_v10 }
 0x536   : > { %5435 = vrot.lane.b32.xlu0 %v7389_v38, %s7688_s4 }
 0x537   : > { %v5422_v4 = vpop.permute.xlu1 %5421 }
 0x538   : > { %5508 = vst.msk [vmem:[#allocation3 + $0x24] sm:$0xf] %vm2533_vm11, %v5422_v4  ;;  %v5420_v6 = vpop.permute.xlu0 %5419 }
 0x539   : > { %5507 = vst.msk [vmem:[#allocation3 + $0x20] sm:$0xf] %vm2533_vm11, %v5420_v6  ;;  %5441 = vrot.lane.b32.xlu1 %v9642_v63, %s7688_s4 }
 0x53a   : > { %5439 = vrot.lane.b32.xlu0 %v7485_v29, %s7688_s4 }
 0x53b   : > { %v5426_v41 = vpop.permute.xlu1 %5425 }
 0x53c   : > { %5510 = vst.msk [vmem:[#allocation3 + $0x2c] sm:$0xf] %vm2533_vm11, %v5426_v41  ;;  %v5424_v7 = vpop.permute.xlu0 %5423 }
 0x53d   : > { %5509 = vst.msk [vmem:[#allocation3 + $0x28] sm:$0xf] %vm2533_vm11, %v5424_v7  ;;  %3909 = vrot.lane.b32.xlu1 %v7390_v31, %s7682_s19  ;;  %v7426_v31 = vpack.c.bf16 %v4786_v2, %v4786_v2 }
 0x53e   : > { %3907 = vrot.lane.b32.xlu0 %v7389_v38, %s7682_s19  ;;  %v7425_v38 = vpack.c.bf16 %v4785_v48, %v4785_v48 }
 0x53f   : > { %v3894_v35 = vpop.permute.xlu1 %3893 }
 0x540   : > { %3976 = vst.msk [vmem:[#allocation3 + $0x34] sm:$0xf] %vm990_vm5, %v3894_v35  ;;  %v3892_v17 = vpop.permute.xlu0 %3891  ;;  %v7657_v40 = vld [vmem:[#allocation3 + $0x20] sm:$0xff]  }
 0x541   : > { %3975 = vst.msk [vmem:[#allocation3 + $0x30] sm:$0xf] %vm990_vm5, %v3892_v17  ;;  %3913 = vrot.lane.b32.xlu1 %v9642_v63, %s7682_s19  ;;  %7589 = vmatprep.mubr.msk.bf16.mxu1 %vm2698_vm12, %v7657_v40  ;;  %v4022_v40 = vld [vmem:[#allocation2 + $0x158] sm:$0xff] }
 0x542   : > { %3911 = vrot.lane.b32.xlu0 %v7485_v29, %s7682_s19 }
 0x543   : > { %v3898_v47 = vpop.permute.xlu1 %3897 }
 0x544   : > { %3978 = vst.msk [vmem:[#allocation3 + $0x3c] sm:$0xf] %vm990_vm5, %v3898_v47  ;;  %v3896_v44 = vpop.permute.xlu0 %3895  ;;  %v7658_v50 = vld [vmem:[#allocation3 + $0x28] sm:$0xff]   ;;  %v7334_v47 = vpack.c.bf16 %v4022_v40, %v4022_v40 }
 0x545   : > { %3977 = vst.msk [vmem:[#allocation3 + $0x38] sm:$0xf] %vm990_vm5, %v3896_v44  ;;  %4165 = vrot.lane.b32.xlu1 %v7328_v18, %s7683_s20  ;;  %7590 = vmatmul.mubr.msk.bf16.gmra.mxu1 %vm2698_vm12, %v7658_v50  ;;  %v7333_v44 = vpack.c.bf16 %v4021_v34, %v4021_v34 }
 0x546   : > { %4163 = vrot.lane.b32.xlu0 %v7327_v21, %s7683_s20 }
 0x547   : > { %v4150_v53 = vpop.permute.xlu1 %4149 }
 0x548   : > { %4232 = vst.msk [vmem:[#allocation3 + $0x34] sm:$0xf] %vm1247_vm6, %v4150_v53  ;;  %v4148_v22 = vpop.permute.xlu0 %4147 }
 0x549   : > { %4231 = vst.msk [vmem:[#allocation3 + $0x30] sm:$0xf] %vm1247_vm6, %v4148_v22  ;;  %4169 = vrot.lane.b32.xlu1 %v7330_v15, %s7683_s20 }
 0x54a   : > { %4167 = vrot.lane.b32.xlu0 %v7329_v36, %s7683_s20 }
 0x54b   : > { %v4154_v27 = vpop.permute.xlu1 %4153 }
 0x54c   : > { %4234 = vst.msk [vmem:[#allocation3 + $0x3c] sm:$0xf] %vm1247_vm6, %v4154_v27  ;;  %v4152_v56 = vpop.permute.xlu0 %4151 }
 0x54d   : > { %4233 = vst.msk [vmem:[#allocation3 + $0x38] sm:$0xf] %vm1247_vm6, %v4152_v56  ;;  %4421 = vrot.lane.b32.xlu1 %v9631_v30, %s7684_s21 }
 0x54e   : > { %4419 = vrot.lane.b32.xlu0 %v7453_v5, %s7684_s21  ;;  %v5297_v5 = vld [vmem:[#allocation2 + $0x13a] sm:$0xff] }
 0x54f   : > { %v4406_v28 = vpop.permute.xlu1 %4405  ;;  %v7489_v3 = vpack.c.bf16 %v5297_v5, %v5297_v5 }
 0x550   : > { %4488 = vst.msk [vmem:[#allocation3 + $0x34] sm:$0xf] %vm1504_vm7, %v4406_v28  ;;  %v4404_v33 = vpop.permute.xlu0 %4403 }
 0x551   : > { %4487 = vst.msk [vmem:[#allocation3 + $0x30] sm:$0xf] %vm1504_vm7, %v4404_v33  ;;  %4425 = vrot.lane.b32.xlu1 %v7362_v11, %s7684_s21 }
 0x552   : > { %4423 = vrot.lane.b32.xlu0 %v7361_v42, %s7684_s21 }
 0x553   : > { %v4410_v19 = vpop.permute.xlu1 %4409 }
 0x554   : > { %4490 = vst.msk [vmem:[#allocation3 + $0x3c] sm:$0xf] %vm1504_vm7, %v4410_v19  ;;  %v4408_v45 = vpop.permute.xlu0 %4407 }
 0x555   : > { %4489 = vst.msk [vmem:[#allocation3 + $0x38] sm:$0xf] %vm1504_vm7, %v4408_v45  ;;  %4677 = vrot.lane.b32.xlu1 %v9642_v63, %s7685_s22 }
 0x556   : > { %4675 = vrot.lane.b32.xlu0 %v7485_v29, %s7685_s22 }
 0x557   : > { %v4662_v13 = vpop.permute.xlu1 %4661 }
 0x558   : > { %4744 = vst.msk [vmem:[#allocation3 + $0x34] sm:$0xf] %vm1761_vm8, %v4662_v13  ;;  %v4660_v62 = vpop.permute.xlu0 %4659 }
 0x559   : > { %4743 = vst.msk [vmem:[#allocation3 + $0x30] sm:$0xf] %vm1761_vm8, %v4660_v62  ;;  %4681 = vrot.lane.b32.xlu1 %v7394_v8, %s7685_s22  ;;  %v5046_v62 = vld [vmem:[#allocation2 + $0x171] sm:$0xff] }
 0x55a   : > { %4679 = vrot.lane.b32.xlu0 %v7393_v46, %s7685_s22 }
 0x55b   : > { %v4666_v9 = vpop.permute.xlu1 %4665 }
 0x55c   : > { %4746 = vst.msk [vmem:[#allocation3 + $0x3c] sm:$0xf] %vm1761_vm8, %v4666_v9  ;;  %v4664_v39 = vpop.permute.xlu0 %4663 }
 0x55d   : > { %4745 = vst.msk [vmem:[#allocation3 + $0x38] sm:$0xf] %vm1761_vm8, %v4664_v39  ;;  %4933 = vrot.lane.b32.xlu1 %v7330_v15, %s7686_s23  ;;  %v7366_v15 = vpack.c.bf16 %v4278_v52, %v4278_v52  ;;  %v9758_v39 = vpack.c.bf16 %v5046_v62, %v5046_v62  ;;  %v5306_v62 = vld [vmem:[#allocation2 + $0x1a2] sm:$0xff] }
 0x55e   : > { %4931 = vrot.lane.b32.xlu0 %v7329_v36, %s7686_s23  ;;  %v7365_v36 = vpack.c.bf16 %v4277_v37, %v4277_v37 }
 0x55f   : > { %v4918_v43 = vpop.permute.xlu1 %4917 }
 0x560   : > { %5000 = vst.msk [vmem:[#allocation3 + $0x34] sm:$0xf] %vm2019_vm9, %v4918_v43  ;;  %v4916_v58 = vpop.permute.xlu0 %4915 }
 0x561   : > { %4999 = vst.msk [vmem:[#allocation3 + $0x30] sm:$0xf] %vm2019_vm9, %v4916_v58  ;;  %4937 = vrot.lane.b32.xlu1 %v7426_v31, %s7686_s23  ;;  %v5302_v58 = vld [vmem:[#allocation2 + $0x172] sm:$0xff] }
 0x562   : > { %4935 = vrot.lane.b32.xlu0 %v7425_v38, %s7686_s23 }
 0x563   : > { %v4922_v26 = vpop.permute.xlu1 %4921 }
 0x564   : > { %5002 = vst.msk [vmem:[#allocation3 + $0x3c] sm:$0xf] %vm2019_vm9, %v4922_v26  ;;  %v4920_v51 = vpop.permute.xlu0 %4919 }
 0x565   : > { %5001 = vst.msk [vmem:[#allocation3 + $0x38] sm:$0xf] %vm2019_vm9, %v4920_v51  ;;  %5189 = vrot.lane.b32.xlu1 %v7362_v11, %s7687_s28  ;;  %v7398_v11 = vpack.c.bf16 %v4534_v49, %v4534_v49  ;;  %v9772_v51 = vpack.c.bf16 %v5302_v58, %v5302_v58 }
 0x566   : > { %5187 = vrot.lane.b32.xlu0 %v7361_v42, %s7687_s28  ;;  %v7397_v42 = vpack.c.bf16 %v4533_v60, %v4533_v60 }
 0x567   : > { %v5174_v55 = vpop.permute.xlu1 %5173 }
 0x568   : > { %5256 = vst.msk [vmem:[#allocation3 + $0x34] sm:$0xf] %vm2276_vm10, %v5174_v55  ;;  %v5172_v12 = vpop.permute.xlu0 %5171 }
 0x569   : > { %5255 = vst.msk [vmem:[#allocation3 + $0x30] sm:$0xf] %vm2276_vm10, %v5172_v12  ;;  %5193 = vrot.lane.b32.xlu1 %v7458_v20, %s7687_s28 }
 0x56a   : > { %5191 = vrot.lane.b32.xlu0 %v7457_v16, %s7687_s28 }
 0x56b   : > { %v5178_v23 = vpop.permute.xlu1 %5177 }
 0x56c   : > { %5258 = vst.msk [vmem:[#allocation3 + $0x3c] sm:$0xf] %vm2276_vm10, %v5178_v23  ;;  %v5176_v30 = vpop.permute.xlu0 %5175 }
 0x56d   : > { %5257 = vst.msk [vmem:[#allocation3 + $0x38] sm:$0xf] %vm2276_vm10, %v5176_v30  ;;  %5445 = vrot.lane.b32.xlu1 %v7394_v8, %s7688_s4 }
 0x56e   : > { %5443 = vrot.lane.b32.xlu0 %v7393_v46, %s7688_s4 }
 0x56f   : > { %v5430_v61 = vpop.permute.xlu1 %5429 }
 0x570   : > { %5512 = vst.msk [vmem:[#allocation3 + $0x34] sm:$0xf] %vm2533_vm11, %v5430_v61  ;;  %v5428_v24 = vpop.permute.xlu0 %5427 }
 0x571   : > { %5511 = vst.msk [vmem:[#allocation3 + $0x30] sm:$0xf] %vm2533_vm11, %v5428_v24  ;;  %5449 = vrot.lane.b32.xlu1 %v7490_v1, %s7688_s4  ;;  %v4026_v24 = vld [vmem:[#allocation2 + $0x188] sm:$0xff] }
 0x572   : > { %5447 = vrot.lane.b32.xlu0 %v7489_v3, %s7688_s4 }
 0x573   : > { %v5434_v4 = vpop.permute.xlu1 %5433 }
 0x574   : > { %5514 = vst.msk [vmem:[#allocation3 + $0x3c] sm:$0xf] %vm2533_vm11, %v5434_v4  ;;  %v5432_v63 = vpop.permute.xlu0 %5431 }
 0x575   : > { %5513 = vst.msk [vmem:[#allocation3 + $0x38] sm:$0xf] %vm2533_vm11, %v5432_v63  ;;  %3917 = vrot.lane.b32.xlu1 %v7394_v8, %s7682_s19  ;;  %v7338_v63 = vpack.c.bf16 %v4026_v24, %v4026_v24 }
 0x576   : > { %3915 = vrot.lane.b32.xlu0 %v7393_v46, %s7682_s19  ;;  %v5045_v46 = vld [vmem:[#allocation2 + $0x169] sm:$0xff] }
 0x577   : > { %v3902_v6 = vpop.permute.xlu1 %3901  ;;  %v9761_v48 = vpack.c.bf16 %v5045_v46, %v5045_v46  ;;  %v5305_v46 = vld [vmem:[#allocation2 + $0x19a] sm:$0xff] }
 0x578   : > { %3980 = vst.msk [vmem:[#allocation3 + $0x44] sm:$0xf] %vm990_vm5, %v3902_v6  ;;  %v3900_v29 = vpop.permute.xlu0 %3899  ;;  %v7659_v41 = vld [vmem:[#allocation3 + $0x30] sm:$0xff]  }
 0x579   : > { %3979 = vst.msk [vmem:[#allocation3 + $0x40] sm:$0xf] %vm990_vm5, %v3900_v29  ;;  %3921 = vrot.lane.b32.xlu1 %v7490_v1, %s7682_s19  ;;  %7593 = vmatprep.mubr.msk.bf16.mxu1 %vm2698_vm12, %v7659_v41 }
 0x57a   : > { %3919 = vrot.lane.b32.xlu0 %v7489_v3, %s7682_s19 }
 0x57b   : > { %v3906_v7 = vpop.permute.xlu1 %3905 }
 0x57c   : > { %3982 = vst.msk [vmem:[#allocation3 + $0x4c] sm:$0xf] %vm990_vm5, %v3906_v7  ;;  %v3904_v35 = vpop.permute.xlu0 %3903  ;;  %v7660_v17 = vld [vmem:[#allocation3 + $0x38] sm:$0xff]  }
 0x57d   : > { %3981 = vst.msk [vmem:[#allocation3 + $0x48] sm:$0xf] %vm990_vm5, %v3904_v35  ;;  %4173 = vrot.lane.b32.xlu1 %v7426_v31, %s7683_s20  ;;  %7594 = vmatmul.mubr.msk.bf16.gmra.mxu1 %vm2698_vm12, %v7660_v17  ;;  %v4282_v7 = vld [vmem:[#allocation2 + $0x189] sm:$0xff] }
 0x57e   : > { %4171 = vrot.lane.b32.xlu0 %v7425_v38, %s7683_s20  ;;  %v5301_v38 = vld [vmem:[#allocation2 + $0x16a] sm:$0xff]  ;;  %v7370_v17 = vpack.c.bf16 %v4282_v7, %v4282_v7 }
 0x57f   : > { %v4158_v54 = vpop.permute.xlu1 %4157  ;;  %v9775_v32 = vpack.c.bf16 %v5301_v38, %v5301_v38 }
 0x580   : > { %4236 = vst.msk [vmem:[#allocation3 + $0x44] sm:$0xf] %vm1247_vm6, %v4158_v54  ;;  %v4156_v18 = vpop.permute.xlu0 %4155 }
 0x581   : > { %4235 = vst.msk [vmem:[#allocation3 + $0x40] sm:$0xf] %vm1247_vm6, %v4156_v18  ;;  %4177 = vrot.lane.b32.xlu1 %v7334_v47, %s7683_s20  ;;  %v4538_v18 = vld [vmem:[#allocation2 + $0x18a] sm:$0xff] }
 0x582   : > { %4175 = vrot.lane.b32.xlu0 %v7333_v44, %s7683_s20 }
 0x583   : > { %v4162_v21 = vpop.permute.xlu1 %4161 }
 0x584   : > { %4238 = vst.msk [vmem:[#allocation3 + $0x4c] sm:$0xf] %vm1247_vm6, %v4162_v21  ;;  %v4160_v50 = vpop.permute.xlu0 %4159 }
 0x585   : > { %4237 = vst.msk [vmem:[#allocation3 + $0x48] sm:$0xf] %vm1247_vm6, %v4160_v50  ;;  %4429 = vrot.lane.b32.xlu1 %v7458_v20, %s7684_s21  ;;  %v7402_v50 = vpack.c.bf16 %v4538_v18, %v4538_v18 }
 0x586   : > { %4427 = vrot.lane.b32.xlu0 %v7457_v16, %s7684_s21 }
 0x587   : > { %v4414_v53 = vpop.permute.xlu1 %4413 }
 0x588   : > { %4492 = vst.msk [vmem:[#allocation3 + $0x44] sm:$0xf] %vm1504_vm7, %v4414_v53  ;;  %v4412_v22 = vpop.permute.xlu0 %4411 }
 0x589   : > { %4491 = vst.msk [vmem:[#allocation3 + $0x40] sm:$0xf] %vm1504_vm7, %v4412_v22  ;;  %4433 = vrot.lane.b32.xlu1 %v7366_v15, %s7684_s21  ;;  %v4794_v22 = vld [vmem:[#allocation2 + $0x1a0] sm:$0xff] }
 0x58a   : > { %4431 = vrot.lane.b32.xlu0 %v7365_v36, %s7684_s21 }
 0x58b   : > { %v4418_v27 = vpop.permute.xlu1 %4417 }
 0x58c   : > { %4494 = vst.msk [vmem:[#allocation3 + $0x4c] sm:$0xf] %vm1504_vm7, %v4418_v27  ;;  %v4416_v56 = vpop.permute.xlu0 %4415 }
 0x58d   : > { %4493 = vst.msk [vmem:[#allocation3 + $0x48] sm:$0xf] %vm1504_vm7, %v4416_v56  ;;  %4685 = vrot.lane.b32.xlu1 %v7490_v1, %s7685_s22  ;;  %v7434_v56 = vpack.c.bf16 %v4794_v22, %v4794_v22 }
 0x58e   : > { %4683 = vrot.lane.b32.xlu0 %v7489_v3, %s7685_s22  ;;  %v4025_v3 = vld [vmem:[#allocation2 + $0x180] sm:$0xff] }
 0x58f   : > { %v4670_v28 = vpop.permute.xlu1 %4669  ;;  %v7337_v29 = vpack.c.bf16 %v4025_v3, %v4025_v3 }
 0x590   : > { %4748 = vst.msk [vmem:[#allocation3 + $0x44] sm:$0xf] %vm1761_vm8, %v4670_v28  ;;  %v4668_v33 = vpop.permute.xlu0 %4667 }
 0x591   : > { %4747 = vst.msk [vmem:[#allocation3 + $0x40] sm:$0xf] %vm1761_vm8, %v4668_v33  ;;  %4689 = vrot.lane.b32.xlu1 %v7398_v11, %s7685_s22  ;;  %v5050_v33 = vld [vmem:[#allocation2 + $0x1a1] sm:$0xff] }
 0x592   : > { %4687 = vrot.lane.b32.xlu0 %v7397_v42, %s7685_s22 }
 0x593   : > { %v4674_v19 = vpop.permute.xlu1 %4673 }
 0x594   : > { %4750 = vst.msk [vmem:[#allocation3 + $0x4c] sm:$0xf] %vm1761_vm8, %v4674_v19  ;;  %v4672_v45 = vpop.permute.xlu0 %4671 }
 0x595   : > { %4749 = vst.msk [vmem:[#allocation3 + $0x48] sm:$0xf] %vm1761_vm8, %v4672_v45  ;;  %4941 = vrot.lane.b32.xlu1 %v7334_v47, %s7686_s23  ;;  %v7466_v45 = vpack.c.bf16 %v5050_v33, %v5050_v33 }
 0x596   : > { %4939 = vrot.lane.b32.xlu0 %v7333_v44, %s7686_s23  ;;  %v4537_v44 = vld [vmem:[#allocation2 + $0x182] sm:$0xff] }
 0x597   : > { %v4926_v59 = vpop.permute.xlu1 %4925  ;;  %v7401_v37 = vpack.c.bf16 %v4537_v44, %v4537_v44 }
 0x598   : > { %5004 = vst.msk [vmem:[#allocation3 + $0x44] sm:$0xf] %vm2019_vm9, %v4926_v59  ;;  %v4924_v25 = vpop.permute.xlu0 %4923 }
 0x599   : > { %5003 = vst.msk [vmem:[#allocation3 + $0x40] sm:$0xf] %vm2019_vm9, %v4924_v25  ;;  %4945 = vrot.lane.b32.xlu1 %v9298_v0, %s7686_s23 }
 0x59a   : > { %4943 = vrot.lane.b32.xlu0 %v9310_v57, %s7686_s23 }
 0x59b   : > { %v4930_v13 = vpop.permute.xlu1 %4929 }
 0x59c   : > { %5006 = vst.msk [vmem:[#allocation3 + $0x4c] sm:$0xf] %vm2019_vm9, %v4930_v13  ;;  %v4928_v8 = vpop.permute.xlu0 %4927 }
 0x59d   : > { %5005 = vst.msk [vmem:[#allocation3 + $0x48] sm:$0xf] %vm2019_vm9, %v4928_v8  ;;  %5197 = vrot.lane.b32.xlu1 %v7366_v15, %s7687_s28 }
 0x59e   : > { %5195 = vrot.lane.b32.xlu0 %v7365_v36, %s7687_s28  ;;  %v4793_v36 = vld [vmem:[#allocation2 + $0x198] sm:$0xff] }
 0x59f   : > { %v5182_v9 = vpop.permute.xlu1 %5181  ;;  %v7433_v60 = vpack.c.bf16 %v4793_v36, %v4793_v36 }
 0x5a0   : > { %5260 = vst.msk [vmem:[#allocation3 + $0x44] sm:$0xf] %vm2276_vm10, %v5182_v9  ;;  %v5180_v2 = vpop.permute.xlu0 %5179 }
 0x5a1   : > { %5259 = vst.msk [vmem:[#allocation3 + $0x40] sm:$0xf] %vm2276_vm10, %v5180_v2  ;;  %5201 = vrot.lane.b32.xlu1 %v9758_v39, %s7687_s28 }
 0x5a2   : > { %5199 = vrot.lane.b32.xlu0 %v9761_v48, %s7687_s28 }
 0x5a3   : > { %v5186_v43 = vpop.permute.xlu1 %5185 }
 0x5a4   : > { %5262 = vst.msk [vmem:[#allocation3 + $0x4c] sm:$0xf] %vm2276_vm10, %v5186_v43  ;;  %v5184_v31 = vpop.permute.xlu0 %5183 }
 0x5a5   : > { %5261 = vst.msk [vmem:[#allocation3 + $0x48] sm:$0xf] %vm2276_vm10, %v5184_v31  ;;  %5453 = vrot.lane.b32.xlu1 %v7398_v11, %s7688_s4 }
 0x5a6   : > { %5451 = vrot.lane.b32.xlu0 %v7397_v42, %s7688_s4 }
 0x5a7   : > { %v5438_v26 = vpop.permute.xlu1 %5437 }
 0x5a8   : > { %5516 = vst.msk [vmem:[#allocation3 + $0x44] sm:$0xf] %vm2533_vm11, %v5438_v26  ;;  %v5436_v14 = vpop.permute.xlu0 %5435 }
 0x5a9   : > { %5515 = vst.msk [vmem:[#allocation3 + $0x40] sm:$0xf] %vm2533_vm11, %v5436_v14  ;;  %5457 = vrot.lane.b32.xlu1 %v9772_v51, %s7688_s4 }
 0x5aa   : > { %5455 = vrot.lane.b32.xlu0 %v9775_v32, %s7688_s4 }
 0x5ab   : > { %v5442_v55 = vpop.permute.xlu1 %5441 }
 0x5ac   : > { %5518 = vst.msk [vmem:[#allocation3 + $0x4c] sm:$0xf] %vm2533_vm11, %v5442_v55  ;;  %v5440_v20 = vpop.permute.xlu0 %5439 }
 0x5ad   : > { %5517 = vst.msk [vmem:[#allocation3 + $0x48] sm:$0xf] %vm2533_vm11, %v5440_v20  ;;  %3673 = vrot.lane.b32.xlu1 %v9758_v39, %s7681_s18 }
 0x5ae   : > { %3671 = vrot.lane.b32.xlu0 %v9761_v48, %s7681_s18 }
 0x5af   : > { %v3910_v12 = vpop.permute.xlu1 %3909 }
 0x5b0   : > { %3984 = vst.msk [vmem:[#allocation3 + $0x54] sm:$0xf] %vm990_vm5, %v3910_v12  ;;  %v3908_v16 = vpop.permute.xlu0 %3907  ;;  %v7661_v23 = vld [vmem:[#allocation3 + $0x40] sm:$0xff]  }
 0x5b1   : > { %3983 = vst.msk [vmem:[#allocation3 + $0x50] sm:$0xf] %vm990_vm5, %v3908_v16  ;;  %3925 = vrot.lane.b32.xlu1 %v7398_v11, %s7682_s19  ;;  %7597 = vmatprep.mubr.msk.bf16.mxu1 %vm2698_vm12, %v7661_v23 }
 0x5b2   : > { %3923 = vrot.lane.b32.xlu0 %v7397_v42, %s7682_s19  ;;  %v5049_v42 = vld [vmem:[#allocation2 + $0x199] sm:$0xff] }
 0x5b3   : > { %v3914_v30 = vpop.permute.xlu1 %3913  ;;  %v7465_v25 = vpack.c.bf16 %v5049_v42, %v5049_v42 }
 0x5b4   : > { %3986 = vst.msk [vmem:[#allocation3 + $0x5c] sm:$0xf] %vm990_vm5, %v3914_v30  ;;  %v3912_v10 = vpop.permute.xlu0 %3911  ;;  %v7662_v5 = vld [vmem:[#allocation3 + $0x48] sm:$0xff]  }
 0x5b5   : > { %3985 = vst.msk [vmem:[#allocation3 + $0x58] sm:$0xf] %vm990_vm5, %v3912_v10  ;;  %3929 = vrot.lane.b32.xlu1 %v9772_v51, %s7682_s19  ;;  %7598 = vmatmul.mubr.msk.bf16.gmra.mxu1 %vm2698_vm12, %v7662_v5 }
 0x5b6   : > { %3927 = vrot.lane.b32.xlu0 %v9775_v32, %s7682_s19 }
 0x5b7   : > { %v4166_v61 = vpop.permute.xlu1 %4165 }
 0x5b8   : > { %4240 = vst.msk [vmem:[#allocation3 + $0x54] sm:$0xf] %vm1247_vm6, %v4166_v61  ;;  %v4164_v1 = vpop.permute.xlu0 %4163 }
 0x5b9   : > { %4239 = vst.msk [vmem:[#allocation3 + $0x50] sm:$0xf] %vm1247_vm6, %v4164_v1  ;;  %4181 = vrot.lane.b32.xlu1 %v9298_v0, %s7683_s20 }
 0x5ba   : > { %4179 = vrot.lane.b32.xlu0 %v9310_v57, %s7683_s20  ;;  %v4281_v57 = vld [vmem:[#allocation2 + $0x181] sm:$0xff] }
 0x5bb   : > { %v4170_v4 = vpop.permute.xlu1 %4169  ;;  %v7369_v34 = vpack.c.bf16 %v4281_v57, %v4281_v57 }
 0x5bc   : > { %4242 = vst.msk [vmem:[#allocation3 + $0x5c] sm:$0xf] %vm1247_vm6, %v4170_v4  ;;  %v4168_v6 = vpop.permute.xlu0 %4167 }
 0x5bd   : > { %4241 = vst.msk [vmem:[#allocation3 + $0x58] sm:$0xf] %vm1247_vm6, %v4168_v6  ;;  %4185 = vrot.lane.b32.xlu1 %v7338_v63, %s7683_s20 }
 0x5be   : > { %4183 = vrot.lane.b32.xlu0 %v7337_v29, %s7683_s20 }
 0x5bf   : > { %v4422_v41 = vpop.permute.xlu1 %4421 }
 0x5c0   : > { %4496 = vst.msk [vmem:[#allocation3 + $0x54] sm:$0xf] %vm1504_vm7, %v4422_v41  ;;  %v4420_v0 = vpop.permute.xlu0 %4419 }
 0x5c1   : > { %4495 = vst.msk [vmem:[#allocation3 + $0x50] sm:$0xf] %vm1504_vm7, %v4420_v0  ;;  %4437 = vrot.lane.b32.xlu1 %v9758_v39, %s7684_s21  ;;  %v7498_v39 = vpack.c.bf16 %v5306_v62, %v5306_v62 }
 0x5c2   : > { %4435 = vrot.lane.b32.xlu0 %v9761_v48, %s7684_s21  ;;  %v7497_v48 = vpack.c.bf16 %v5305_v46, %v5305_v46 }
 0x5c3   : > { %v4426_v35 = vpop.permute.xlu1 %4425 }
 0x5c4   : > { %4498 = vst.msk [vmem:[#allocation3 + $0x5c] sm:$0xf] %vm1504_vm7, %v4426_v35  ;;  %v4424_v40 = vpop.permute.xlu0 %4423 }
 0x5c5   : > { %4497 = vst.msk [vmem:[#allocation3 + $0x58] sm:$0xf] %vm1504_vm7, %v4424_v40  ;;  %4441 = vrot.lane.b32.xlu1 %v7370_v17, %s7684_s21 }
 0x5c6   : > { %4439 = vrot.lane.b32.xlu0 %v7369_v34, %s7684_s21 }
 0x5c7   : > { %v4678_v54 = vpop.permute.xlu1 %4677 }
 0x5c8   : > { %4752 = vst.msk [vmem:[#allocation3 + $0x54] sm:$0xf] %vm1761_vm8, %v4678_v54  ;;  %v4676_v47 = vpop.permute.xlu0 %4675 }
 0x5c9   : > { %4751 = vst.msk [vmem:[#allocation3 + $0x50] sm:$0xf] %vm1761_vm8, %v4676_v47  ;;  %4693 = vrot.lane.b32.xlu1 %v9772_v51, %s7685_s22 }
 0x5ca   : > { %4691 = vrot.lane.b32.xlu0 %v9775_v32, %s7685_s22 }
 0x5cb   : > { %v4682_v21 = vpop.permute.xlu1 %4681 }
 0x5cc   : > { %4754 = vst.msk [vmem:[#allocation3 + $0x5c] sm:$0xf] %vm1761_vm8, %v4682_v21  ;;  %v4680_v52 = vpop.permute.xlu0 %4679 }
 0x5cd   : > { %4753 = vst.msk [vmem:[#allocation3 + $0x58] sm:$0xf] %vm1761_vm8, %v4680_v52  ;;  %4697 = vrot.lane.b32.xlu1 %v7402_v50, %s7685_s22 }
 0x5ce   : > { %4695 = vrot.lane.b32.xlu0 %v7401_v37, %s7685_s22 }
 0x5cf   : > { %v4934_v53 = vpop.permute.xlu1 %4933 }
 0x5d0   : > { %5008 = vst.msk [vmem:[#allocation3 + $0x54] sm:$0xf] %vm2019_vm9, %v4934_v53  ;;  %v4932_v15 = vpop.permute.xlu0 %4931 }
 0x5d1   : > { %5007 = vst.msk [vmem:[#allocation3 + $0x50] sm:$0xf] %vm2019_vm9, %v4932_v15  ;;  %4949 = vrot.lane.b32.xlu1 %v7338_v63, %s7686_s23 }
 0x5d2   : > { %4947 = vrot.lane.b32.xlu0 %v7337_v29, %s7686_s23 }
 0x5d3   : > { %v4938_v27 = vpop.permute.xlu1 %4937 }
 0x5d4   : > { %5010 = vst.msk [vmem:[#allocation3 + $0x5c] sm:$0xf] %vm2019_vm9, %v4938_v27  ;;  %v4936_v49 = vpop.permute.xlu0 %4935 }
 0x5d5   : > { %5009 = vst.msk [vmem:[#allocation3 + $0x58] sm:$0xf] %vm2019_vm9, %v4936_v49  ;;  %4953 = vrot.lane.b32.xlu1 %v7434_v56, %s7686_s23 }
 0x5d6   : > { %4951 = vrot.lane.b32.xlu0 %v7433_v60, %s7686_s23 }
 0x5d7   : > { %v5190_v28 = vpop.permute.xlu1 %5189 }
 0x5d8   : > { %5264 = vst.msk [vmem:[#allocation3 + $0x54] sm:$0xf] %vm2276_vm10, %v5190_v28  ;;  %v5188_v11 = vpop.permute.xlu0 %5187 }
 0x5d9   : > { %5263 = vst.msk [vmem:[#allocation3 + $0x50] sm:$0xf] %vm2276_vm10, %v5188_v11  ;;  %5205 = vrot.lane.b32.xlu1 %v7370_v17, %s7687_s28 }
 0x5da   : > { %5203 = vrot.lane.b32.xlu0 %v7369_v34, %s7687_s28 }
 0x5db   : > { %v5194_v19 = vpop.permute.xlu1 %5193 }
 0x5dc   : > { %5266 = vst.msk [vmem:[#allocation3 + $0x5c] sm:$0xf] %vm2276_vm10, %v5194_v19  ;;  %v5192_v59 = vpop.permute.xlu0 %5191 }
 0x5dd   : > { %5265 = vst.msk [vmem:[#allocation3 + $0x58] sm:$0xf] %vm2276_vm10, %v5192_v59  ;;  %5209 = vrot.lane.b32.xlu1 %v7466_v45, %s7687_s28 }
 0x5de   : > { %5207 = vrot.lane.b32.xlu0 %v7465_v25, %s7687_s28 }
 0x5df   : > { %v5446_v13 = vpop.permute.xlu1 %5445 }
 0x5e0   : > { %5520 = vst.msk [vmem:[#allocation3 + $0x54] sm:$0xf] %vm2533_vm11, %v5446_v13  ;;  %v5444_v8 = vpop.permute.xlu0 %5443 }
 0x5e1   : > { %5519 = vst.msk [vmem:[#allocation3 + $0x50] sm:$0xf] %vm2533_vm11, %v5444_v8  ;;  %5461 = vrot.lane.b32.xlu1 %v7402_v50, %s7688_s4 }
 0x5e2   : > { %5459 = vrot.lane.b32.xlu0 %v7401_v37, %s7688_s4 }
 0x5e3   : > { %v5450_v9 = vpop.permute.xlu1 %5449 }
 0x5e4   : > { %5522 = vst.msk [vmem:[#allocation3 + $0x5c] sm:$0xf] %vm2533_vm11, %v5450_v9  ;;  %v5448_v2 = vpop.permute.xlu0 %5447 }
 0x5e5   : > { %5521 = vst.msk [vmem:[#allocation3 + $0x58] sm:$0xf] %vm2533_vm11, %v5448_v2  ;;  %5465 = vrot.lane.b32.xlu1 %v7498_v39, %s7688_s4 }
 0x5e6   : > { %5463 = vrot.lane.b32.xlu0 %v7497_v48, %s7688_s4 }
 0x5e7   : > { %v3918_v43 = vpop.permute.xlu1 %3917 }
 0x5e8   : > { %3988 = vst.msk [vmem:[#allocation3 + $0x64] sm:$0xf] %vm990_vm5, %v3918_v43  ;;  %v3916_v31 = vpop.permute.xlu0 %3915  ;;  %v7663_v58 = vld [vmem:[#allocation3 + $0x50] sm:$0xff]   ;;  %v9918_v43 = vpop.f32.mrf.mxu1 }
 0x5e9   : > { %3987 = vst.msk [vmem:[#allocation3 + $0x60] sm:$0xf] %vm990_vm5, %v3916_v31  ;;  %7601 = vmatprep.mubr.msk.bf16.mxu1 %vm2698_vm12, %v7663_v58 }
 0x5ea   : > { %v9920_v31 = vpop.f32.mrf.mxu1 }
 0x5eb   : > { %v3922_v38 = vpop.permute.xlu1 %3921 }
 0x5ec   : > { %3990 = vst.msk [vmem:[#allocation3 + $0x6c] sm:$0xf] %vm990_vm5, %v3922_v38  ;;  %v3920_v26 = vpop.permute.xlu0 %3919  ;;  %v7664_v51 = vld [vmem:[#allocation3 + $0x58] sm:$0xff]   ;;  %v9922_v58 = vpop.f32.mrf.mxu1 }
 0x5ed   : > { %3989 = vst.msk [vmem:[#allocation3 + $0x68] sm:$0xf] %vm990_vm5, %v3920_v26  ;;  %7602 = vmatmul.mubr.msk.bf16.gmra.mxu1 %vm2698_vm12, %v7664_v51 }
 0x5ee   : > { %v9924_v38 = vpop.f32.mrf.mxu1 }
 0x5ef   : > { %v4174_v14 = vpop.permute.xlu1 %4173 }
 0x5f0   : > { %4244 = vst.msk [vmem:[#allocation3 + $0x64] sm:$0xf] %vm1247_vm6, %v4174_v14  ;;  %v4172_v32 = vpop.permute.xlu0 %4171  ;;  %v9926_v26 = vpop.f32.mrf.mxu1 }
 0x5f1   : > { %4243 = vst.msk [vmem:[#allocation3 + $0x60] sm:$0xf] %vm1247_vm6, %v4172_v32 }
 0x5f2   : > { %v9928_v51 = vpop.f32.mrf.mxu1 }
 0x5f3   : > { %v4178_v55 = vpop.permute.xlu1 %4177 }
 0x5f4   : > { %4246 = vst.msk [vmem:[#allocation3 + $0x6c] sm:$0xf] %vm1247_vm6, %v4178_v55  ;;  %v4176_v20 = vpop.permute.xlu0 %4175  ;;  %v9930_v14 = vpop.f32.mrf.mxu1  ;;  %v5876_v55 = vsel %vm205_vm0, %v9924_v38, 0.0 }
 0x5f5   : > { %4245 = vst.msk [vmem:[#allocation3 + $0x68] sm:$0xf] %vm1247_vm6, %v4176_v20 }
 0x5f6   : > { %v9932_v32 = vpop.f32.mrf.mxu1 }
 0x5f7   : > { %v4430_v12 = vpop.permute.xlu1 %4429 }
 0x5f8   : > { %4500 = vst.msk [vmem:[#allocation3 + $0x64] sm:$0xf] %vm1504_vm7, %v4430_v12  ;;  %v4428_v16 = vpop.permute.xlu0 %4427  ;;  %v5875_v12 = vsel %vm205_vm0, %v9920_v31, 0.0 }
 0x5f9   : > { %4499 = vst.msk [vmem:[#allocation3 + $0x60] sm:$0xf] %vm1504_vm7, %v4428_v16  ;;  %v5877_v16 = vadd.f32 %v5876_v55, %v5875_v12 }
 0x5fb   : > { %v4434_v23 = vpop.permute.xlu1 %4433 }
 0x5fc   : > { %4502 = vst.msk [vmem:[#allocation3 + $0x6c] sm:$0xf] %vm1504_vm7, %v4434_v23  ;;  %v4432_v30 = vpop.permute.xlu0 %4431 }
 0x5fd   : > { %4501 = vst.msk [vmem:[#allocation3 + $0x68] sm:$0xf] %vm1504_vm7, %v4432_v30  ;;  %v5878_v30 = vsel %vm205_vm0, %v9918_v43, 0.0 }
 0x5ff   : > { %v4686_v10 = vpop.permute.xlu1 %4685 }
 0x600   : > { %4756 = vst.msk [vmem:[#allocation3 + $0x64] sm:$0xf] %vm1761_vm8, %v4686_v10  ;;  %v4684_v5 = vpop.permute.xlu0 %4683  ;;  %v5879_v10 = vadd.f32 %v5878_v30, %v5877_v16 }
 0x601   : > { %4755 = vst.msk [vmem:[#allocation3 + $0x60] sm:$0xf] %vm1761_vm8, %v4684_v5 }
 0x603   : > { %v4690_v61 = vpop.permute.xlu1 %4689 }
 0x604   : > { %4758 = vst.msk [vmem:[#allocation3 + $0x6c] sm:$0xf] %vm1761_vm8, %v4690_v61  ;;  %v4688_v1 = vpop.permute.xlu0 %4687  ;;  %v5880_v61 = vsel %vm205_vm0, %v9922_v58, 0.0 }
 0x605   : > { %4757 = vst.msk [vmem:[#allocation3 + $0x68] sm:$0xf] %vm1761_vm8, %v4688_v1  ;;  %v9936_v20 = vpop.f32.mrf.mxu1  ;;  %v5882_v1 = vsel %vm205_vm0, %v9928_v51, 0.0 }
 0x607   : > { %v4942_v24 = vpop.permute.xlu1 %4941  ;;  %v9940_v23 = vpop.f32.mrf.mxu1 }
 0x608   : > { %5012 = vst.msk [vmem:[#allocation3 + $0x64] sm:$0xf] %vm2019_vm9, %v4942_v24  ;;  %v4940_v3 = vpop.permute.xlu0 %4939  ;;  %v5881_v24 = vadd.f32 %v5880_v61, %v5879_v10 }
 0x609   : > { %5011 = vst.msk [vmem:[#allocation3 + $0x60] sm:$0xf] %vm2019_vm9, %v4940_v3  ;;  %v9944_v5 = vpop.f32.mrf.mxu1  ;;  %v5884_v3 = vsel %vm205_vm0, %v9932_v32, 0.0 }
 0x60b   : > { %v4946_v4 = vpop.permute.xlu1 %4945 }
 0x60c   : > { %5014 = vst.msk [vmem:[#allocation3 + $0x6c] sm:$0xf] %vm2019_vm9, %v4946_v4  ;;  %v4944_v63 = vpop.permute.xlu0 %4943  ;;  %v5883_v4 = vadd.f32 %v5882_v1, %v5881_v24 }
 0x60d   : > { %5013 = vst.msk [vmem:[#allocation3 + $0x68] sm:$0xf] %vm2019_vm9, %v4944_v63  ;;  %v9952_v63 = vpop.f32.mrf.mxu1 }
 0x60f   : > { %v5198_v6 = vpop.permute.xlu1 %5197 }
 0x610   : > { %5268 = vst.msk [vmem:[#allocation3 + $0x64] sm:$0xf] %vm2276_vm10, %v5198_v6  ;;  %v5196_v29 = vpop.permute.xlu0 %5195  ;;  %v5885_v6 = vadd.f32 %v5884_v3, %v5883_v4 }
 0x611   : > { %5267 = vst.msk [vmem:[#allocation3 + $0x60] sm:$0xf] %vm2276_vm10, %v5196_v29 }
 0x613   : > { %v5202_v41 = vpop.permute.xlu1 %5201 }
 0x614   : > { %5270 = vst.msk [vmem:[#allocation3 + $0x6c] sm:$0xf] %vm2276_vm10, %v5202_v41  ;;  %v5200_v0 = vpop.permute.xlu0 %5199  ;;  %v5886_v41 = vsel %vm205_vm0, %v9926_v26, 0.0 }
 0x615   : > { %5269 = vst.msk [vmem:[#allocation3 + $0x68] sm:$0xf] %vm2276_vm10, %v5200_v0  ;;  %v5887_v0 = vadd.f32 %v5886_v41, %v5885_v6 }
 0x617   : > { %v5454_v7 = vpop.permute.xlu1 %5453 }
 0x618   : > { %5524 = vst.msk [vmem:[#allocation3 + $0x64] sm:$0xf] %vm2533_vm11, %v5454_v7  ;;  %v5452_v57 = vpop.permute.xlu0 %5451 }
 0x619   : > { %5523 = vst.msk [vmem:[#allocation3 + $0x60] sm:$0xf] %vm2533_vm11, %v5452_v57  ;;  %v5888_v57 = vsel %vm205_vm0, %v9930_v14, 0.0 }
 0x61b   : > { %v5458_v35 = vpop.permute.xlu1 %5457 }
 0x61c   : > { %5526 = vst.msk [vmem:[#allocation3 + $0x6c] sm:$0xf] %vm2533_vm11, %v5458_v35  ;;  %v5456_v17 = vpop.permute.xlu0 %5455  ;;  %v5890_v35 = vsel %vm205_vm0, %v9940_v23, 0.0 }
 0x61d   : > { %5525 = vst.msk [vmem:[#allocation3 + $0x68] sm:$0xf] %vm2533_vm11, %v5456_v17  ;;  %v5889_v17 = vadd.f32 %v5888_v57, %v5887_v0 }
 0x61f   : > { %v3674_v40 = vpop.permute.xlu1 %3673 }
 0x620   : > { %3738 = vst.msk [vmem:[#allocation3 + $0x7c] sm:$0xf] %vm733_vm3, %v3674_v40  ;;  %v3672_v34 = vpop.permute.xlu0 %3671  ;;  %v7665_v54 = vld [vmem:[#allocation3 + $0x60] sm:$0xff]  }
 0x621   : > { %3737 = vst.msk [vmem:[#allocation3 + $0x78] sm:$0xf] %vm733_vm3, %v3672_v34  ;;  %7605 = vmatprep.mubr.msk.bf16.mxu1 %vm2698_vm12, %v7665_v54  ;;  %v5892_v34 = vsel %vm205_vm0, %v9952_v63, 0.0  ;;  %v5891_v54 = vadd.f32 %v5890_v35, %v5889_v17 }
 0x623   : > { %v3926_v47 = vpop.permute.xlu1 %3925 }
 0x624   : > { %3992 = vst.msk [vmem:[#allocation3 + $0x74] sm:$0xf] %vm990_vm5, %v3926_v47  ;;  %v3924_v18 = vpop.permute.xlu0 %3923  ;;  %v7666_v44 = vld [vmem:[#allocation3 + $0x68] sm:$0xff]   ;;  %v5893_v47 = vadd.f32 %v5892_v34, %v5891_v54 }
 0x625   : > { %3991 = vst.msk [vmem:[#allocation3 + $0x70] sm:$0xf] %vm990_vm5, %v3924_v18  ;;  %7606 = vmatmul.mubr.msk.bf16.gmra.mxu1 %vm2698_vm12, %v7666_v44 }
 0x627   : > { %v3930_v21 = vpop.permute.xlu1 %3929 }
 0x628   : > { %3994 = vst.msk [vmem:[#allocation3 + $0x7c] sm:$0xf] %vm990_vm5, %v3930_v21  ;;  %v3928_v50 = vpop.permute.xlu0 %3927  ;;  %v5894_v21 = vsel %vm205_vm0, %v9936_v20, 0.0 }
 0x629   : > { %3993 = vst.msk [vmem:[#allocation3 + $0x78] sm:$0xf] %vm990_vm5, %v3928_v50  ;;  %v5895_v50 = vadd.f32 %v5894_v21, %v5893_v47 }
 0x62b   : > { %v4182_v52 = vpop.permute.xlu1 %4181 }
 0x62c   : > { %4248 = vst.msk [vmem:[#allocation3 + $0x74] sm:$0xf] %vm1247_vm6, %v4182_v52  ;;  %v4180_v37 = vpop.permute.xlu0 %4179 }
 0x62d   : > { %4247 = vst.msk [vmem:[#allocation3 + $0x70] sm:$0xf] %vm1247_vm6, %v4180_v37  ;;  %v5896_v37 = vsel %vm205_vm0, %v9944_v5, 0.0 }
 0x62f   : > { %v4186_v53 = vpop.permute.xlu1 %4185 }
 0x630   : > { %4250 = vst.msk [vmem:[#allocation3 + $0x7c] sm:$0xf] %vm1247_vm6, %v4186_v53  ;;  %v4184_v15 = vpop.permute.xlu0 %4183 }
 0x631   : > { %4249 = vst.msk [vmem:[#allocation3 + $0x78] sm:$0xf] %vm1247_vm6, %v4184_v15  ;;  %v5897_v15 = vadd.f32 %v5896_v37, %v5895_v50 }
 0x633   : > { %v4438_v22 = vpop.permute.xlu1 %4437 }
 0x634   : > { %4504 = vst.msk [vmem:[#allocation3 + $0x74] sm:$0xf] %vm1504_vm7, %v4438_v22  ;;  %v4436_v36 = vpop.permute.xlu0 %4435 }
 0x635   : > { %4503 = vst.msk [vmem:[#allocation3 + $0x70] sm:$0xf] %vm1504_vm7, %v4436_v36 }
 0x637   : > { %v4442_v27 = vpop.permute.xlu1 %4441 }
 0x638   : > { %4506 = vst.msk [vmem:[#allocation3 + $0x7c] sm:$0xf] %vm1504_vm7, %v4442_v27  ;;  %v4440_v56 = vpop.permute.xlu0 %4439 }
 0x639   : > { %4505 = vst.msk [vmem:[#allocation3 + $0x78] sm:$0xf] %vm1504_vm7, %v4440_v56 }
 0x63b   : > { %v4694_v49 = vpop.permute.xlu1 %4693 }
 0x63c   : > { %4760 = vst.msk [vmem:[#allocation3 + $0x74] sm:$0xf] %vm1761_vm8, %v4694_v49  ;;  %v4692_v60 = vpop.permute.xlu0 %4691 }
 0x63d   : > { %4759 = vst.msk [vmem:[#allocation3 + $0x70] sm:$0xf] %vm1761_vm8, %v4692_v60  ;;  %v9954_v29 = vpop.f32.mrf.mxu1 }
 0x63e   : > { %v5902_v60 = vsel %vm205_vm0, %v9954_v29, 0.0 }
 0x63f   : > { %v4698_v28 = vpop.permute.xlu1 %4697  ;;  %v9958_v7 = vpop.f32.mrf.mxu1 }
 0x640   : > { %4762 = vst.msk [vmem:[#allocation3 + $0x7c] sm:$0xf] %vm1761_vm8, %v4698_v28  ;;  %v4696_v11 = vpop.permute.xlu0 %4695  ;;  %v5898_v53 = vsel %vm205_vm0, %v9958_v7, 0.0 }
 0x641   : > { %4761 = vst.msk [vmem:[#allocation3 + $0x78] sm:$0xf] %vm1761_vm8, %v4696_v11  ;;  %v9964_v40 = vpop.f32.mrf.mxu1  ;;  %v5899_v36 = vadd.f32 %v5898_v53, %v5897_v15 }
 0x643   : > { %v4950_v33 = vpop.permute.xlu1 %4949  ;;  %v9968_v18 = vpop.f32.mrf.mxu1 }
 0x644   : > { %5016 = vst.msk [vmem:[#allocation3 + $0x74] sm:$0xf] %vm2019_vm9, %v4950_v33  ;;  %v4948_v42 = vpop.permute.xlu0 %4947  ;;  %v5900_v22 = vsel %vm205_vm0, %v9968_v18, 0.0  ;;  %v5904_v33 = vsel %vm205_vm0, %v9964_v40, 0.0 }
 0x645   : > { %5015 = vst.msk [vmem:[#allocation3 + $0x70] sm:$0xf] %vm2019_vm9, %v4948_v42  ;;  %v5901_v56 = vadd.f32 %v5900_v22, %v5899_v36 }
 0x647   : > { %v4954_v19 = vpop.permute.xlu1 %4953  ;;  %v5903_v28 = vadd.f32 %v5902_v60, %v5901_v56 }
 0x648   : > { %5018 = vst.msk [vmem:[#allocation3 + $0x7c] sm:$0xf] %vm2019_vm9, %v4954_v19  ;;  %v4952_v45 = vpop.permute.xlu0 %4951 }
 0x649   : > { %5017 = vst.msk [vmem:[#allocation3 + $0x78] sm:$0xf] %vm2019_vm9, %v4952_v45  ;;  %v5905_v19 = vadd.f32 %v5904_v33, %v5903_v28 }
 0x64b   : > { %v5206_v59 = vpop.permute.xlu1 %5205 }
 0x64c   : > { %5272 = vst.msk [vmem:[#allocation3 + $0x74] sm:$0xf] %vm2276_vm10, %v5206_v59  ;;  %v5204_v25 = vpop.permute.xlu0 %5203 }
 0x64d   : > { %5271 = vst.msk [vmem:[#allocation3 + $0x70] sm:$0xf] %vm2276_vm10, %v5204_v25 }
 0x64f   : > { %v5210_v13 = vpop.permute.xlu1 %5209 }
 0x650   : > { %5274 = vst.msk [vmem:[#allocation3 + $0x7c] sm:$0xf] %vm2276_vm10, %v5210_v13  ;;  %v5208_v8 = vpop.permute.xlu0 %5207 }
 0x651   : > { %5273 = vst.msk [vmem:[#allocation3 + $0x78] sm:$0xf] %vm2276_vm10, %v5208_v8 }
 0x653   : > { %v5462_v62 = vpop.permute.xlu1 %5461 }
 0x654   : > { %5528 = vst.msk [vmem:[#allocation3 + $0x74] sm:$0xf] %vm2533_vm11, %v5462_v62  ;;  %v5460_v46 = vpop.permute.xlu0 %5459 }
 0x655   : > { %5527 = vst.msk [vmem:[#allocation3 + $0x70] sm:$0xf] %vm2533_vm11, %v5460_v46 }
 0x657   : > { %v5466_v9 = vpop.permute.xlu1 %5465 }
 0x658   : > { %5530 = vst.msk [vmem:[#allocation3 + $0x7c] sm:$0xf] %vm2533_vm11, %v5466_v9  ;;  %v5464_v39 = vpop.permute.xlu0 %5463 }
 0x659   : > { %5529 = vst.msk [vmem:[#allocation3 + $0x78] sm:$0xf] %vm2533_vm11, %v5464_v39 }
 0x65c   : > { %v7667_v2 = vld [vmem:[#allocation3 + $0x70] sm:$0xff]  }
 0x65d   : > { %7609 = vmatprep.mubr.msk.bf16.mxu1 %vm2698_vm12, %v7667_v2 }
 0x660   : > { %v7668_v48 = vld [vmem:[#allocation3 + $0x78] sm:$0xff]  }
 0x661   : > { %7610 = vmatmul.mubr.msk.bf16.gmra.mxu1 %vm2698_vm12, %v7668_v48 }
 0x675   : > { %v9970_v44 = vpop.f32.mrf.mxu1 }
 0x676   : > { %v5910_v62 = vsel %vm205_vm0, %v9970_v44, 0.0 }
 0x677   : > { %v9974_v52 = vpop.f32.mrf.mxu1 }
 0x678   : > { %v5906_v42 = vsel %vm205_vm0, %v9974_v52, 0.0 }
 0x679   : > { %v9982_v27 = vpop.f32.mrf.mxu1  ;;  %v5907_v25 = vadd.f32 %v5906_v42, %v5905_v19 }
 0x67a   : > { %v5912_v2 = vsel %vm205_vm0, %v9982_v27, 0.0 }
 0x67b   : > { %v9984_v49 = vpop.f32.mrf.mxu1 }
 0x67c   : > { %v5908_v59 = vsel %vm205_vm0, %v9984_v49, 0.0 }
 0x67d   : > { %v5909_v13 = vadd.f32 %v5908_v59, %v5907_v25 }
 0x67f   : > { %v5911_v46 = vadd.f32 %v5910_v62, %v5909_v13 }
 0x681   : > { %v5913_v55 = vadd.f32 %v5912_v2, %v5911_v46 }
 0x6ad   : > { %v9988_v11 = vpop.f32.mrf.mxu1 }
 0x6ae   : > { %v5918_v1 = vsel %vm205_vm0, %v9988_v11, 0.0 }
 0x6af   : > { %v9994_v45 = vpop.f32.mrf.mxu1 }
 0x6b0   : > { %v5914_v48 = vsel %vm205_vm0, %v9994_v45, 0.0 }
 0x6b1   : > { %v9998_v8 = vpop.f32.mrf.mxu1  ;;  %v5915_v16 = vadd.f32 %v5914_v48, %v5913_v55 }
 0x6b2   : > { %v5920_v4 = vsel %vm205_vm0, %v9998_v8, 0.0 }
 0x6b3   : > { %v10002_v9 = vpop.f32.mrf.mxu1 }
 0x6b4   : > { %v5916_v12 = vsel %vm205_vm0, %v10002_v9, 0.0 }
 0x6b5   : > { %v5917_v10 = vadd.f32 %v5916_v12, %v5915_v16 }
 0x6b7   : > { %v5919_v24 = vadd.f32 %v5918_v1, %v5917_v10 }
 0x6b9   : > { %v5921_v41 = vadd.f32 %v5920_v4, %v5919_v24 }
 0x6e5   : > { %v10004_v39 = vpop.f32.mrf.mxu1 }
 0x6e6   : > { %v5926_v17 = vsel %vm205_vm0, %v10004_v39, 0.0 }
 0x6e7   : > { %v10012_v30 = vpop.f32.mrf.mxu1 }
 0x6e8   : > { %v5922_v6 = vsel %vm205_vm0, %v10012_v30, 0.0 }
 0x6e9   : > { %v10014_v61 = vpop.f32.mrf.mxu1  ;;  %v5923_v57 = vadd.f32 %v5922_v6, %v5921_v41 }
 0x6ea   : > { %v5928_v21 = vsel %vm205_vm0, %v10014_v61, 0.0 }
 0x6eb   : > { %v10018_v3 = vpop.f32.mrf.mxu1 }
 0x6ec   : > { %v5924_v0 = vsel %vm205_vm0, %v10018_v3, 0.0 }
 0x6ed   : > { %v5925_v35 = vadd.f32 %v5924_v0, %v5923_v57 }
 0x6ef   : > { %v5927_v34 = vadd.f32 %v5926_v17, %v5925_v35 }
 0x6f1   : > { %v5929_v37 = vadd.f32 %v5928_v21, %v5927_v34 }
 0x721   : > { %v10028_v54 = vpop.f32.mrf.mxu1 }
 0x722   : > { %v5934_v60 = vsel %vm205_vm0, %v10028_v54, 0.0 }
 0x723   : > { %v10030_v47 = vpop.f32.mrf.mxu1 }
 0x724   : > { %v5930_v50 = vsel %vm205_vm0, %v10030_v47, 0.0 }
 0x725   : > { %v10036_v53 = vpop.f32.mrf.mxu1  ;;  %v5931_v15 = vadd.f32 %v5930_v50, %v5929_v37 }
 0x726   : > { %v5936_v33 = vsel %vm205_vm0, %v10036_v53, 0.0 }
 0x727   : > { %v10038_v22 = vpop.f32.mrf.mxu1 }
 0x728   : > { %v5932_v36 = vsel %vm205_vm0, %v10038_v22, 0.0 }
 0x729   : > { %v5933_v56 = vadd.f32 %v5932_v36, %v5931_v15 }
 0x72b   : > { %v5935_v28 = vadd.f32 %v5934_v60, %v5933_v56 }
 0x72d   : > { %v5937_v42 = vadd.f32 %v5936_v33, %v5935_v28 }
 0x72f   : > { %v5938_v19 = vrot.slane %v5937_v42, 4 }
 0x731   : > { %v5939_v59 = vadd.f32 %v5938_v19, %v5937_v42 }
 0x733   : > { %v5940_v25 = vrot.slane %v5939_v59, 2 }
 0x735   : > { %v5941_v13 = vadd.f32 %v5940_v25, %v5939_v59 }
 0x737   : > { %v5942_v62 = vrot.slane %v5941_v13, 1 }
 0x739   : > { %v5943_v46 = vadd.f32 %v5942_v62, %v5941_v13 }
 0x73b   : > { %v10046_v2 = vmul.f32 0.00390625, %v5943_v46 }
 0x73d   : > { %v10050_v48 = vsub.f32 %v9920_v31, %v10046_v2  ;;  %v10054_v55 = vsub.f32 %v9924_v38, %v10046_v2  ;;  %v10058_v12 = vsub.f32 %v9918_v43, %v10046_v2  ;;  %v10062_v16 = vsub.f32 %v9922_v58, %v10046_v2 }
 0x73e   : > { %v10070_v31 = vsub.f32 %v9928_v51, %v10046_v2  ;;  %v10076_v43 = vsub.f32 %v9932_v32, %v10046_v2  ;;  %v10084_v41 = vsub.f32 %v9926_v26, %v10046_v2  ;;  %v10091_v32 = vsub.f32 %v9930_v14, %v10046_v2 }
 0x73f   : > { %v5977_v10 = vmul.f32 %v10050_v48, %v10050_v48  ;;  %v5978_v1 = vmul.f32 %v10054_v55, %v10054_v55  ;;  %v5979_v38 = vmul.f32 %v10058_v12, %v10058_v12  ;;  %v5980_v58 = vmul.f32 %v10062_v16, %v10062_v16 }
 0x740   : > { %v5981_v51 = vmul.f32 %v10070_v31, %v10070_v31  ;;  %v5982_v35 = vmul.f32 %v10076_v43, %v10076_v43  ;;  %v10098_v26 = vsub.f32 %v9940_v23, %v10046_v2  ;;  %v5983_v21 = vmul.f32 %v10084_v41, %v10084_v41 }
 0x741   : > { %v6009_v24 = vsel %vm205_vm0, %v5977_v10, 0.0  ;;  %v6010_v4 = vsel %vm205_vm0, %v5978_v1, 0.0  ;;  %v6012_v0 = vsel %vm205_vm0, %v5979_v38, 0.0  ;;  %v6014_v17 = vsel %vm205_vm0, %v5980_v58, 0.0 }
 0x742   : > { %v6011_v6 = vadd.f32 %v6010_v4, %v6009_v24  ;;  %v6016_v50 = vsel %vm205_vm0, %v5981_v51, 0.0  ;;  %v10105_v14 = vsub.f32 %v9952_v63, %v10046_v2  ;;  %v5984_v15 = vmul.f32 %v10091_v32, %v10091_v32 }
 0x743   : > { %v6018_v36 = vsel %vm205_vm0, %v5982_v35, 0.0  ;;  %v10112_v23 = vsub.f32 %v9936_v20, %v10046_v2  ;;  %v5985_v60 = vmul.f32 %v10098_v26, %v10098_v26  ;;  %v6020_v28 = vsel %vm205_vm0, %v5983_v21, 0.0 }
 0x744   : > { %v6013_v57 = vadd.f32 %v6012_v0, %v6011_v6  ;;  %v10119_v63 = vsub.f32 %v9944_v5, %v10046_v2  ;;  %v5986_v42 = vmul.f32 %v10105_v14, %v10105_v14  ;;  %v6022_v19 = vsel %vm205_vm0, %v5984_v15, 0.0 }
 0x745   : > { %v10126_v20 = vsub.f32 %v9958_v7, %v10046_v2  ;;  %v5987_v25 = vmul.f32 %v10112_v23, %v10112_v23  ;;  %v6024_v13 = vsel %vm205_vm0, %v5985_v60, 0.0  ;;  %v10133_v5 = vsub.f32 %v9968_v18, %v10046_v2 }
 0x746   : > { %v6015_v34 = vadd.f32 %v6014_v17, %v6013_v57  ;;  %v5988_v46 = vmul.f32 %v10119_v63, %v10119_v63  ;;  %v6026_v10 = vsel %vm205_vm0, %v5986_v42, 0.0  ;;  %v10140_v7 = vsub.f32 %v9954_v29, %v10046_v2 }
 0x747   : > { %v5989_v38 = vmul.f32 %v10126_v20, %v10126_v20  ;;  %v6028_v58 = vsel %vm205_vm0, %v5987_v25, 0.0  ;;  %v10147_v18 = vsub.f32 %v9964_v40, %v10046_v2  ;;  %v5990_v4 = vmul.f32 %v10133_v5, %v10133_v5 }
 0x748   : > { %v6017_v37 = vadd.f32 %v6016_v50, %v6015_v34  ;;  %v6030_v6 = vsel %vm205_vm0, %v5988_v46, 0.0  ;;  %v10154_v29 = vsub.f32 %v9974_v52, %v10046_v2  ;;  %v5991_v0 = vmul.f32 %v10140_v7, %v10140_v7 }
 0x749   : > { %v6032_v57 = vsel %vm205_vm0, %v5989_v38, 0.0  ;;  %v10161_v40 = vsub.f32 %v9984_v49, %v10046_v2  ;;  %v5992_v17 = vmul.f32 %v10147_v18, %v10147_v18  ;;  %v6034_v34 = vsel %vm205_vm0, %v5990_v4, 0.0 }
 0x74a   : > { %v6019_v56 = vadd.f32 %v6018_v36, %v6017_v37  ;;  %v10168_v52 = vsub.f32 %v9970_v44, %v10046_v2  ;;  %v5993_v50 = vmul.f32 %v10154_v29, %v10154_v29  ;;  %v6036_v37 = vsel %vm205_vm0, %v5991_v0, 0.0 }
 0x74b   : > { %v10175_v49 = vsub.f32 %v9982_v27, %v10046_v2  ;;  %v5994_v36 = vmul.f32 %v10161_v40, %v10161_v40  ;;  %v10182_v44 = vsub.f32 %v9994_v45, %v10046_v2  ;;  %v10189_v27 = vsub.f32 %v10002_v9, %v10046_v2 }
 0x74c   : > { %v6021_v33 = vadd.f32 %v6020_v28, %v6019_v56  ;;  %v6038_v56 = vsel %vm205_vm0, %v5992_v17, 0.0  ;;  %v5995_v28 = vmul.f32 %v10168_v52, %v10168_v52  ;;  %v10196_v45 = vsub.f32 %v9988_v11, %v10046_v2 }
 0x74d   : > { %v10203_v9 = vsub.f32 %v9998_v8, %v10046_v2  ;;  %v10210_v11 = vsub.f32 %v10012_v30, %v10046_v2  ;;  %v10217_v8 = vsub.f32 %v10018_v3, %v10046_v2  ;;  %v10224_v30 = vsub.f32 %v10004_v39, %v10046_v2 }
 0x74e   : > { %v6023_v59 = vadd.f32 %v6022_v19, %v6021_v33  ;;  %v6040_v33 = vsel %vm205_vm0, %v5993_v50, 0.0  ;;  %v5996_v19 = vmul.f32 %v10175_v49, %v10175_v49  ;;  %v10231_v3 = vsub.f32 %v10014_v61, %v10046_v2 }
 0x74f   : > { %v10238_v39 = vsub.f32 %v10030_v47, %v10046_v2  ;;  %v10245_v61 = vsub.f32 %v10038_v22, %v10046_v2  ;;  %v10252_v47 = vsub.f32 %v10028_v54, %v10046_v2  ;;  %v10259_v22 = vsub.f32 %v10036_v53, %v10046_v2 }
 0x750   : > { %v6025_v62 = vadd.f32 %v6024_v13, %v6023_v59  ;;  %v6042_v59 = vsel %vm205_vm0, %v5994_v36, 0.0  ;;  %v5997_v13 = vmul.f32 %v10182_v44, %v10182_v44 }
 0x751   : > { %v6007_v54 = vmul.f32 %v10252_v47, %v10252_v47 }
 0x752   : > { %v6027_v1 = vadd.f32 %v6026_v10, %v6025_v62  ;;  %v6044_v62 = vsel %vm205_vm0, %v5995_v28, 0.0  ;;  %v5998_v10 = vmul.f32 %v10189_v27, %v10189_v27 }
 0x753   : > { %v6068_v53 = vsel %vm205_vm0, %v6007_v54, 0.0  ;;  %v6122_v54 = vld [vmem:[%s7725_s17 + $0x48] sm:$0xff] }
 0x754   : > { %v6029_v24 = vadd.f32 %v6028_v58, %v6027_v1  ;;  %v6046_v1 = vsel %vm205_vm0, %v5996_v19, 0.0  ;;  %v5999_v58 = vmul.f32 %v10196_v45, %v10196_v45 }
 0x756   : > { %v6031_v51 = vadd.f32 %v6030_v6, %v6029_v24  ;;  %v6048_v24 = vsel %vm205_vm0, %v5997_v13, 0.0  ;;  %v6000_v6 = vmul.f32 %v10203_v9, %v10203_v9 }
 0x758   : > { %v6033_v35 = vadd.f32 %v6032_v57, %v6031_v51  ;;  %v6050_v51 = vsel %vm205_vm0, %v5998_v10, 0.0  ;;  %v6001_v57 = vmul.f32 %v10210_v11, %v10210_v11  ;;  %v6008_v10 = vmul.f32 %v10259_v22, %v10259_v22 }
 0x75a   : > { %v6035_v21 = vadd.f32 %v6034_v34, %v6033_v35  ;;  %v6052_v35 = vsel %vm205_vm0, %v5999_v58, 0.0  ;;  %v6002_v34 = vmul.f32 %v10217_v8, %v10217_v8  ;;  %v6070_v58 = vsel %vm205_vm0, %v6008_v10, 0.0  ;;  %v6125_v10 = vld [vmem:[%s7725_s17 + $0x60] sm:$0xff] }
 0x75c   : > { %v6037_v15 = vadd.f32 %v6036_v37, %v6035_v21  ;;  %v6054_v21 = vsel %vm205_vm0, %v6000_v6, 0.0  ;;  %v6003_v37 = vmul.f32 %v10224_v30, %v10224_v30 }
 0x75e   : > { %v6039_v60 = vadd.f32 %v6038_v56, %v6037_v15  ;;  %v6056_v15 = vsel %vm205_vm0, %v6001_v57, 0.0  ;;  %v6004_v56 = vmul.f32 %v10231_v3, %v10231_v3 }
 0x760   : > { %v6041_v42 = vadd.f32 %v6040_v33, %v6039_v60  ;;  %v6058_v60 = vsel %vm205_vm0, %v6002_v34, 0.0  ;;  %v6005_v33 = vmul.f32 %v10238_v39, %v10238_v39 }
 0x762   : > { %v6043_v25 = vadd.f32 %v6042_v59, %v6041_v42  ;;  %v6060_v42 = vsel %vm205_vm0, %v6003_v37, 0.0  ;;  %v6006_v59 = vmul.f32 %v10245_v61, %v10245_v61 }
 0x764   : > { %v6045_v46 = vadd.f32 %v6044_v62, %v6043_v25  ;;  %v6062_v25 = vsel %vm205_vm0, %v6004_v56, 0.0  ;;  %v6064_v62 = vsel %vm205_vm0, %v6005_v33, 0.0 }
 0x766   : > { %v6047_v38 = vadd.f32 %v6046_v1, %v6045_v46  ;;  %v6066_v1 = vsel %vm205_vm0, %v6006_v59, 0.0  ;;  %v6119_v59 = vld [vmem:[%s7725_s17 + $0x30] sm:$0xff] }
 0x768   : > { %v6049_v4 = vadd.f32 %v6048_v24, %v6047_v38 }
 0x76a   : > { %v6051_v0 = vadd.f32 %v6050_v51, %v6049_v4 }
 0x76c   : > { %v6053_v17 = vadd.f32 %v6052_v35, %v6051_v0 }
 0x76e   : > { %v6055_v50 = vadd.f32 %v6054_v21, %v6053_v17 }
 0x770   : > { %v6057_v36 = vadd.f32 %v6056_v15, %v6055_v50 }
 0x772   : > { %v6059_v28 = vadd.f32 %v6058_v60, %v6057_v36 }
 0x774   : > { %v6061_v19 = vadd.f32 %v6060_v42, %v6059_v28 }
 0x776   : > { %v6063_v13 = vadd.f32 %v6062_v25, %v6061_v19  ;;  %v6118_v19 = vld [vmem:[%s7725_s17 + $0x28] sm:$0xff]  ;;  %v6120_v25 = vld [vmem:[%s7725_s17 + $0x38] sm:$0xff] }
 0x778   : > { %v6065_v46 = vadd.f32 %v6064_v62, %v6063_v13  ;;  %v6121_v13 = vld [vmem:[%s7725_s17 + $0x40] sm:$0xff]  ;;  %v6123_v62 = vld [vmem:[%s7725_s17 + $0x50] sm:$0xff] }
 0x77a   : > { %v6067_v38 = vadd.f32 %v6066_v1, %v6065_v46  ;;  %v6126_v1 = vld [vmem:[%s7725_s17 + $0x68] sm:$0xff] }
 0x77c   : > { %v6069_v2 = vadd.f32 %v6068_v53, %v6067_v38  ;;  %v6127_v38 = vld [vmem:[%s7725_s17 + $0x70] sm:$0xff]  ;;  %v6128_v53 = vld [vmem:[%s7725_s17 + $0x78] sm:$0xff] }
 0x77e   : > { %v6071_v24 = vadd.f32 %v6070_v58, %v6069_v2  ;;  %v6129_v2 = vld [vmem:[%s7725_s17 + $0x80] sm:$0xff]  ;;  %v6130_v58 = vld [vmem:[%s7725_s17 + $0x88] sm:$0xff] }
 0x780   : > { %v6072_v4 = vrot.slane %v6071_v24, 4 }
 0x782   : > { %v6073_v6 = vadd.f32 %v6072_v4, %v6071_v24  ;;  %v6131_v24 = vld [vmem:[%s7725_s17 + $0x90] sm:$0xff] }
 0x784   : > { %v6074_v51 = vrot.slane %v6073_v6, 2 }
 0x786   : > { %v6075_v0 = vadd.f32 %v6074_v51, %v6073_v6 }
 0x788   : > { %v6076_v57 = vrot.slane %v6075_v0, 1 }
 0x78a   : > { %v6077_v35 = vadd.f32 %v6076_v57, %v6075_v0  ;;  %v6134_v0 = vld [vmem:[%s7725_s17 + $0xa8] sm:$0xff] }
 0x78c   : > { %v6078_v17 = vmul.f32 0.00390625, %v6077_v35 }
 0x78e   : > { %v6079_v34 = vadd.f32 1e-05, %v6078_v17 }
 0x790   : > { %7671 = vrsqrt.f32 %v6079_v34 }
 0x79d   : > { %v7672_v21 = vpop.eup %7671 }
 0x79e   : > { %v6081_v50 = vmul.f32 %v7672_v21, %v10050_v48  ;;  %v6082_v37 = vmul.f32 %v7672_v21, %v10054_v55  ;;  %v6083_v15 = vmul.f32 %v7672_v21, %v10058_v12  ;;  %v6084_v36 = vmul.f32 %v7672_v21, %v10062_v16 }
 0x79f   : > { %v6085_v56 = vmul.f32 %v7672_v21, %v10070_v31  ;;  %v6086_v60 = vmul.f32 %v7672_v21, %v10076_v43  ;;  %v6087_v28 = vmul.f32 %v7672_v21, %v10084_v41  ;;  %v6088_v33 = vmul.f32 %v7672_v21, %v10091_v32 }
 0x7a0   : > { %v6089_v48 = vmul.f32 %v7672_v21, %v10098_v26  ;;  %v6090_v55 = vmul.f32 %v7672_v21, %v10105_v14  ;;  %v6091_v12 = vmul.f32 %v7672_v21, %v10112_v23  ;;  %v6092_v16 = vmul.f32 %v7672_v21, %v10119_v63  ;;  %v6113_v26 = vld [vmem:[%s7725_s17] sm:$0xff]  ;;  %v6114_v14 = vld [vmem:[%s7725_s17 + $0x8] sm:$0xff]  ;;  %v6115_v23 = vld [vmem:[%s7725_s17 + $0x10] sm:$0xff] }
 0x7a1   : > { %v10285_v31 = vmul.f32 %v7672_v21, %v10126_v20  ;;  %v10288_v43 = vmul.f32 %v7672_v21, %v10133_v5  ;;  %v10291_v41 = vmul.f32 %v7672_v21, %v10140_v7  ;;  %v10294_v32 = vmul.f32 %v7672_v21, %v10147_v18  ;;  %v6116_v63 = vld [vmem:[%s7725_s17 + $0x18] sm:$0xff]  ;;  %v6117_v18 = vld [vmem:[%s7725_s17 + $0x20] sm:$0xff] }
 0x7a2   : > { %v10301_v42 = vmul.f32 %v7672_v21, %v10154_v29  ;;  %v10304_v20 = vmul.f32 %v7672_v21, %v10161_v40  ;;  %v10307_v5 = vmul.f32 %v7672_v21, %v10168_v52  ;;  %v10310_v7 = vmul.f32 %v7672_v21, %v10175_v49 }
 0x7a3   : > { %v10317_v29 = vmul.f32 %v7672_v21, %v10182_v44  ;;  %v10320_v40 = vmul.f32 %v7672_v21, %v10189_v27  ;;  %v10323_v52 = vmul.f32 %v7672_v21, %v10196_v45  ;;  %v10326_v49 = vmul.f32 %v7672_v21, %v10203_v9  ;;  %v6124_v9 = vld [vmem:[%s7725_s17 + $0x58] sm:$0xff] }
 0x7a4   : > { %v10332_v46 = vmul.f32 %v7672_v21, %v10210_v11  ;;  %v10335_v44 = vmul.f32 %v7672_v21, %v10217_v8  ;;  %v10338_v27 = vmul.f32 %v7672_v21, %v10224_v30  ;;  %v10341_v45 = vmul.f32 %v7672_v21, %v10231_v3 }
 0x7a5   : > { %v10354_v11 = vmul.f32 %v7672_v21, %v10238_v39  ;;  %v10357_v8 = vmul.f32 %v7672_v21, %v10245_v61  ;;  %v10360_v30 = vmul.f32 %v7672_v21, %v10252_v47  ;;  %v10363_v3 = vmul.f32 %v7672_v21, %v10259_v22  ;;  %v6132_v39 = vld [vmem:[%s7725_s17 + $0x98] sm:$0xff]  ;;  %v6133_v47 = vld [vmem:[%s7725_s17 + $0xa0] sm:$0xff]  ;;  %v6135_v22 = vld [vmem:[%s7725_s17 + $0xb0] sm:$0xff] }
 0x7a6   : > { %v6145_v4 = vadd.f32 %v6113_v26, %v6081_v50  ;;  %v6146_v6 = vadd.f32 %v6114_v14, %v6082_v37  ;;  %v6147_v51 = vadd.f32 %v6115_v23, %v6083_v15  ;;  %v6148_v61 = vadd.f32 %v6116_v63, %v6084_v36  ;;  %v6136_v21 = vld [vmem:[%s7725_s17 + $0xb8] sm:$0xff]  ;;  %v6138_v50 = vld [vmem:[%s7725_s17 + $0xc8] sm:$0xff] }
 0x7a7   : > { %10474 = vst [vmem:[#allocation4_spill] sm:$0xff] %v10363_v3  ;;  %v6149_v57 = vadd.f32 %v6117_v18, %v6085_v56  ;;  %v6150_v35 = vadd.f32 %v6118_v19, %v6086_v60  ;;  %v6151_v17 = vadd.f32 %v6119_v59, %v6087_v28  ;;  %v6152_v34 = vadd.f32 %v6120_v25, %v6088_v33  ;;  %v6137_v3 = vld [vmem:[%s7725_s17 + $0xc0] sm:$0xff]  ;;  %v6139_v56 = vld [vmem:[%s7725_s17 + $0xd0] sm:$0xff]  ;;  %v6140_v60 = vld [vmem:[%s7725_s17 + $0xd8] sm:$0xff] }
 0x7a8   : > { %v6153_v37 = vadd.f32 %v6121_v13, %v6089_v48  ;;  %v6154_v15 = vadd.f32 %v6122_v54, %v6090_v55  ;;  %v6155_v36 = vadd.f32 %v6123_v62, %v6091_v12  ;;  %v6156_v26 = vadd.f32 %v6124_v9, %v6092_v16  ;;  %6177 = vst.msk [vmem:[%s10351_s16] sm:$0xff] %vm205_vm0, %v6145_v4  ;;  %v6141_v28 = vld [vmem:[%s7725_s17 + $0xe0] sm:$0xff]  ;;  %v6142_v16 = vld [vmem:[%s7725_s17 + $0xe8] sm:$0xff] }
 0x7a9   : > { %6178 = vst.msk [vmem:[%s10351_s16 + $0x8] sm:$0xff] %vm205_vm0, %v6146_v6  ;;  %6179 = vst.msk [vmem:[%s10351_s16 + $0x10] sm:$0xff] %vm205_vm0, %v6147_v51  ;;  %v6157_v33 = vadd.f32 %v6125_v10, %v10285_v31  ;;  %v6158_v48 = vadd.f32 %v6126_v1, %v10288_v43  ;;  %v6159_v55 = vadd.f32 %v6127_v38, %v10291_v41  ;;  %v6143_v31 = vld [vmem:[%s7725_s17 + $0xf0] sm:$0xff]  ;;  %v6144_v43 = vld [vmem:[%s7725_s17 + $0xf8] sm:$0xff] }
 0x7aa   : > { %6180 = vst.msk [vmem:[%s10351_s16 + $0x18] sm:$0xff] %vm205_vm0, %v6148_v61  ;;  %v6160_v12 = vadd.f32 %v6128_v53, %v10294_v32  ;;  %6181 = vst.msk [vmem:[%s10351_s16 + $0x20] sm:$0xff] %vm205_vm0, %v6149_v57  ;;  %v6161_v41 = vadd.f32 %v6129_v2, %v10301_v42  ;;  %v6162_v14 = vadd.f32 %v6130_v58, %v10304_v20 }
 0x7ab   : > { %6182 = vst.msk [vmem:[%s10351_s16 + $0x28] sm:$0xff] %vm205_vm0, %v6150_v35  ;;  %6183 = vst.msk [vmem:[%s10351_s16 + $0x30] sm:$0xff] %vm205_vm0, %v6151_v17  ;;  %v6163_v32 = vadd.f32 %v6131_v24, %v10307_v5  ;;  %v6164_v23 = vadd.f32 %v6132_v39, %v10310_v7  ;;  %v6165_v63 = vadd.f32 %v6133_v47, %v10317_v29 }
 0x7ac   : > { %6184 = vst.msk [vmem:[%s10351_s16 + $0x38] sm:$0xff] %vm205_vm0, %v6152_v34  ;;  %6185 = vst.msk [vmem:[%s10351_s16 + $0x40] sm:$0xff] %vm205_vm0, %v6153_v37  ;;  %v6166_v42 = vadd.f32 %v6134_v0, %v10320_v40  ;;  %v6167_v20 = vadd.f32 %v6135_v22, %v10323_v52  ;;  %v6168_v5 = vadd.f32 %v6136_v21, %v10326_v49 }
 0x7ad   : > { %6186 = vst.msk [vmem:[%s10351_s16 + $0x48] sm:$0xff] %vm205_vm0, %v6154_v15  ;;  %6187 = vst.msk [vmem:[%s10351_s16 + $0x50] sm:$0xff] %vm205_vm0, %v6155_v36  ;;  %v6169_v7 = vadd.f32 %v6137_v3, %v10332_v46  ;;  %v6170_v18 = vadd.f32 %v6138_v50, %v10335_v44  ;;  %v6171_v19 = vadd.f32 %v6139_v56, %v10338_v27 }
 0x7ae   : > { %6188 = vst.msk [vmem:[%s10351_s16 + $0x58] sm:$0xff] %vm205_vm0, %v6156_v26  ;;  %6189 = vst.msk [vmem:[%s10351_s16 + $0x60] sm:$0xff] %vm205_vm0, %v6157_v33  ;;  %v6172_v59 = vadd.f32 %v6140_v60, %v10341_v45  ;;  %v6173_v25 = vadd.f32 %v6141_v28, %v10354_v11  ;;  %v6174_v29 = vadd.f32 %v6142_v16, %v10357_v8  ;;  %v10475_v52 = vld [vmem:[#allocation4_spill] sm:$0xff] }
 0x7af   : > { %6190 = vst.msk [vmem:[%s10351_s16 + $0x68] sm:$0xff] %vm205_vm0, %v6158_v48  ;;  %6191 = vst.msk [vmem:[%s10351_s16 + $0x70] sm:$0xff] %vm205_vm0, %v6159_v55  ;;  %v6175_v40 = vadd.f32 %v6143_v31, %v10360_v30  ;;  %v6176_v49 = vadd.f32 %v6144_v43, %v10475_v52 }
 0x7b0   : > { %6192 = vst.msk [vmem:[%s10351_s16 + $0x78] sm:$0xff] %vm205_vm0, %v6160_v12  ;;  %6193 = vst.msk [vmem:[%s10351_s16 + $0x80] sm:$0xff] %vm205_vm0, %v6161_v41 }
 0x7b1   : > { %6194 = vst.msk [vmem:[%s10351_s16 + $0x88] sm:$0xff] %vm205_vm0, %v6162_v14  ;;  %6195 = vst.msk [vmem:[%s10351_s16 + $0x90] sm:$0xff] %vm205_vm0, %v6163_v32 }
 0x7b2   : > { %6196 = vst.msk [vmem:[%s10351_s16 + $0x98] sm:$0xff] %vm205_vm0, %v6164_v23  ;;  %6197 = vst.msk [vmem:[%s10351_s16 + $0xa0] sm:$0xff] %vm205_vm0, %v6165_v63 }
 0x7b3   : > { %6198 = vst.msk [vmem:[%s10351_s16 + $0xa8] sm:$0xff] %vm205_vm0, %v6166_v42  ;;  %6199 = vst.msk [vmem:[%s10351_s16 + $0xb0] sm:$0xff] %vm205_vm0, %v6167_v20 }
 0x7b4   : > { %6200 = vst.msk [vmem:[%s10351_s16 + $0xb8] sm:$0xff] %vm205_vm0, %v6168_v5  ;;  %6201 = vst.msk [vmem:[%s10351_s16 + $0xc0] sm:$0xff] %vm205_vm0, %v6169_v7 }
 0x7b5   : > { %6202 = vst.msk [vmem:[%s10351_s16 + $0xc8] sm:$0xff] %vm205_vm0, %v6170_v18  ;;  %6203 = vst.msk [vmem:[%s10351_s16 + $0xd0] sm:$0xff] %vm205_vm0, %v6171_v19 }
 0x7b6   : > { %6204 = vst.msk [vmem:[%s10351_s16 + $0xd8] sm:$0xff] %vm205_vm0, %v6172_v59  ;;  %6205 = vst.msk [vmem:[%s10351_s16 + $0xe0] sm:$0xff] %vm205_vm0, %v6173_v25 }
 0x7b7   : > { %6206 = vst.msk [vmem:[%s10351_s16 + $0xe8] sm:$0xff] %vm205_vm0, %v6174_v29  ;;  %6207 = vst.msk [vmem:[%s10351_s16 + $0xf0] sm:$0xff] %vm205_vm0, %v6175_v40 }
 0x7b8   : > { %6208 = vst.msk [vmem:[%s10351_s16 + $0xf8] sm:$0xff] %vm205_vm0, %v6176_v49 }
 0x7b9 PF: > { %s13_s12 = sadd.s32 1, %s7679_s12  }
 0x7ba   : > { %p10_p4 = scmp.ge.s32.totalorder %s13_s12, 4  }
 0x7bc   :  { %12 = sbr.rel (!%p10_p4) target bundleno = 1 (0x1), region = 65 }

</bundles_post_ra>
